<compile_context>
chip_gen: v6e
topology: v6e:2x2x1
jax: 0.10.0
libtpu: 0.0.40
codegen_flags: <defaults>
</compile_context>

<pallas_src>
import functools

import jax
import jax.numpy as jnp
from jax import lax
from jax.experimental import pallas as pl
from jax.experimental.pallas import tpu as pltpu


# ----------------------------------------------------------------------------
# host-side static helpers
# ----------------------------------------------------------------------------
def _resize_matrix_ac_true(out_size, in_size):
    """Bilinear align_corners=True interpolation matrix (out_size, in_size)."""
    if out_size == 1:
        src = jnp.zeros((1,), jnp.float32)
    else:
        src = jnp.arange(out_size, dtype=jnp.float32) * ((in_size - 1) / (out_size - 1))
    cols = jnp.arange(in_size, dtype=jnp.float32)
    return jnp.maximum(0.0, 1.0 - jnp.abs(src[:, None] - cols[None, :]))


def _static_grid_tensors(h, w):
    """Delta-independent per-pixel tensors, flattened row-major over (h, w)."""
    col = jnp.tile(jnp.arange(w, dtype=jnp.float32)[None, :], (h, 1)).reshape(1, h * w)
    row = jnp.tile(jnp.arange(h, dtype=jnp.float32)[:, None], (1, w)).reshape(1, h * w)
    sx = w / (w - 1) if w > 1 else 0.0
    sy = h / (h - 1) if h > 1 else 0.0
    # grid_sample (align_corners=False):  x_pix = ((x_norm+1)*W - 1)/2,
    # x_norm = -1 + 2*j/(W-1) + dx/W   ==>   x_pix = j*W/(W-1) - 0.5 + dx/2
    pos = jnp.concatenate([col * sx - 0.5, row * sy - 0.5], axis=0)      # (2, HW)
    # validity masks for the 9 conv3x3 taps (zero padding), tap order (dy, dx) row-major
    masks = []
    for dy in (-1, 0, 1):
        for dx in (-1, 0, 1):
            ok = ((row + dy >= 0) & (row + dy <= h - 1) &
                  (col + dx >= 0) & (col + dx <= w - 1))
            masks.append(ok.astype(jnp.float32))
    tapmask = jnp.concatenate(masks, axis=0)                             # (9, HW)
    return pos, tapmask


def _const_spec(arr):
    """Full-array, grid-invariant (resident) BlockSpec for a small constant."""
    return pl.BlockSpec(arr.shape, lambda i, nd=arr.ndim: (0,) * nd)


# ----------------------------------------------------------------------------
# fused kernel: channel-major, B images stacked along the lane axis (C, B*HW)
# ----------------------------------------------------------------------------
def _upsample_fused_kernel(low_ref, high_ref, rxE_ref, ryE_ref, pos_ref, mask_ref,
                           dbias_ref, w1l_ref, w1h_ref, w2t_ref, o_ref, hup_ref,
                           *, C, H, W, H2, W2, B):
    f32 = jnp.float32
    HW = H * W
    HW2 = H2 * W2
    L = B * HW
    cdt = w1l_ref.dtype            # compute (MXU-operand) dtype: bf16 or f32

    # ---- 1. bilinear resize of `high` to (H, W), align_corners=True ------------
    # Separable hat-matrix contraction done per (image, source-row) slab so the lane
    # layout never changes (no in-kernel reshapes) and only one (C, HW) accumulator
    # is live per iteration; slabs are re-read from the VMEM block each step.
    rxE = rxE_ref[...]                                                    # (W2, HW)
    for b in range(B):
        acc = jnp.zeros((C, HW), f32)
        for p in range(H2):
            slab = high_ref[:, b * HW2 + p * W2:b * HW2 + (p + 1) * W2]   # (C, W2)
            contrib = jnp.dot(slab, rxE, preferred_element_type=f32)      # (C, HW)
            acc = acc + contrib * ryE_ref[p:p + 1, :]
        hup_ref[:, b * HW:(b + 1) * HW] = acc.astype(hup_ref.dtype)

    # ---- 2+3. both 1x1 convs + folded BatchNorm; concat never materialized -----
    # TODO(synk): BatchNorm uses running statistics (eval mode), not batch stats.
    # The 1x1/BN bias is linear through the 3x3 conv and is pre-folded into dbias.
    y = (jnp.dot(w1l_ref[...], low_ref[...], preferred_element_type=f32) +
         jnp.dot(w1h_ref[...], hup_ref[...], preferred_element_type=f32))
    y = y.astype(cdt)                                                     # (2C, B*HW)

    # ---- 4. both 3x3 convs: 9 accumulated (4, 2C)@(2C, B*HW) GEMMs --------------
    # Taps via lane rolls + precomputed boundary masks (masks also kill wrap-around
    # between images stacked on the lane axis).  Center tap needs no roll/mask.
    delta = dbias_ref[...]                                                # (4, B*HW) f32
    tap = 0
    for dy in (-1, 0, 1):
        for dx in (-1, 0, 1):
            off = dy * W + dx
            if off == 0:
                ytap = y
            else:
                ytap = pltpu.roll(y, (-off) % L, 1) * mask_ref[tap:tap + 1, :]
            delta = delta + jnp.dot(w2t_ref[tap], ytap, preferred_element_type=f32)
            tap += 1
    # rows of delta: [dx1, dy1, dx2, dy2]

    # ---- 5. grid_sample(high_up, delta1) + grid_sample(low, delta2) -------------
    # bilinear, padding_mode='zeros', align_corners=False.  Per (image, source-row)
    # slab: (C, W)@(W, HW) on the MXU; the old (C*H, HW) intermediate never exists.
    # TODO(synk): for large W, restrict wx to a banded column window from max|delta|
    # instead of the dense (W, HW) hat matrix.
    pos = pos_ref[...]                                                    # (2, HW) f32
    xb, yb = pos[0:1, :], pos[1:2, :]
    qcol = lax.broadcasted_iota(jnp.int32, (W, HW), 0).astype(f32)

    for b in range(B):
        lo = b * HW
        out_b = jnp.zeros((C, HW), f32)
        for img_ref, drow in ((hup_ref, 0), (low_ref, 2)):   # (sampled image, delta rows)
            xpix = xb + 0.5 * delta[drow:drow + 1, lo:lo + HW]
            ypix = yb + 0.5 * delta[drow + 1:drow + 2, lo:lo + HW]
            wx = jnp.maximum(0.0, 1.0 - jnp.abs(xpix - qcol)).astype(cdt)  # (W, HW)
            for p in range(H):
                slab = img_ref[:, lo + p * W:lo + (p + 1) * W]             # (C, W)
                contrib = jnp.dot(slab, wx, preferred_element_type=f32)    # (C, HW)
                wyp = jnp.maximum(0.0, 1.0 - jnp.abs(ypix - float(p)))     # (1, HW)
                out_b = out_b + contrib * wyp
        o_ref[:, lo:lo + HW] = out_b.astype(o_ref.dtype)


# ----------------------------------------------------------------------------
# parameters (torch-module-shaped) and packing into kernel-ready arrays
# ----------------------------------------------------------------------------
def init_params(key, c):
    eps = 1e-5

    def branch(k):
        kk = jax.random.split(k, 7)
        return dict(
            w1=0.1 * jax.random.normal(kk[0], (c, 2 * c), jnp.float32),    # 1x1 conv (out,in), no bias
            gamma=1.0 + 0.1 * jax.random.normal(kk[1], (c,), jnp.float32),
            beta=0.1 * jax.random.normal(kk[2], (c,), jnp.float32),
            rmean=0.1 * jax.random.normal(kk[3], (c,), jnp.float32),
            rvar=1.0 + 0.1 * jnp.abs(jax.random.normal(kk[4], (c,), jnp.float32)),
            eps=eps,
            w2=0.1 * jax.random.normal(kk[5], (2, c, 3, 3), jnp.float32),  # 3x3 conv, OIHW
            b2=0.1 * jax.random.normal(kk[6], (2,), jnp.float32),
        )

    k1, k2 = jax.random.split(key)
    return dict(gen1=branch(k1), gen2=branch(k2))


def _pack_params(params, c, tapmask):
    def fold(p):
        scale = p['gamma'] * lax.rsqrt(p['rvar'] + p['eps'])
        bias = p['beta'] - p['rmean'] * scale
        return p['w1'] * scale[:, None], bias                          # BN folded into 1x1

    w1a, b1a = fold(params['gen1'])                                    # (c, 2c), (c,)
    w1b, b1b = fold(params['gen2'])
    w1l = jnp.concatenate([w1a[:, :c], w1b[:, :c]], axis=0)            # (2c, c): acts on low
    w1h = jnp.concatenate([w1a[:, c:], w1b[:, c:]], axis=0)            # (2c, c): acts on high_up
    b1 = jnp.concatenate([b1a, b1b])                                   # (2c,)

    # per-tap 3x3 weights, tap t = (dy+1)*3 + (dx+1), block structure over both branches
    w2taps = jnp.zeros((9, 4, 2 * c), jnp.float32)
    w2taps = w2taps.at[:, 0:2, 0:c].set(
        params['gen1']['w2'].transpose(2, 3, 0, 1).reshape(9, 2, c))
    w2taps = w2taps.at[:, 2:4, c:2 * c].set(
        params['gen2']['w2'].transpose(2, 3, 0, 1).reshape(9, 2, c))
    b2 = jnp.concatenate([params['gen1']['b2'], params['gen2']['b2']])  # (4,)

    # fold the 1x1(+BN) bias and the 3x3 bias into one spatial delta-bias map:
    #   dbias = sum_t (W2_t @ b1) * tapmask_t + b2       (zero padding => masked taps)
    per_tap = jnp.einsum('tom,m->to', w2taps, b1)                       # (9, 4)
    dbias = jnp.einsum('to,tl->ol', per_tap, tapmask) + b2[:, None]     # (4, HW)
    return w1l, w1h, w2taps, dbias


# ----------------------------------------------------------------------------
# upsample_layer.forward
# ----------------------------------------------------------------------------
def upsample_layer_forward(low_nchw, high_nchw, params, *, use_bf16=True,
                           images_per_step=None):
    n, c, h, w = low_nchw.shape
    _, _, h2, w2 = high_nchw.shape
    hw, hw2 = h * w, h2 * w2
    cdt = jnp.bfloat16 if use_bf16 else jnp.float32

    if images_per_step is None:
        images_per_step = 2 if (n >= 2 and n % 2 == 0) else 1
    b = images_per_step
    assert n % b == 0
    g = n // b

    # wrapper-side layout plumbing: channel-major with images stacked on lanes
    low_cm = low_nchw.astype(cdt).reshape(n, c, hw).transpose(1, 0, 2).reshape(c, n * hw)
    high_cm = high_nchw.astype(cdt).reshape(n, c, hw2).transpose(1, 0, 2).reshape(c, n * hw2)

    # host-precomputed constants (all resident across the grid)
    rx = _resize_matrix_ac_true(w, w2)                       # (w, w2)
    ry = _resize_matrix_ac_true(h, h2)                       # (h, h2)
    rxE = jnp.tile(rx.T, (1, h)).astype(cdt)                 # (w2, hw): rxE[q, i*w+j] = rx[j, q]
    ryE = jnp.repeat(ry.T, w, axis=1)                        # (h2, hw): ryE[p, i*w+j] = ry[i, p]
    pos, tapmask = _static_grid_tensors(h, w)                # (2, hw), (9, hw)
    w1l, w1h, w2taps, dbias = _pack_params(params, c, tapmask)
    tapmask_b = jnp.tile(tapmask, (1, b)).astype(cdt)        # (9, b*hw)
    dbias_b = jnp.tile(dbias, (1, b))                        # (4, b*hw) f32
    w1l, w1h, w2taps = w1l.astype(cdt), w1h.astype(cdt), w2taps.astype(cdt)

    kernel = functools.partial(_upsample_fused_kernel, C=c, H=h, W=w, H2=h2, W2=w2, B=b)

    # advisory cost estimate + explicit VMEM budget (v7x-safe cap of 64 MiB)
    flops = 2 * n * (c * h2 * w2 * hw          # resize
                     + 2 * (2 * c) * c * hw    # 1x1 (both halves)
                     + 9 * 4 * (2 * c) * hw    # 3x3 taps
                     + 2 * h * c * w * hw)     # two grid_samples
    bytes_io = int(low_cm.size * low_cm.dtype.itemsize
                   + high_cm.size * high_cm.dtype.itemsize + n * c * hw * 4)
    itm = jnp.dtype(cdt).itemsize
    step_bytes = (2 * (c * b * hw * itm + c * b * hw2 * itm + c * b * hw * 4)   # dbuf blocks
                  + c * b * hw * itm                                            # hup scratch
                  + (rxE.size + tapmask_b.size + w1l.size + w1h.size + w2taps.size) * itm
                  + (ryE.size + pos.size + dbias_b.size) * 4
                  + (2 * c) * b * hw * 4 * 3 + 4 * c * hw * 4)                  # y/taps/acc temps
    vmem_limit = int(min(64 * 2**20, max(16 * 2**20, 2 * step_bytes)))

    out_cm = pl.pallas_call(
        kernel,
        out_shape=jax.ShapeDtypeStruct((c, n * hw), jnp.float32),
        grid=(g,),
        in_specs=[
            pl.BlockSpec((c, b * hw), lambda i: (0, i)),
            pl.BlockSpec((c, b * hw2), lambda i: (0, i)),
            _const_spec(rxE), _const_spec(ryE), _const_spec(pos),
            _const_spec(tapmask_b), _const_spec(dbias_b),
            _const_spec(w1l), _const_spec(w1h), _const_spec(w2taps),
        ],
        out_specs=pl.BlockSpec((c, b * hw), lambda i: (0, i)),
        scratch_shapes=[pltpu.VMEM((c, b * hw), cdt)],
        compiler_params=pltpu.CompilerParams(
            dimension_semantics=("parallel",), vmem_limit_bytes=vmem_limit),
        cost_estimate=pl.CostEstimate(flops=int(flops), transcendentals=0,
                                      bytes_accessed=bytes_io),
    )(low_cm, high_cm, rxE, ryE, pos, tapmask_b, dbias_b, w1l, w1h, w2taps)

    return out_cm.reshape(c, n, h, w).transpose(1, 0, 2, 3)     # back to NCHW


# ----------------------------------------------------------------------------
# pure-XLA reference (mirrors the torch module) for a correctness self-check
# ----------------------------------------------------------------------------
def reference_forward(low, high, params):
    n, c, h, w = low.shape
    h2, w2 = high.shape[2], high.shape[3]
    hi = lax.Precision.HIGHEST

    ry = _resize_matrix_ac_true(h, h2)
    rx = _resize_matrix_ac_true(w, w2)
    high_up = jnp.einsum('ip,jq,ncpq->ncij', ry, rx, high, precision=hi)
    concat = jnp.concatenate([low, high_up], axis=1)

    def branch(p):
        scale = p['gamma'] * lax.rsqrt(p['rvar'] + p['eps'])
        bias = p['beta'] - p['rmean'] * scale
        y = lax.conv_general_dilated(concat, p['w1'][:, :, None, None], (1, 1), 'VALID',
                                     dimension_numbers=('NCHW', 'OIHW', 'NCHW'),
                                     precision=hi)
        y = y * scale[None, :, None, None] + bias[None, :, None, None]
        d = lax.conv_general_dilated(y, p['w2'], (1, 1), ((1, 1), (1, 1)),
                                     dimension_numbers=('NCHW', 'OIHW', 'NCHW'),
                                     precision=hi)
        return d + p['b2'][None, :, None, None]

    d1 = branch(params['gen1'])
    d2 = branch(params['gen2'])

    def grid_sample(img, delta):
        gx = jnp.linspace(-1.0, 1.0, w)[None, None, :] + delta[:, 0] / w   # (n,h,w)
        gy = jnp.linspace(-1.0, 1.0, h)[None, :, None] + delta[:, 1] / h
        xpix = ((gx + 1.0) * w - 1.0) * 0.5
        ypix = ((gy + 1.0) * h - 1.0) * 0.5
        wx = jnp.maximum(0.0, 1.0 - jnp.abs(xpix[..., None] - jnp.arange(w, dtype=jnp.float32)))
        wy = jnp.maximum(0.0, 1.0 - jnp.abs(ypix[..., None] - jnp.arange(h, dtype=jnp.float32)))
        return jnp.einsum('nijp,nijq,ncpq->ncij', wy, wx, img, precision=hi)

    return grid_sample(high_up, d1) + grid_sample(low, d2)


if __name__ == "__main__":
    key = jax.random.PRNGKey(0)
    k_low, k_high, k_par = jax.random.split(key, 3)

    N, C, H, W = 4, 8, 16, 16
    low_stage = jax.random.normal(k_low, (N, C, H, W), jnp.float32)
    high_stage = jax.random.normal(k_high, (N, C, H // 2, W // 2), jnp.float32)
    params = init_params(k_par, C)

    ref = reference_forward(low_stage, high_stage, params)

    # f32-operand build: tight correctness check against the XLA reference.
    out_f32 = upsample_layer_forward(low_stage, high_stage, params, use_bf16=False)
    jax.block_until_ready(out_f32)
    assert out_f32.shape == (N, C, H, W) and out_f32.dtype == jnp.float32
    err_f32 = float(jnp.max(jnp.abs(out_f32 - ref)))
    assert jnp.allclose(out_f32, ref, rtol=2e-3, atol=2e-3), err_f32

    # bf16-MXU-operand build (default fast path): f32 accumulation, looser tolerance.
    out_bf16 = upsample_layer_forward(low_stage, high_stage, params, use_bf16=True)
    jax.block_until_ready(out_bf16)
    assert out_bf16.shape == (N, C, H, W) and out_bf16.dtype == jnp.float32
    err_bf16 = float(jnp.max(jnp.abs(out_bf16 - ref)))
    assert jnp.allclose(out_bf16, ref, rtol=5e-2, atol=1e-1), err_bf16

    print("KERNEL_OK")
</pallas_src>

<mosaic_0001>
module attributes {stable_mosaic.version = 11 : i64} {
  func.func @_upsample_fused_kernel(%arg0: i32, %arg1: memref<8x512xf32, #tpu.memory_space<vmem>>, %arg2: memref<8x128xf32, #tpu.memory_space<vmem>>, %arg3: memref<8x256xf32, #tpu.memory_space<vmem>>, %arg4: memref<8x256xf32, #tpu.memory_space<vmem>>, %arg5: memref<2x256xf32, #tpu.memory_space<vmem>>, %arg6: memref<9x512xf32, #tpu.memory_space<vmem>>, %arg7: memref<4x512xf32, #tpu.memory_space<vmem>>, %arg8: memref<16x8xf32, #tpu.memory_space<vmem>>, %arg9: memref<16x8xf32, #tpu.memory_space<vmem>>, %arg10: memref<9x4x16xf32, #tpu.memory_space<vmem>>, %arg11: memref<8x512xf32, #tpu.memory_space<vmem>>, %arg12: memref<8x512xf32, #tpu.memory_space<vmem>>) attributes {dimension_semantics = [#tpu.dimension_semantics<parallel>], iteration_bounds = array<i64: 2>, scalar_prefetch = 0 : i64, scratch_operands = 1 : i64, tpu.core_type = #tpu.core_type<tc>, window_params = [{transform_indices = @transform_0, window_bounds = array<i64: 8, 512>}, {transform_indices = @transform_1, window_bounds = array<i64: 8, 128>}, {pipeline_mode = #tpu.pipeline_mode<synchronous>, transform_indices = @transform_2, window_bounds = array<i64: 8, 256>}, {pipeline_mode = #tpu.pipeline_mode<synchronous>, transform_indices = @transform_3, window_bounds = array<i64: 8, 256>}, {pipeline_mode = #tpu.pipeline_mode<synchronous>, transform_indices = @transform_4, window_bounds = array<i64: 2, 256>}, {pipeline_mode = #tpu.pipeline_mode<synchronous>, transform_indices = @transform_5, window_bounds = array<i64: 9, 512>}, {pipeline_mode = #tpu.pipeline_mode<synchronous>, transform_indices = @transform_6, window_bounds = array<i64: 4, 512>}, {pipeline_mode = #tpu.pipeline_mode<synchronous>, transform_indices = @transform_7, window_bounds = array<i64: 16, 8>}, {pipeline_mode = #tpu.pipeline_mode<synchronous>, transform_indices = @transform_8, window_bounds = array<i64: 16, 8>}, {pipeline_mode = #tpu.pipeline_mode<synchronous>, transform_indices = @transform_9, window_bounds = array<i64: 9, 4, 16>}, {transform_indices = @transform_10, window_bounds = array<i64: 8, 512>}]} {
    %c0 = arith.constant 0 : index
    %c0_0 = arith.constant 0 : index
    %0 = vector.load %arg3[%c0, %c0_0] : memref<8x256xf32, #tpu.memory_space<vmem>>, vector<8x256xf32>
    %cst = arith.constant 0.000000e+00 : f32
    %1 = vector.broadcast %cst : f32 to vector<8x256xf32>
    %c0_1 = arith.constant 0 : index
    %c0_2 = arith.constant 0 : index
    %2 = vector.load %arg2[%c0_1, %c0_2] : memref<8x128xf32, #tpu.memory_space<vmem>>, vector<8x8xf32>
    %cst_3 = arith.constant dense<0.000000e+00> : vector<8x256xf32>
    %3 = tpu.matmul %2, %0, %cst_3 {dimension_numbers = #tpu.dot_dimension_numbers<[1], [0], [0], [1], [0, 0, 1, 1], [], []>} : vector<8x8xf32>, vector<8x256xf32>, vector<8x256xf32> -> vector<8x256xf32>
    %c0_4 = arith.constant 0 : index
    %c0_5 = arith.constant 0 : index
    %4 = vector.load %arg4[%c0_4, %c0_5] : memref<8x256xf32, #tpu.memory_space<vmem>>, vector<1x256xf32>
    %5 = vector.broadcast %4 : vector<1x256xf32> to vector<8x256xf32>
    %6 = arith.mulf %3, %5 : vector<8x256xf32>
    %7 = arith.addf %1, %6 : vector<8x256xf32>
    %c0_6 = arith.constant 0 : index
    %c8 = arith.constant 8 : index
    %8 = vector.load %arg2[%c0_6, %c8] : memref<8x128xf32, #tpu.memory_space<vmem>>, vector<8x8xf32>
    %cst_7 = arith.constant dense<0.000000e+00> : vector<8x256xf32>
    %9 = tpu.matmul %8, %0, %cst_7 {dimension_numbers = #tpu.dot_dimension_numbers<[1], [0], [0], [1], [0, 0, 1, 1], [], []>} : vector<8x8xf32>, vector<8x256xf32>, vector<8x256xf32> -> vector<8x256xf32>
    %c1 = arith.constant 1 : index
    %c0_8 = arith.constant 0 : index
    %10 = vector.load %arg4[%c1, %c0_8] : memref<8x256xf32, #tpu.memory_space<vmem>>, vector<1x256xf32>
    %11 = vector.broadcast %10 : vector<1x256xf32> to vector<8x256xf32>
    %12 = arith.mulf %9, %11 : vector<8x256xf32>
    %13 = arith.addf %7, %12 : vector<8x256xf32>
    %c0_9 = arith.constant 0 : index
    %c16 = arith.constant 16 : index
    %14 = vector.load %arg2[%c0_9, %c16] : memref<8x128xf32, #tpu.memory_space<vmem>>, vector<8x8xf32>
    %cst_10 = arith.constant dense<0.000000e+00> : vector<8x256xf32>
    %15 = tpu.matmul %14, %0, %cst_10 {dimension_numbers = #tpu.dot_dimension_numbers<[1], [0], [0], [1], [0, 0, 1, 1], [], []>} : vector<8x8xf32>, vector<8x256xf32>, vector<8x256xf32> -> vector<8x256xf32>
    %c2 = arith.constant 2 : index
    %c0_11 = arith.constant 0 : index
    %16 = vector.load %arg4[%c2, %c0_11] : memref<8x256xf32, #tpu.memory_space<vmem>>, vector<1x256xf32>
    %17 = vector.broadcast %16 : vector<1x256xf32> to vector<8x256xf32>
    %18 = arith.mulf %15, %17 : vector<8x256xf32>
    %19 = arith.addf %13, %18 : vector<8x256xf32>
    %c0_12 = arith.constant 0 : index
    %c24 = arith.constant 24 : index
    %20 = vector.load %arg2[%c0_12, %c24] : memref<8x128xf32, #tpu.memory_space<vmem>>, vector<8x8xf32>
    %cst_13 = arith.constant dense<0.000000e+00> : vector<8x256xf32>
    %21 = tpu.matmul %20, %0, %cst_13 {dimension_numbers = #tpu.dot_dimension_numbers<[1], [0], [0], [1], [0, 0, 1, 1], [], []>} : vector<8x8xf32>, vector<8x256xf32>, vector<8x256xf32> -> vector<8x256xf32>
    %c3 = arith.constant 3 : index
    %c0_14 = arith.constant 0 : index
    %22 = vector.load %arg4[%c3, %c0_14] : memref<8x256xf32, #tpu.memory_space<vmem>>, vector<1x256xf32>
    %23 = vector.broadcast %22 : vector<1x256xf32> to vector<8x256xf32>
    %24 = arith.mulf %21, %23 : vector<8x256xf32>
    %25 = arith.addf %19, %24 : vector<8x256xf32>
    %c0_15 = arith.constant 0 : index
    %c32 = arith.constant 32 : index
    %26 = vector.load %arg2[%c0_15, %c32] : memref<8x128xf32, #tpu.memory_space<vmem>>, vector<8x8xf32>
    %cst_16 = arith.constant dense<0.000000e+00> : vector<8x256xf32>
    %27 = tpu.matmul %26, %0, %cst_16 {dimension_numbers = #tpu.dot_dimension_numbers<[1], [0], [0], [1], [0, 0, 1, 1], [], []>} : vector<8x8xf32>, vector<8x256xf32>, vector<8x256xf32> -> vector<8x256xf32>
    %c4 = arith.constant 4 : index
    %c0_17 = arith.constant 0 : index
    %28 = vector.load %arg4[%c4, %c0_17] : memref<8x256xf32, #tpu.memory_space<vmem>>, vector<1x256xf32>
    %29 = vector.broadcast %28 : vector<1x256xf32> to vector<8x256xf32>
    %30 = arith.mulf %27, %29 : vector<8x256xf32>
    %31 = arith.addf %25, %30 : vector<8x256xf32>
    %c0_18 = arith.constant 0 : index
    %c40 = arith.constant 40 : index
    %32 = vector.load %arg2[%c0_18, %c40] : memref<8x128xf32, #tpu.memory_space<vmem>>, vector<8x8xf32>
    %cst_19 = arith.constant dense<0.000000e+00> : vector<8x256xf32>
    %33 = tpu.matmul %32, %0, %cst_19 {dimension_numbers = #tpu.dot_dimension_numbers<[1], [0], [0], [1], [0, 0, 1, 1], [], []>} : vector<8x8xf32>, vector<8x256xf32>, vector<8x256xf32> -> vector<8x256xf32>
    %c5 = arith.constant 5 : index
    %c0_20 = arith.constant 0 : index
    %34 = vector.load %arg4[%c5, %c0_20] : memref<8x256xf32, #tpu.memory_space<vmem>>, vector<1x256xf32>
    %35 = vector.broadcast %34 : vector<1x256xf32> to vector<8x256xf32>
    %36 = arith.mulf %33, %35 : vector<8x256xf32>
    %37 = arith.addf %31, %36 : vector<8x256xf32>
    %c0_21 = arith.constant 0 : index
    %c48 = arith.constant 48 : index
    %38 = vector.load %arg2[%c0_21, %c48] : memref<8x128xf32, #tpu.memory_space<vmem>>, vector<8x8xf32>
    %cst_22 = arith.constant dense<0.000000e+00> : vector<8x256xf32>
    %39 = tpu.matmul %38, %0, %cst_22 {dimension_numbers = #tpu.dot_dimension_numbers<[1], [0], [0], [1], [0, 0, 1, 1], [], []>} : vector<8x8xf32>, vector<8x256xf32>, vector<8x256xf32> -> vector<8x256xf32>
    %c6 = arith.constant 6 : index
    %c0_23 = arith.constant 0 : index
    %40 = vector.load %arg4[%c6, %c0_23] : memref<8x256xf32, #tpu.memory_space<vmem>>, vector<1x256xf32>
    %41 = vector.broadcast %40 : vector<1x256xf32> to vector<8x256xf32>
    %42 = arith.mulf %39, %41 : vector<8x256xf32>
    %43 = arith.addf %37, %42 : vector<8x256xf32>
    %c0_24 = arith.constant 0 : index
    %c56 = arith.constant 56 : index
    %44 = vector.load %arg2[%c0_24, %c56] : memref<8x128xf32, #tpu.memory_space<vmem>>, vector<8x8xf32>
    %cst_25 = arith.constant dense<0.000000e+00> : vector<8x256xf32>
    %45 = tpu.matmul %44, %0, %cst_25 {dimension_numbers = #tpu.dot_dimension_numbers<[1], [0], [0], [1], [0, 0, 1, 1], [], []>} : vector<8x8xf32>, vector<8x256xf32>, vector<8x256xf32> -> vector<8x256xf32>
    %c7 = arith.constant 7 : index
    %c0_26 = arith.constant 0 : index
    %46 = vector.load %arg4[%c7, %c0_26] : memref<8x256xf32, #tpu.memory_space<vmem>>, vector<1x256xf32>
    %47 = vector.broadcast %46 : vector<1x256xf32> to vector<8x256xf32>
    %48 = arith.mulf %45, %47 : vector<8x256xf32>
    %49 = arith.addf %43, %48 : vector<8x256xf32>
    %c0_27 = arith.constant 0 : index
    %c0_28 = arith.constant 0 : index
    %50 = vector.load %arg12[%c0_27, %c0_28] : memref<8x512xf32, #tpu.memory_space<vmem>>, vector<8x256xf32>
    tpu.vector_store %arg12[%c0_27, %c0_28], %49 {strides = array<i32>} : memref<8x512xf32, #tpu.memory_space<vmem>>, vector<8x256xf32>,
    %cst_29 = arith.constant 0.000000e+00 : f32
    %51 = vector.broadcast %cst_29 : f32 to vector<8x256xf32>
    %c0_30 = arith.constant 0 : index
    %c64 = arith.constant 64 : index
    %52 = vector.load %arg2[%c0_30, %c64] : memref<8x128xf32, #tpu.memory_space<vmem>>, vector<8x8xf32>
    %cst_31 = arith.constant dense<0.000000e+00> : vector<8x256xf32>
    %53 = tpu.matmul %52, %0, %cst_31 {dimension_numbers = #tpu.dot_dimension_numbers<[1], [0], [0], [1], [0, 0, 1, 1], [], []>} : vector<8x8xf32>, vector<8x256xf32>, vector<8x256xf32> -> vector<8x256xf32>
    %c0_32 = arith.constant 0 : index
    %c0_33 = arith.constant 0 : index
    %54 = vector.load %arg4[%c0_32, %c0_33] : memref<8x256xf32, #tpu.memory_space<vmem>>, vector<1x256xf32>
    %55 = vector.broadcast %54 : vector<1x256xf32> to vector<8x256xf32>
    %56 = arith.mulf %53, %55 : vector<8x256xf32>
    %57 = arith.addf %51, %56 : vector<8x256xf32>
    %c0_34 = arith.constant 0 : index
    %c72 = arith.constant 72 : index
    %58 = vector.load %arg2[%c0_34, %c72] : memref<8x128xf32, #tpu.memory_space<vmem>>, vector<8x8xf32>
    %cst_35 = arith.constant dense<0.000000e+00> : vector<8x256xf32>
    %59 = tpu.matmul %58, %0, %cst_35 {dimension_numbers = #tpu.dot_dimension_numbers<[1], [0], [0], [1], [0, 0, 1, 1], [], []>} : vector<8x8xf32>, vector<8x256xf32>, vector<8x256xf32> -> vector<8x256xf32>
    %c1_36 = arith.constant 1 : index
    %c0_37 = arith.constant 0 : index
    %60 = vector.load %arg4[%c1_36, %c0_37] : memref<8x256xf32, #tpu.memory_space<vmem>>, vector<1x256xf32>
    %61 = vector.broadcast %60 : vector<1x256xf32> to vector<8x256xf32>
    %62 = arith.mulf %59, %61 : vector<8x256xf32>
    %63 = arith.addf %57, %62 : vector<8x256xf32>
    %c0_38 = arith.constant 0 : index
    %c80 = arith.constant 80 : index
    %64 = vector.load %arg2[%c0_38, %c80] : memref<8x128xf32, #tpu.memory_space<vmem>>, vector<8x8xf32>
    %cst_39 = arith.constant dense<0.000000e+00> : vector<8x256xf32>
    %65 = tpu.matmul %64, %0, %cst_39 {dimension_numbers = #tpu.dot_dimension_numbers<[1], [0], [0], [1], [0, 0, 1, 1], [], []>} : vector<8x8xf32>, vector<8x256xf32>, vector<8x256xf32> -> vector<8x256xf32>
    %c2_40 = arith.constant 2 : index
    %c0_41 = arith.constant 0 : index
    %66 = vector.load %arg4[%c2_40, %c0_41] : memref<8x256xf32, #tpu.memory_space<vmem>>, vector<1x256xf32>
    %67 = vector.broadcast %66 : vector<1x256xf32> to vector<8x256xf32>
    %68 = arith.mulf %65, %67 : vector<8x256xf32>
    %69 = arith.addf %63, %68 : vector<8x256xf32>
    %c0_42 = arith.constant 0 : index
    %c88 = arith.constant 88 : index
    %70 = vector.load %arg2[%c0_42, %c88] : memref<8x128xf32, #tpu.memory_space<vmem>>, vector<8x8xf32>
    %cst_43 = arith.constant dense<0.000000e+00> : vector<8x256xf32>
    %71 = tpu.matmul %70, %0, %cst_43 {dimension_numbers = #tpu.dot_dimension_numbers<[1], [0], [0], [1], [0, 0, 1, 1], [], []>} : vector<8x8xf32>, vector<8x256xf32>, vector<8x256xf32> -> vector<8x256xf32>
    %c3_44 = arith.constant 3 : index
    %c0_45 = arith.constant 0 : index
    %72 = vector.load %arg4[%c3_44, %c0_45] : memref<8x256xf32, #tpu.memory_space<vmem>>, vector<1x256xf32>
    %73 = vector.broadcast %72 : vector<1x256xf32> to vector<8x256xf32>
    %74 = arith.mulf %71, %73 : vector<8x256xf32>
    %75 = arith.addf %69, %74 : vector<8x256xf32>
    %c0_46 = arith.constant 0 : index
    %c96 = arith.constant 96 : index
    %76 = vector.load %arg2[%c0_46, %c96] : memref<8x128xf32, #tpu.memory_space<vmem>>, vector<8x8xf32>
    %cst_47 = arith.constant dense<0.000000e+00> : vector<8x256xf32>
    %77 = tpu.matmul %76, %0, %cst_47 {dimension_numbers = #tpu.dot_dimension_numbers<[1], [0], [0], [1], [0, 0, 1, 1], [], []>} : vector<8x8xf32>, vector<8x256xf32>, vector<8x256xf32> -> vector<8x256xf32>
    %c4_48 = arith.constant 4 : index
    %c0_49 = arith.constant 0 : index
    %78 = vector.load %arg4[%c4_48, %c0_49] : memref<8x256xf32, #tpu.memory_space<vmem>>, vector<1x256xf32>
    %79 = vector.broadcast %78 : vector<1x256xf32> to vector<8x256xf32>
    %80 = arith.mulf %77, %79 : vector<8x256xf32>
    %81 = arith.addf %75, %80 : vector<8x256xf32>
    %c0_50 = arith.constant 0 : index
    %c104 = arith.constant 104 : index
    %82 = vector.load %arg2[%c0_50, %c104] : memref<8x128xf32, #tpu.memory_space<vmem>>, vector<8x8xf32>
    %cst_51 = arith.constant dense<0.000000e+00> : vector<8x256xf32>
    %83 = tpu.matmul %82, %0, %cst_51 {dimension_numbers = #tpu.dot_dimension_numbers<[1], [0], [0], [1], [0, 0, 1, 1], [], []>} : vector<8x8xf32>, vector<8x256xf32>, vector<8x256xf32> -> vector<8x256xf32>
    %c5_52 = arith.constant 5 : index
    %c0_53 = arith.constant 0 : index
    %84 = vector.load %arg4[%c5_52, %c0_53] : memref<8x256xf32, #tpu.memory_space<vmem>>, vector<1x256xf32>
    %85 = vector.broadcast %84 : vector<1x256xf32> to vector<8x256xf32>
    %86 = arith.mulf %83, %85 : vector<8x256xf32>
    %87 = arith.addf %81, %86 : vector<8x256xf32>
    %c0_54 = arith.constant 0 : index
    %c112 = arith.constant 112 : index
    %88 = vector.load %arg2[%c0_54, %c112] : memref<8x128xf32, #tpu.memory_space<vmem>>, vector<8x8xf32>
    %cst_55 = arith.constant dense<0.000000e+00> : vector<8x256xf32>
    %89 = tpu.matmul %88, %0, %cst_55 {dimension_numbers = #tpu.dot_dimension_numbers<[1], [0], [0], [1], [0, 0, 1, 1], [], []>} : vector<8x8xf32>, vector<8x256xf32>, vector<8x256xf32> -> vector<8x256xf32>
    %c6_56 = arith.constant 6 : index
    %c0_57 = arith.constant 0 : index
    %90 = vector.load %arg4[%c6_56, %c0_57] : memref<8x256xf32, #tpu.memory_space<vmem>>, vector<1x256xf32>
    %91 = vector.broadcast %90 : vector<1x256xf32> to vector<8x256xf32>
    %92 = arith.mulf %89, %91 : vector<8x256xf32>
    %93 = arith.addf %87, %92 : vector<8x256xf32>
    %c0_58 = arith.constant 0 : index
    %c120 = arith.constant 120 : index
    %94 = vector.load %arg2[%c0_58, %c120] : memref<8x128xf32, #tpu.memory_space<vmem>>, vector<8x8xf32>
    %cst_59 = arith.constant dense<0.000000e+00> : vector<8x256xf32>
    %95 = tpu.matmul %94, %0, %cst_59 {dimension_numbers = #tpu.dot_dimension_numbers<[1], [0], [0], [1], [0, 0, 1, 1], [], []>} : vector<8x8xf32>, vector<8x256xf32>, vector<8x256xf32> -> vector<8x256xf32>
    %c7_60 = arith.constant 7 : index
    %c0_61 = arith.constant 0 : index
    %96 = vector.load %arg4[%c7_60, %c0_61] : memref<8x256xf32, #tpu.memory_space<vmem>>, vector<1x256xf32>
    %97 = vector.broadcast %96 : vector<1x256xf32> to vector<8x256xf32>
    %98 = arith.mulf %95, %97 : vector<8x256xf32>
    %99 = arith.addf %93, %98 : vector<8x256xf32>
    %c0_62 = arith.constant 0 : index
    %c256 = arith.constant 256 : index
    %100 = vector.load %arg12[%c0_62, %c256] : memref<8x512xf32, #tpu.memory_space<vmem>>, vector<8x256xf32>
    tpu.vector_store %arg12[%c0_62, %c256], %99 {strides = array<i32>} : memref<8x512xf32, #tpu.memory_space<vmem>>, vector<8x256xf32>,
    %c0_63 = arith.constant 0 : index
    %c0_64 = arith.constant 0 : index
    %101 = vector.load %arg8[%c0_63, %c0_64] : memref<16x8xf32, #tpu.memory_space<vmem>>, vector<16x8xf32>
    %c0_65 = arith.constant 0 : index
    %c0_66 = arith.constant 0 : index
    %102 = vector.load %arg1[%c0_65, %c0_66] : memref<8x512xf32, #tpu.memory_space<vmem>>, vector<8x512xf32>
    %cst_67 = arith.constant dense<0.000000e+00> : vector<16x512xf32>
    %103 = tpu.matmul %101, %102, %cst_67 {dimension_numbers = #tpu.dot_dimension_numbers<[1], [0], [0], [1], [0, 0, 1, 1], [], []>} : vector<16x8xf32>, vector<8x512xf32>, vector<16x512xf32> -> vector<16x512xf32>
    %c0_68 = arith.constant 0 : index
    %c0_69 = arith.constant 0 : index
    %104 = vector.load %arg9[%c0_68, %c0_69] : memref<16x8xf32, #tpu.memory_space<vmem>>, vector<16x8xf32>
    %c0_70 = arith.constant 0 : index
    %c0_71 = arith.constant 0 : index
    %105 = vector.load %arg12[%c0_70, %c0_71] : memref<8x512xf32, #tpu.memory_space<vmem>>, vector<8x512xf32>
    %cst_72 = arith.constant dense<0.000000e+00> : vector<16x512xf32>
    %106 = tpu.matmul %104, %105, %cst_72 {dimension_numbers = #tpu.dot_dimension_numbers<[1], [0], [0], [1], [0, 0, 1, 1], [], []>} : vector<16x8xf32>, vector<8x512xf32>, vector<16x512xf32> -> vector<16x512xf32>
    %107 = arith.addf %103, %106 : vector<16x512xf32>
    %c0_73 = arith.constant 0 : index
    %c0_74 = arith.constant 0 : index
    %108 = vector.load %arg7[%c0_73, %c0_74] : memref<4x512xf32, #tpu.memory_space<vmem>>, vector<4x512xf32>
    %c17_i32 = arith.constant 17 : i32
    %109 = tpu.dynamic_rotate %107 by %c17_i32 dim 1 : vector<16x512xf32>, i32 -> vector<16x512xf32>
    %c0_75 = arith.constant 0 : index
    %c0_76 = arith.constant 0 : index
    %110 = vector.load %arg6[%c0_75, %c0_76] : memref<9x512xf32, #tpu.memory_space<vmem>>, vector<1x512xf32>
    %111 = vector.broadcast %110 : vector<1x512xf32> to vector<16x512xf32>
    %112 = arith.mulf %109, %111 : vector<16x512xf32>
    %c0_77 = arith.constant 0 : index
    %c0_78 = arith.constant 0 : index
    %c0_79 = arith.constant 0 : index
    %113 = vector.load %arg10[%c0_77, %c0_78, %c0_79] : memref<9x4x16xf32, #tpu.memory_space<vmem>>, vector<1x4x16xf32>
    %114 = vector.shape_cast %113 : vector<1x4x16xf32> to vector<4x16xf32>
    %cst_80 = arith.constant dense<0.000000e+00> : vector<4x512xf32>
    %115 = tpu.matmul %114, %112, %cst_80 {dimension_numbers = #tpu.dot_dimension_numbers<[1], [0], [0], [1], [0, 0, 1, 1], [], []>} : vector<4x16xf32>, vector<16x512xf32>, vector<4x512xf32> -> vector<4x512xf32>
    %116 = arith.addf %108, %115 : vector<4x512xf32>
    %c16_i32 = arith.constant 16 : i32
    %117 = tpu.dynamic_rotate %107 by %c16_i32 dim 1 : vector<16x512xf32>, i32 -> vector<16x512xf32>
    %c1_81 = arith.constant 1 : index
    %c0_82 = arith.constant 0 : index
    %118 = vector.load %arg6[%c1_81, %c0_82] : memref<9x512xf32, #tpu.memory_space<vmem>>, vector<1x512xf32>
    %119 = vector.broadcast %118 : vector<1x512xf32> to vector<16x512xf32>
    %120 = arith.mulf %117, %119 : vector<16x512xf32>
    %c1_83 = arith.constant 1 : index
    %c0_84 = arith.constant 0 : index
    %c0_85 = arith.constant 0 : index
    %121 = vector.load %arg10[%c1_83, %c0_84, %c0_85] : memref<9x4x16xf32, #tpu.memory_space<vmem>>, vector<1x4x16xf32>
    %122 = vector.shape_cast %121 : vector<1x4x16xf32> to vector<4x16xf32>
    %cst_86 = arith.constant dense<0.000000e+00> : vector<4x512xf32>
    %123 = tpu.matmul %122, %120, %cst_86 {dimension_numbers = #tpu.dot_dimension_numbers<[1], [0], [0], [1], [0, 0, 1, 1], [], []>} : vector<4x16xf32>, vector<16x512xf32>, vector<4x512xf32> -> vector<4x512xf32>
    %124 = arith.addf %116, %123 : vector<4x512xf32>
    %c15_i32 = arith.constant 15 : i32
    %125 = tpu.dynamic_rotate %107 by %c15_i32 dim 1 : vector<16x512xf32>, i32 -> vector<16x512xf32>
    %c2_87 = arith.constant 2 : index
    %c0_88 = arith.constant 0 : index
    %126 = vector.load %arg6[%c2_87, %c0_88] : memref<9x512xf32, #tpu.memory_space<vmem>>, vector<1x512xf32>
    %127 = vector.broadcast %126 : vector<1x512xf32> to vector<16x512xf32>
    %128 = arith.mulf %125, %127 : vector<16x512xf32>
    %c2_89 = arith.constant 2 : index
    %c0_90 = arith.constant 0 : index
    %c0_91 = arith.constant 0 : index
    %129 = vector.load %arg10[%c2_89, %c0_90, %c0_91] : memref<9x4x16xf32, #tpu.memory_space<vmem>>, vector<1x4x16xf32>
    %130 = vector.shape_cast %129 : vector<1x4x16xf32> to vector<4x16xf32>
    %cst_92 = arith.constant dense<0.000000e+00> : vector<4x512xf32>
    %131 = tpu.matmul %130, %128, %cst_92 {dimension_numbers = #tpu.dot_dimension_numbers<[1], [0], [0], [1], [0, 0, 1, 1], [], []>} : vector<4x16xf32>, vector<16x512xf32>, vector<4x512xf32> -> vector<4x512xf32>
    %132 = arith.addf %124, %131 : vector<4x512xf32>
    %c1_i32 = arith.constant 1 : i32
    %133 = tpu.dynamic_rotate %107 by %c1_i32 dim 1 : vector<16x512xf32>, i32 -> vector<16x512xf32>
    %c3_93 = arith.constant 3 : index
    %c0_94 = arith.constant 0 : index
    %134 = vector.load %arg6[%c3_93, %c0_94] : memref<9x512xf32, #tpu.memory_space<vmem>>, vector<1x512xf32>
    %135 = vector.broadcast %134 : vector<1x512xf32> to vector<16x512xf32>
    %136 = arith.mulf %133, %135 : vector<16x512xf32>
    %c3_95 = arith.constant 3 : index
    %c0_96 = arith.constant 0 : index
    %c0_97 = arith.constant 0 : index
    %137 = vector.load %arg10[%c3_95, %c0_96, %c0_97] : memref<9x4x16xf32, #tpu.memory_space<vmem>>, vector<1x4x16xf32>
    %138 = vector.shape_cast %137 : vector<1x4x16xf32> to vector<4x16xf32>
    %cst_98 = arith.constant dense<0.000000e+00> : vector<4x512xf32>
    %139 = tpu.matmul %138, %136, %cst_98 {dimension_numbers = #tpu.dot_dimension_numbers<[1], [0], [0], [1], [0, 0, 1, 1], [], []>} : vector<4x16xf32>, vector<16x512xf32>, vector<4x512xf32> -> vector<4x512xf32>
    %140 = arith.addf %132, %139 : vector<4x512xf32>
    %c4_99 = arith.constant 4 : index
    %c0_100 = arith.constant 0 : index
    %c0_101 = arith.constant 0 : index
    %141 = vector.load %arg10[%c4_99, %c0_100, %c0_101] : memref<9x4x16xf32, #tpu.memory_space<vmem>>, vector<1x4x16xf32>
    %142 = vector.shape_cast %141 : vector<1x4x16xf32> to vector<4x16xf32>
    %cst_102 = arith.constant dense<0.000000e+00> : vector<4x512xf32>
    %143 = tpu.matmul %142, %107, %cst_102 {dimension_numbers = #tpu.dot_dimension_numbers<[1], [0], [0], [1], [0, 0, 1, 1], [], []>} : vector<4x16xf32>, vector<16x512xf32>, vector<4x512xf32> -> vector<4x512xf32>
    %144 = arith.addf %140, %143 : vector<4x512xf32>
    %c511_i32 = arith.constant 511 : i32
    %145 = tpu.dynamic_rotate %107 by %c511_i32 dim 1 : vector<16x512xf32>, i32 -> vector<16x512xf32>
    %c5_103 = arith.constant 5 : index
    %c0_104 = arith.constant 0 : index
    %146 = vector.load %arg6[%c5_103, %c0_104] : memref<9x512xf32, #tpu.memory_space<vmem>>, vector<1x512xf32>
    %147 = vector.broadcast %146 : vector<1x512xf32> to vector<16x512xf32>
    %148 = arith.mulf %145, %147 : vector<16x512xf32>
    %c5_105 = arith.constant 5 : index
    %c0_106 = arith.constant 0 : index
    %c0_107 = arith.constant 0 : index
    %149 = vector.load %arg10[%c5_105, %c0_106, %c0_107] : memref<9x4x16xf32, #tpu.memory_space<vmem>>, vector<1x4x16xf32>
    %150 = vector.shape_cast %149 : vector<1x4x16xf32> to vector<4x16xf32>
    %cst_108 = arith.constant dense<0.000000e+00> : vector<4x512xf32>
    %151 = tpu.matmul %150, %148, %cst_108 {dimension_numbers = #tpu.dot_dimension_numbers<[1], [0], [0], [1], [0, 0, 1, 1], [], []>} : vector<4x16xf32>, vector<16x512xf32>, vector<4x512xf32> -> vector<4x512xf32>
    %152 = arith.addf %144, %151 : vector<4x512xf32>
    %c497_i32 = arith.constant 497 : i32
    %153 = tpu.dynamic_rotate %107 by %c497_i32 dim 1 : vector<16x512xf32>, i32 -> vector<16x512xf32>
    %c6_109 = arith.constant 6 : index
    %c0_110 = arith.constant 0 : index
    %154 = vector.load %arg6[%c6_109, %c0_110] : memref<9x512xf32, #tpu.memory_space<vmem>>, vector<1x512xf32>
    %155 = vector.broadcast %154 : vector<1x512xf32> to vector<16x512xf32>
    %156 = arith.mulf %153, %155 : vector<16x512xf32>
    %c6_111 = arith.constant 6 : index
    %c0_112 = arith.constant 0 : index
    %c0_113 = arith.constant 0 : index
    %157 = vector.load %arg10[%c6_111, %c0_112, %c0_113] : memref<9x4x16xf32, #tpu.memory_space<vmem>>, vector<1x4x16xf32>
    %158 = vector.shape_cast %157 : vector<1x4x16xf32> to vector<4x16xf32>
    %cst_114 = arith.constant dense<0.000000e+00> : vector<4x512xf32>
    %159 = tpu.matmul %158, %156, %cst_114 {dimension_numbers = #tpu.dot_dimension_numbers<[1], [0], [0], [1], [0, 0, 1, 1], [], []>} : vector<4x16xf32>, vector<16x512xf32>, vector<4x512xf32> -> vector<4x512xf32>
    %160 = arith.addf %152, %159 : vector<4x512xf32>
    %c496_i32 = arith.constant 496 : i32
    %161 = tpu.dynamic_rotate %107 by %c496_i32 dim 1 : vector<16x512xf32>, i32 -> vector<16x512xf32>
    %c7_115 = arith.constant 7 : index
    %c0_116 = arith.constant 0 : index
    %162 = vector.load %arg6[%c7_115, %c0_116] : memref<9x512xf32, #tpu.memory_space<vmem>>, vector<1x512xf32>
    %163 = vector.broadcast %162 : vector<1x512xf32> to vector<16x512xf32>
    %164 = arith.mulf %161, %163 : vector<16x512xf32>
    %c7_117 = arith.constant 7 : index
    %c0_118 = arith.constant 0 : index
    %c0_119 = arith.constant 0 : index
    %165 = vector.load %arg10[%c7_117, %c0_118, %c0_119] : memref<9x4x16xf32, #tpu.memory_space<vmem>>, vector<1x4x16xf32>
    %166 = vector.shape_cast %165 : vector<1x4x16xf32> to vector<4x16xf32>
    %cst_120 = arith.constant dense<0.000000e+00> : vector<4x512xf32>
    %167 = tpu.matmul %166, %164, %cst_120 {dimension_numbers = #tpu.dot_dimension_numbers<[1], [0], [0], [1], [0, 0, 1, 1], [], []>} : vector<4x16xf32>, vector<16x512xf32>, vector<4x512xf32> -> vector<4x512xf32>
    %168 = arith.addf %160, %167 : vector<4x512xf32>
    %c495_i32 = arith.constant 495 : i32
    %169 = tpu.dynamic_rotate %107 by %c495_i32 dim 1 : vector<16x512xf32>, i32 -> vector<16x512xf32>
    %c8_121 = arith.constant 8 : index
    %c0_122 = arith.constant 0 : index
    %170 = vector.load %arg6[%c8_121, %c0_122] : memref<9x512xf32, #tpu.memory_space<vmem>>, vector<1x512xf32>
    %171 = vector.broadcast %170 : vector<1x512xf32> to vector<16x512xf32>
    %172 = arith.mulf %169, %171 : vector<16x512xf32>
    %c8_123 = arith.constant 8 : index
    %c0_124 = arith.constant 0 : index
    %c0_125 = arith.constant 0 : index
    %173 = vector.load %arg10[%c8_123, %c0_124, %c0_125] : memref<9x4x16xf32, #tpu.memory_space<vmem>>, vector<1x4x16xf32>
    %174 = vector.shape_cast %173 : vector<1x4x16xf32> to vector<4x16xf32>
    %cst_126 = arith.constant dense<0.000000e+00> : vector<4x512xf32>
    %175 = tpu.matmul %174, %172, %cst_126 {dimension_numbers = #tpu.dot_dimension_numbers<[1], [0], [0], [1], [0, 0, 1, 1], [], []>} : vector<4x16xf32>, vector<16x512xf32>, vector<4x512xf32> -> vector<4x512xf32>
    %176 = arith.addf %168, %175 : vector<4x512xf32>
    %c0_127 = arith.constant 0 : index
    %c0_128 = arith.constant 0 : index
    %177 = vector.load %arg5[%c0_127, %c0_128] : memref<2x256xf32, #tpu.memory_space<vmem>>, vector<2x256xf32>
    %178 = vector.extract_strided_slice %177 {offsets = [0, 0], sizes = [1, 256], strides = [1, 1]} : vector<2x256xf32> to vector<1x256xf32>
    %179 = vector.extract_strided_slice %177 {offsets = [1, 0], sizes = [1, 256], strides = [1, 1]} : vector<2x256xf32> to vector<1x256xf32>
    %180 = tpu.iota {dimensions = array<i32: 0>} : vector<16x256xi32>
    %181 = arith.sitofp %180 : vector<16x256xi32> to vector<16x256xf32>
    %cst_129 = arith.constant 0.000000e+00 : f32
    %182 = vector.broadcast %cst_129 : f32 to vector<8x256xf32>
    %183 = vector.extract_strided_slice %176 {offsets = [0, 0], sizes = [1, 256], strides = [1, 1]} : vector<4x512xf32> to vector<1x256xf32>
    %cst_130 = arith.constant 5.000000e-01 : f32
    %184 = vector.broadcast %cst_130 : f32 to vector<1x256xf32>
    %185 = arith.mulf %184, %183 : vector<1x256xf32>
    %186 = arith.addf %178, %185 : vector<1x256xf32>
    %187 = vector.extract_strided_slice %176 {offsets = [1, 0], sizes = [1, 256], strides = [1, 1]} : vector<4x512xf32> to vector<1x256xf32>
    %cst_131 = arith.constant 5.000000e-01 : f32
    %188 = vector.broadcast %cst_131 : f32 to vector<1x256xf32>
    %189 = arith.mulf %188, %187 : vector<1x256xf32>
    %190 = arith.addf %179, %189 : vector<1x256xf32>
    %191 = vector.broadcast %186 : vector<1x256xf32> to vector<16x256xf32>
    %192 = arith.subf %191, %181 : vector<16x256xf32>
    %193 = math.absf %192 : vector<16x256xf32>
    %cst_132 = arith.constant 1.000000e+00 : f32
    %194 = vector.broadcast %cst_132 : f32 to vector<16x256xf32>
    %195 = arith.subf %194, %193 : vector<16x256xf32>
    %cst_133 = arith.constant 0.000000e+00 : f32
    %196 = vector.broadcast %cst_133 : f32 to vector<16x256xf32>
    %197 = arith.maximumf %196, %195 : vector<16x256xf32>
    %c0_134 = arith.constant 0 : index
    %c0_135 = arith.constant 0 : index
    %198 = vector.load %arg12[%c0_134, %c0_135] : memref<8x512xf32, #tpu.memory_space<vmem>>, vector<8x16xf32>
    %cst_136 = arith.constant dense<0.000000e+00> : vector<8x256xf32>
    %199 = tpu.matmul %198, %197, %cst_136 {dimension_numbers = #tpu.dot_dimension_numbers<[1], [0], [0], [1], [0, 0, 1, 1], [], []>} : vector<8x16xf32>, vector<16x256xf32>, vector<8x256xf32> -> vector<8x256xf32>
    %cst_137 = arith.constant 0.000000e+00 : f32
    %200 = vector.broadcast %cst_137 : f32 to vector<1x256xf32>
    %201 = arith.subf %190, %200 : vector<1x256xf32>
    %202 = math.absf %201 : vector<1x256xf32>
    %cst_138 = arith.constant 1.000000e+00 : f32
    %203 = vector.broadcast %cst_138 : f32 to vector<1x256xf32>
    %204 = arith.subf %203, %202 : vector<1x256xf32>
    %cst_139 = arith.constant 0.000000e+00 : f32
    %205 = vector.broadcast %cst_139 : f32 to vector<1x256xf32>
    %206 = arith.maximumf %205, %204 : vector<1x256xf32>
    %207 = vector.broadcast %206 : vector<1x256xf32> to vector<8x256xf32>
    %208 = arith.mulf %199, %207 : vector<8x256xf32>
    %209 = arith.addf %182, %208 : vector<8x256xf32>
    %c0_140 = arith.constant 0 : index
    %c16_141 = arith.constant 16 : index
    %210 = vector.load %arg12[%c0_140, %c16_141] : memref<8x512xf32, #tpu.memory_space<vmem>>, vector<8x16xf32>
    %cst_142 = arith.constant dense<0.000000e+00> : vector<8x256xf32>
    %211 = tpu.matmul %210, %197, %cst_142 {dimension_numbers = #tpu.dot_dimension_numbers<[1], [0], [0], [1], [0, 0, 1, 1], [], []>} : vector<8x16xf32>, vector<16x256xf32>, vector<8x256xf32> -> vector<8x256xf32>
    %cst_143 = arith.constant 1.000000e+00 : f32
    %212 = vector.broadcast %cst_143 : f32 to vector<1x256xf32>
    %213 = arith.subf %190, %212 : vector<1x256xf32>
    %214 = math.absf %213 : vector<1x256xf32>
    %cst_144 = arith.constant 1.000000e+00 : f32
    %215 = vector.broadcast %cst_144 : f32 to vector<1x256xf32>
    %216 = arith.subf %215, %214 : vector<1x256xf32>
    %cst_145 = arith.constant 0.000000e+00 : f32
    %217 = vector.broadcast %cst_145 : f32 to vector<1x256xf32>
    %218 = arith.maximumf %217, %216 : vector<1x256xf32>
    %219 = vector.broadcast %218 : vector<1x256xf32> to vector<8x256xf32>
    %220 = arith.mulf %211, %219 : vector<8x256xf32>
    %221 = arith.addf %209, %220 : vector<8x256xf32>
    %c0_146 = arith.constant 0 : index
    %c32_147 = arith.constant 32 : index
    %222 = vector.load %arg12[%c0_146, %c32_147] : memref<8x512xf32, #tpu.memory_space<vmem>>, vector<8x16xf32>
    %cst_148 = arith.constant dense<0.000000e+00> : vector<8x256xf32>
    %223 = tpu.matmul %222, %197, %cst_148 {dimension_numbers = #tpu.dot_dimension_numbers<[1], [0], [0], [1], [0, 0, 1, 1], [], []>} : vector<8x16xf32>, vector<16x256xf32>, vector<8x256xf32> -> vector<8x256xf32>
    %cst_149 = arith.constant 2.000000e+00 : f32
    %224 = vector.broadcast %cst_149 : f32 to vector<1x256xf32>
    %225 = arith.subf %190, %224 : vector<1x256xf32>
    %226 = math.absf %225 : vector<1x256xf32>
    %cst_150 = arith.constant 1.000000e+00 : f32
    %227 = vector.broadcast %cst_150 : f32 to vector<1x256xf32>
    %228 = arith.subf %227, %226 : vector<1x256xf32>
    %cst_151 = arith.constant 0.000000e+00 : f32
    %229 = vector.broadcast %cst_151 : f32 to vector<1x256xf32>
    %230 = arith.maximumf %229, %228 : vector<1x256xf32>
    %231 = vector.broadcast %230 : vector<1x256xf32> to vector<8x256xf32>
    %232 = arith.mulf %223, %231 : vector<8x256xf32>
    %233 = arith.addf %221, %232 : vector<8x256xf32>
    %c0_152 = arith.constant 0 : index
    %c48_153 = arith.constant 48 : index
    %234 = vector.load %arg12[%c0_152, %c48_153] : memref<8x512xf32, #tpu.memory_space<vmem>>, vector<8x16xf32>
    %cst_154 = arith.constant dense<0.000000e+00> : vector<8x256xf32>
    %235 = tpu.matmul %234, %197, %cst_154 {dimension_numbers = #tpu.dot_dimension_numbers<[1], [0], [0], [1], [0, 0, 1, 1], [], []>} : vector<8x16xf32>, vector<16x256xf32>, vector<8x256xf32> -> vector<8x256xf32>
    %cst_155 = arith.constant 3.000000e+00 : f32
    %236 = vector.broadcast %cst_155 : f32 to vector<1x256xf32>
    %237 = arith.subf %190, %236 : vector<1x256xf32>
    %238 = math.absf %237 : vector<1x256xf32>
    %cst_156 = arith.constant 1.000000e+00 : f32
    %239 = vector.broadcast %cst_156 : f32 to vector<1x256xf32>
    %240 = arith.subf %239, %238 : vector<1x256xf32>
    %cst_157 = arith.constant 0.000000e+00 : f32
    %241 = vector.broadcast %cst_157 : f32 to vector<1x256xf32>
    %242 = arith.maximumf %241, %240 : vector<1x256xf32>
    %243 = vector.broadcast %242 : vector<1x256xf32> to vector<8x256xf32>
    %244 = arith.mulf %235, %243 : vector<8x256xf32>
    %245 = arith.addf %233, %244 : vector<8x256xf32>
    %c0_158 = arith.constant 0 : index
    %c64_159 = arith.constant 64 : index
    %246 = vector.load %arg12[%c0_158, %c64_159] : memref<8x512xf32, #tpu.memory_space<vmem>>, vector<8x16xf32>
    %cst_160 = arith.constant dense<0.000000e+00> : vector<8x256xf32>
    %247 = tpu.matmul %246, %197, %cst_160 {dimension_numbers = #tpu.dot_dimension_numbers<[1], [0], [0], [1], [0, 0, 1, 1], [], []>} : vector<8x16xf32>, vector<16x256xf32>, vector<8x256xf32> -> vector<8x256xf32>
    %cst_161 = arith.constant 4.000000e+00 : f32
    %248 = vector.broadcast %cst_161 : f32 to vector<1x256xf32>
    %249 = arith.subf %190, %248 : vector<1x256xf32>
    %250 = math.absf %249 : vector<1x256xf32>
    %cst_162 = arith.constant 1.000000e+00 : f32
    %251 = vector.broadcast %cst_162 : f32 to vector<1x256xf32>
    %252 = arith.subf %251, %250 : vector<1x256xf32>
    %cst_163 = arith.constant 0.000000e+00 : f32
    %253 = vector.broadcast %cst_163 : f32 to vector<1x256xf32>
    %254 = arith.maximumf %253, %252 : vector<1x256xf32>
    %255 = vector.broadcast %254 : vector<1x256xf32> to vector<8x256xf32>
    %256 = arith.mulf %247, %255 : vector<8x256xf32>
    %257 = arith.addf %245, %256 : vector<8x256xf32>
    %c0_164 = arith.constant 0 : index
    %c80_165 = arith.constant 80 : index
    %258 = vector.load %arg12[%c0_164, %c80_165] : memref<8x512xf32, #tpu.memory_space<vmem>>, vector<8x16xf32>
    %cst_166 = arith.constant dense<0.000000e+00> : vector<8x256xf32>
    %259 = tpu.matmul %258, %197, %cst_166 {dimension_numbers = #tpu.dot_dimension_numbers<[1], [0], [0], [1], [0, 0, 1, 1], [], []>} : vector<8x16xf32>, vector<16x256xf32>, vector<8x256xf32> -> vector<8x256xf32>
    %cst_167 = arith.constant 5.000000e+00 : f32
    %260 = vector.broadcast %cst_167 : f32 to vector<1x256xf32>
    %261 = arith.subf %190, %260 : vector<1x256xf32>
    %262 = math.absf %261 : vector<1x256xf32>
    %cst_168 = arith.constant 1.000000e+00 : f32
    %263 = vector.broadcast %cst_168 : f32 to vector<1x256xf32>
    %264 = arith.subf %263, %262 : vector<1x256xf32>
    %cst_169 = arith.constant 0.000000e+00 : f32
    %265 = vector.broadcast %cst_169 : f32 to vector<1x256xf32>
    %266 = arith.maximumf %265, %264 : vector<1x256xf32>
    %267 = vector.broadcast %266 : vector<1x256xf32> to vector<8x256xf32>
    %268 = arith.mulf %259, %267 : vector<8x256xf32>
    %269 = arith.addf %257, %268 : vector<8x256xf32>
    %c0_170 = arith.constant 0 : index
    %c96_171 = arith.constant 96 : index
    %270 = vector.load %arg12[%c0_170, %c96_171] : memref<8x512xf32, #tpu.memory_space<vmem>>, vector<8x16xf32>
    %cst_172 = arith.constant dense<0.000000e+00> : vector<8x256xf32>
    %271 = tpu.matmul %270, %197, %cst_172 {dimension_numbers = #tpu.dot_dimension_numbers<[1], [0], [0], [1], [0, 0, 1, 1], [], []>} : vector<8x16xf32>, vector<16x256xf32>, vector<8x256xf32> -> vector<8x256xf32>
    %cst_173 = arith.constant 6.000000e+00 : f32
    %272 = vector.broadcast %cst_173 : f32 to vector<1x256xf32>
    %273 = arith.subf %190, %272 : vector<1x256xf32>
    %274 = math.absf %273 : vector<1x256xf32>
    %cst_174 = arith.constant 1.000000e+00 : f32
    %275 = vector.broadcast %cst_174 : f32 to vector<1x256xf32>
    %276 = arith.subf %275, %274 : vector<1x256xf32>
    %cst_175 = arith.constant 0.000000e+00 : f32
    %277 = vector.broadcast %cst_175 : f32 to vector<1x256xf32>
    %278 = arith.maximumf %277, %276 : vector<1x256xf32>
    %279 = vector.broadcast %278 : vector<1x256xf32> to vector<8x256xf32>
    %280 = arith.mulf %271, %279 : vector<8x256xf32>
    %281 = arith.addf %269, %280 : vector<8x256xf32>
    %c0_176 = arith.constant 0 : index
    %c112_177 = arith.constant 112 : index
    %282 = vector.load %arg12[%c0_176, %c112_177] : memref<8x512xf32, #tpu.memory_space<vmem>>, vector<8x16xf32>
    %cst_178 = arith.constant dense<0.000000e+00> : vector<8x256xf32>
    %283 = tpu.matmul %282, %197, %cst_178 {dimension_numbers = #tpu.dot_dimension_numbers<[1], [0], [0], [1], [0, 0, 1, 1], [], []>} : vector<8x16xf32>, vector<16x256xf32>, vector<8x256xf32> -> vector<8x256xf32>
    %cst_179 = arith.constant 7.000000e+00 : f32
    %284 = vector.broadcast %cst_179 : f32 to vector<1x256xf32>
    %285 = arith.subf %190, %284 : vector<1x256xf32>
    %286 = math.absf %285 : vector<1x256xf32>
    %cst_180 = arith.constant 1.000000e+00 : f32
    %287 = vector.broadcast %cst_180 : f32 to vector<1x256xf32>
    %288 = arith.subf %287, %286 : vector<1x256xf32>
    %cst_181 = arith.constant 0.000000e+00 : f32
    %289 = vector.broadcast %cst_181 : f32 to vector<1x256xf32>
    %290 = arith.maximumf %289, %288 : vector<1x256xf32>
    %291 = vector.broadcast %290 : vector<1x256xf32> to vector<8x256xf32>
    %292 = arith.mulf %283, %291 : vector<8x256xf32>
    %293 = arith.addf %281, %292 : vector<8x256xf32>
    %c0_182 = arith.constant 0 : index
    %c128 = arith.constant 128 : index
    %294 = vector.load %arg12[%c0_182, %c128] : memref<8x512xf32, #tpu.memory_space<vmem>>, vector<8x16xf32>
    %cst_183 = arith.constant dense<0.000000e+00> : vector<8x256xf32>
    %295 = tpu.matmul %294, %197, %cst_183 {dimension_numbers = #tpu.dot_dimension_numbers<[1], [0], [0], [1], [0, 0, 1, 1], [], []>} : vector<8x16xf32>, vector<16x256xf32>, vector<8x256xf32> -> vector<8x256xf32>
    %cst_184 = arith.constant 8.000000e+00 : f32
    %296 = vector.broadcast %cst_184 : f32 to vector<1x256xf32>
    %297 = arith.subf %190, %296 : vector<1x256xf32>
    %298 = math.absf %297 : vector<1x256xf32>
    %cst_185 = arith.constant 1.000000e+00 : f32
    %299 = vector.broadcast %cst_185 : f32 to vector<1x256xf32>
    %300 = arith.subf %299, %298 : vector<1x256xf32>
    %cst_186 = arith.constant 0.000000e+00 : f32
    %301 = vector.broadcast %cst_186 : f32 to vector<1x256xf32>
    %302 = arith.maximumf %301, %300 : vector<1x256xf32>
    %303 = vector.broadcast %302 : vector<1x256xf32> to vector<8x256xf32>
    %304 = arith.mulf %295, %303 : vector<8x256xf32>
    %305 = arith.addf %293, %304 : vector<8x256xf32>
    %c0_187 = arith.constant 0 : index
    %c144 = arith.constant 144 : index
    %306 = vector.load %arg12[%c0_187, %c144] : memref<8x512xf32, #tpu.memory_space<vmem>>, vector<8x16xf32>
    %cst_188 = arith.constant dense<0.000000e+00> : vector<8x256xf32>
    %307 = tpu.matmul %306, %197, %cst_188 {dimension_numbers = #tpu.dot_dimension_numbers<[1], [0], [0], [1], [0, 0, 1, 1], [], []>} : vector<8x16xf32>, vector<16x256xf32>, vector<8x256xf32> -> vector<8x256xf32>
    %cst_189 = arith.constant 9.000000e+00 : f32
    %308 = vector.broadcast %cst_189 : f32 to vector<1x256xf32>
    %309 = arith.subf %190, %308 : vector<1x256xf32>
    %310 = math.absf %309 : vector<1x256xf32>
    %cst_190 = arith.constant 1.000000e+00 : f32
    %311 = vector.broadcast %cst_190 : f32 to vector<1x256xf32>
    %312 = arith.subf %311, %310 : vector<1x256xf32>
    %cst_191 = arith.constant 0.000000e+00 : f32
    %313 = vector.broadcast %cst_191 : f32 to vector<1x256xf32>
    %314 = arith.maximumf %313, %312 : vector<1x256xf32>
    %315 = vector.broadcast %314 : vector<1x256xf32> to vector<8x256xf32>
    %316 = arith.mulf %307, %315 : vector<8x256xf32>
    %317 = arith.addf %305, %316 : vector<8x256xf32>
    %c0_192 = arith.constant 0 : index
    %c160 = arith.constant 160 : index
    %318 = vector.load %arg12[%c0_192, %c160] : memref<8x512xf32, #tpu.memory_space<vmem>>, vector<8x16xf32>
    %cst_193 = arith.constant dense<0.000000e+00> : vector<8x256xf32>
    %319 = tpu.matmul %318, %197, %cst_193 {dimension_numbers = #tpu.dot_dimension_numbers<[1], [0], [0], [1], [0, 0, 1, 1], [], []>} : vector<8x16xf32>, vector<16x256xf32>, vector<8x256xf32> -> vector<8x256xf32>
    %cst_194 = arith.constant 1.000000e+01 : f32
    %320 = vector.broadcast %cst_194 : f32 to vector<1x256xf32>
    %321 = arith.subf %190, %320 : vector<1x256xf32>
    %322 = math.absf %321 : vector<1x256xf32>
    %cst_195 = arith.constant 1.000000e+00 : f32
    %323 = vector.broadcast %cst_195 : f32 to vector<1x256xf32>
    %324 = arith.subf %323, %322 : vector<1x256xf32>
    %cst_196 = arith.constant 0.000000e+00 : f32
    %325 = vector.broadcast %cst_196 : f32 to vector<1x256xf32>
    %326 = arith.maximumf %325, %324 : vector<1x256xf32>
    %327 = vector.broadcast %326 : vector<1x256xf32> to vector<8x256xf32>
    %328 = arith.mulf %319, %327 : vector<8x256xf32>
    %329 = arith.addf %317, %328 : vector<8x256xf32>
    %c0_197 = arith.constant 0 : index
    %c176 = arith.constant 176 : index
    %330 = vector.load %arg12[%c0_197, %c176] : memref<8x512xf32, #tpu.memory_space<vmem>>, vector<8x16xf32>
    %cst_198 = arith.constant dense<0.000000e+00> : vector<8x256xf32>
    %331 = tpu.matmul %330, %197, %cst_198 {dimension_numbers = #tpu.dot_dimension_numbers<[1], [0], [0], [1], [0, 0, 1, 1], [], []>} : vector<8x16xf32>, vector<16x256xf32>, vector<8x256xf32> -> vector<8x256xf32>
    %cst_199 = arith.constant 1.100000e+01 : f32
    %332 = vector.broadcast %cst_199 : f32 to vector<1x256xf32>
    %333 = arith.subf %190, %332 : vector<1x256xf32>
    %334 = math.absf %333 : vector<1x256xf32>
    %cst_200 = arith.constant 1.000000e+00 : f32
    %335 = vector.broadcast %cst_200 : f32 to vector<1x256xf32>
    %336 = arith.subf %335, %334 : vector<1x256xf32>
    %cst_201 = arith.constant 0.000000e+00 : f32
    %337 = vector.broadcast %cst_201 : f32 to vector<1x256xf32>
    %338 = arith.maximumf %337, %336 : vector<1x256xf32>
    %339 = vector.broadcast %338 : vector<1x256xf32> to vector<8x256xf32>
    %340 = arith.mulf %331, %339 : vector<8x256xf32>
    %341 = arith.addf %329, %340 : vector<8x256xf32>
    %c0_202 = arith.constant 0 : index
    %c192 = arith.constant 192 : index
    %342 = vector.load %arg12[%c0_202, %c192] : memref<8x512xf32, #tpu.memory_space<vmem>>, vector<8x16xf32>
    %cst_203 = arith.constant dense<0.000000e+00> : vector<8x256xf32>
    %343 = tpu.matmul %342, %197, %cst_203 {dimension_numbers = #tpu.dot_dimension_numbers<[1], [0], [0], [1], [0, 0, 1, 1], [], []>} : vector<8x16xf32>, vector<16x256xf32>, vector<8x256xf32> -> vector<8x256xf32>
    %cst_204 = arith.constant 1.200000e+01 : f32
    %344 = vector.broadcast %cst_204 : f32 to vector<1x256xf32>
    %345 = arith.subf %190, %344 : vector<1x256xf32>
    %346 = math.absf %345 : vector<1x256xf32>
    %cst_205 = arith.constant 1.000000e+00 : f32
    %347 = vector.broadcast %cst_205 : f32 to vector<1x256xf32>
    %348 = arith.subf %347, %346 : vector<1x256xf32>
    %cst_206 = arith.constant 0.000000e+00 : f32
    %349 = vector.broadcast %cst_206 : f32 to vector<1x256xf32>
    %350 = arith.maximumf %349, %348 : vector<1x256xf32>
    %351 = vector.broadcast %350 : vector<1x256xf32> to vector<8x256xf32>
    %352 = arith.mulf %343, %351 : vector<8x256xf32>
    %353 = arith.addf %341, %352 : vector<8x256xf32>
    %c0_207 = arith.constant 0 : index
    %c208 = arith.constant 208 : index
    %354 = vector.load %arg12[%c0_207, %c208] : memref<8x512xf32, #tpu.memory_space<vmem>>, vector<8x16xf32>
    %cst_208 = arith.constant dense<0.000000e+00> : vector<8x256xf32>
    %355 = tpu.matmul %354, %197, %cst_208 {dimension_numbers = #tpu.dot_dimension_numbers<[1], [0], [0], [1], [0, 0, 1, 1], [], []>} : vector<8x16xf32>, vector<16x256xf32>, vector<8x256xf32> -> vector<8x256xf32>
    %cst_209 = arith.constant 1.300000e+01 : f32
    %356 = vector.broadcast %cst_209 : f32 to vector<1x256xf32>
    %357 = arith.subf %190, %356 : vector<1x256xf32>
    %358 = math.absf %357 : vector<1x256xf32>
    %cst_210 = arith.constant 1.000000e+00 : f32
    %359 = vector.broadcast %cst_210 : f32 to vector<1x256xf32>
    %360 = arith.subf %359, %358 : vector<1x256xf32>
    %cst_211 = arith.constant 0.000000e+00 : f32
    %361 = vector.broadcast %cst_211 : f32 to vector<1x256xf32>
    %362 = arith.maximumf %361, %360 : vector<1x256xf32>
    %363 = vector.broadcast %362 : vector<1x256xf32> to vector<8x256xf32>
    %364 = arith.mulf %355, %363 : vector<8x256xf32>
    %365 = arith.addf %353, %364 : vector<8x256xf32>
    %c0_212 = arith.constant 0 : index
    %c224 = arith.constant 224 : index
    %366 = vector.load %arg12[%c0_212, %c224] : memref<8x512xf32, #tpu.memory_space<vmem>>, vector<8x16xf32>
    %cst_213 = arith.constant dense<0.000000e+00> : vector<8x256xf32>
    %367 = tpu.matmul %366, %197, %cst_213 {dimension_numbers = #tpu.dot_dimension_numbers<[1], [0], [0], [1], [0, 0, 1, 1], [], []>} : vector<8x16xf32>, vector<16x256xf32>, vector<8x256xf32> -> vector<8x256xf32>
    %cst_214 = arith.constant 1.400000e+01 : f32
    %368 = vector.broadcast %cst_214 : f32 to vector<1x256xf32>
    %369 = arith.subf %190, %368 : vector<1x256xf32>
    %370 = math.absf %369 : vector<1x256xf32>
    %cst_215 = arith.constant 1.000000e+00 : f32
    %371 = vector.broadcast %cst_215 : f32 to vector<1x256xf32>
    %372 = arith.subf %371, %370 : vector<1x256xf32>
    %cst_216 = arith.constant 0.000000e+00 : f32
    %373 = vector.broadcast %cst_216 : f32 to vector<1x256xf32>
    %374 = arith.maximumf %373, %372 : vector<1x256xf32>
    %375 = vector.broadcast %374 : vector<1x256xf32> to vector<8x256xf32>
    %376 = arith.mulf %367, %375 : vector<8x256xf32>
    %377 = arith.addf %365, %376 : vector<8x256xf32>
    %c0_217 = arith.constant 0 : index
    %c240 = arith.constant 240 : index
    %378 = vector.load %arg12[%c0_217, %c240] : memref<8x512xf32, #tpu.memory_space<vmem>>, vector<8x16xf32>
    %cst_218 = arith.constant dense<0.000000e+00> : vector<8x256xf32>
    %379 = tpu.matmul %378, %197, %cst_218 {dimension_numbers = #tpu.dot_dimension_numbers<[1], [0], [0], [1], [0, 0, 1, 1], [], []>} : vector<8x16xf32>, vector<16x256xf32>, vector<8x256xf32> -> vector<8x256xf32>
    %cst_219 = arith.constant 1.500000e+01 : f32
    %380 = vector.broadcast %cst_219 : f32 to vector<1x256xf32>
    %381 = arith.subf %190, %380 : vector<1x256xf32>
    %382 = math.absf %381 : vector<1x256xf32>
    %cst_220 = arith.constant 1.000000e+00 : f32
    %383 = vector.broadcast %cst_220 : f32 to vector<1x256xf32>
    %384 = arith.subf %383, %382 : vector<1x256xf32>
    %cst_221 = arith.constant 0.000000e+00 : f32
    %385 = vector.broadcast %cst_221 : f32 to vector<1x256xf32>
    %386 = arith.maximumf %385, %384 : vector<1x256xf32>
    %387 = vector.broadcast %386 : vector<1x256xf32> to vector<8x256xf32>
    %388 = arith.mulf %379, %387 : vector<8x256xf32>
    %389 = arith.addf %377, %388 : vector<8x256xf32>
    %390 = vector.extract_strided_slice %176 {offsets = [2, 0], sizes = [1, 256], strides = [1, 1]} : vector<4x512xf32> to vector<1x256xf32>
    %cst_222 = arith.constant 5.000000e-01 : f32
    %391 = vector.broadcast %cst_222 : f32 to vector<1x256xf32>
    %392 = arith.mulf %391, %390 : vector<1x256xf32>
    %393 = arith.addf %178, %392 : vector<1x256xf32>
    %394 = vector.extract_strided_slice %176 {offsets = [3, 0], sizes = [1, 256], strides = [1, 1]} : vector<4x512xf32> to vector<1x256xf32>
    %cst_223 = arith.constant 5.000000e-01 : f32
    %395 = vector.broadcast %cst_223 : f32 to vector<1x256xf32>
    %396 = arith.mulf %395, %394 : vector<1x256xf32>
    %397 = arith.addf %179, %396 : vector<1x256xf32>
    %398 = vector.broadcast %393 : vector<1x256xf32> to vector<16x256xf32>
    %399 = arith.subf %398, %181 : vector<16x256xf32>
    %400 = math.absf %399 : vector<16x256xf32>
    %cst_224 = arith.constant 1.000000e+00 : f32
    %401 = vector.broadcast %cst_224 : f32 to vector<16x256xf32>
    %402 = arith.subf %401, %400 : vector<16x256xf32>
    %cst_225 = arith.constant 0.000000e+00 : f32
    %403 = vector.broadcast %cst_225 : f32 to vector<16x256xf32>
    %404 = arith.maximumf %403, %402 : vector<16x256xf32>
    %c0_226 = arith.constant 0 : index
    %c0_227 = arith.constant 0 : index
    %405 = vector.load %arg1[%c0_226, %c0_227] : memref<8x512xf32, #tpu.memory_space<vmem>>, vector<8x16xf32>
    %cst_228 = arith.constant dense<0.000000e+00> : vector<8x256xf32>
    %406 = tpu.matmul %405, %404, %cst_228 {dimension_numbers = #tpu.dot_dimension_numbers<[1], [0], [0], [1], [0, 0, 1, 1], [], []>} : vector<8x16xf32>, vector<16x256xf32>, vector<8x256xf32> -> vector<8x256xf32>
    %cst_229 = arith.constant 0.000000e+00 : f32
    %407 = vector.broadcast %cst_229 : f32 to vector<1x256xf32>
    %408 = arith.subf %397, %407 : vector<1x256xf32>
    %409 = math.absf %408 : vector<1x256xf32>
    %cst_230 = arith.constant 1.000000e+00 : f32
    %410 = vector.broadcast %cst_230 : f32 to vector<1x256xf32>
    %411 = arith.subf %410, %409 : vector<1x256xf32>
    %cst_231 = arith.constant 0.000000e+00 : f32
    %412 = vector.broadcast %cst_231 : f32 to vector<1x256xf32>
    %413 = arith.maximumf %412, %411 : vector<1x256xf32>
    %414 = vector.broadcast %413 : vector<1x256xf32> to vector<8x256xf32>
    %415 = arith.mulf %406, %414 : vector<8x256xf32>
    %416 = arith.addf %389, %415 : vector<8x256xf32>
    %c0_232 = arith.constant 0 : index
    %c16_233 = arith.constant 16 : index
    %417 = vector.load %arg1[%c0_232, %c16_233] : memref<8x512xf32, #tpu.memory_space<vmem>>, vector<8x16xf32>
    %cst_234 = arith.constant dense<0.000000e+00> : vector<8x256xf32>
    %418 = tpu.matmul %417, %404, %cst_234 {dimension_numbers = #tpu.dot_dimension_numbers<[1], [0], [0], [1], [0, 0, 1, 1], [], []>} : vector<8x16xf32>, vector<16x256xf32>, vector<8x256xf32> -> vector<8x256xf32>
    %cst_235 = arith.constant 1.000000e+00 : f32
    %419 = vector.broadcast %cst_235 : f32 to vector<1x256xf32>
    %420 = arith.subf %397, %419 : vector<1x256xf32>
    %421 = math.absf %420 : vector<1x256xf32>
    %cst_236 = arith.constant 1.000000e+00 : f32
    %422 = vector.broadcast %cst_236 : f32 to vector<1x256xf32>
    %423 = arith.subf %422, %421 : vector<1x256xf32>
    %cst_237 = arith.constant 0.000000e+00 : f32
    %424 = vector.broadcast %cst_237 : f32 to vector<1x256xf32>
    %425 = arith.maximumf %424, %423 : vector<1x256xf32>
    %426 = vector.broadcast %425 : vector<1x256xf32> to vector<8x256xf32>
    %427 = arith.mulf %418, %426 : vector<8x256xf32>
    %428 = arith.addf %416, %427 : vector<8x256xf32>
    %c0_238 = arith.constant 0 : index
    %c32_239 = arith.constant 32 : index
    %429 = vector.load %arg1[%c0_238, %c32_239] : memref<8x512xf32, #tpu.memory_space<vmem>>, vector<8x16xf32>
    %cst_240 = arith.constant dense<0.000000e+00> : vector<8x256xf32>
    %430 = tpu.matmul %429, %404, %cst_240 {dimension_numbers = #tpu.dot_dimension_numbers<[1], [0], [0], [1], [0, 0, 1, 1], [], []>} : vector<8x16xf32>, vector<16x256xf32>, vector<8x256xf32> -> vector<8x256xf32>
    %cst_241 = arith.constant 2.000000e+00 : f32
    %431 = vector.broadcast %cst_241 : f32 to vector<1x256xf32>
    %432 = arith.subf %397, %431 : vector<1x256xf32>
    %433 = math.absf %432 : vector<1x256xf32>
    %cst_242 = arith.constant 1.000000e+00 : f32
    %434 = vector.broadcast %cst_242 : f32 to vector<1x256xf32>
    %435 = arith.subf %434, %433 : vector<1x256xf32>
    %cst_243 = arith.constant 0.000000e+00 : f32
    %436 = vector.broadcast %cst_243 : f32 to vector<1x256xf32>
    %437 = arith.maximumf %436, %435 : vector<1x256xf32>
    %438 = vector.broadcast %437 : vector<1x256xf32> to vector<8x256xf32>
    %439 = arith.mulf %430, %438 : vector<8x256xf32>
    %440 = arith.addf %428, %439 : vector<8x256xf32>
    %c0_244 = arith.constant 0 : index
    %c48_245 = arith.constant 48 : index
    %441 = vector.load %arg1[%c0_244, %c48_245] : memref<8x512xf32, #tpu.memory_space<vmem>>, vector<8x16xf32>
    %cst_246 = arith.constant dense<0.000000e+00> : vector<8x256xf32>
    %442 = tpu.matmul %441, %404, %cst_246 {dimension_numbers = #tpu.dot_dimension_numbers<[1], [0], [0], [1], [0, 0, 1, 1], [], []>} : vector<8x16xf32>, vector<16x256xf32>, vector<8x256xf32> -> vector<8x256xf32>
    %cst_247 = arith.constant 3.000000e+00 : f32
    %443 = vector.broadcast %cst_247 : f32 to vector<1x256xf32>
    %444 = arith.subf %397, %443 : vector<1x256xf32>
    %445 = math.absf %444 : vector<1x256xf32>
    %cst_248 = arith.constant 1.000000e+00 : f32
    %446 = vector.broadcast %cst_248 : f32 to vector<1x256xf32>
    %447 = arith.subf %446, %445 : vector<1x256xf32>
    %cst_249 = arith.constant 0.000000e+00 : f32
    %448 = vector.broadcast %cst_249 : f32 to vector<1x256xf32>
    %449 = arith.maximumf %448, %447 : vector<1x256xf32>
    %450 = vector.broadcast %449 : vector<1x256xf32> to vector<8x256xf32>
    %451 = arith.mulf %442, %450 : vector<8x256xf32>
    %452 = arith.addf %440, %451 : vector<8x256xf32>
    %c0_250 = arith.constant 0 : index
    %c64_251 = arith.constant 64 : index
    %453 = vector.load %arg1[%c0_250, %c64_251] : memref<8x512xf32, #tpu.memory_space<vmem>>, vector<8x16xf32>
    %cst_252 = arith.constant dense<0.000000e+00> : vector<8x256xf32>
    %454 = tpu.matmul %453, %404, %cst_252 {dimension_numbers = #tpu.dot_dimension_numbers<[1], [0], [0], [1], [0, 0, 1, 1], [], []>} : vector<8x16xf32>, vector<16x256xf32>, vector<8x256xf32> -> vector<8x256xf32>
    %cst_253 = arith.constant 4.000000e+00 : f32
    %455 = vector.broadcast %cst_253 : f32 to vector<1x256xf32>
    %456 = arith.subf %397, %455 : vector<1x256xf32>
    %457 = math.absf %456 : vector<1x256xf32>
    %cst_254 = arith.constant 1.000000e+00 : f32
    %458 = vector.broadcast %cst_254 : f32 to vector<1x256xf32>
    %459 = arith.subf %458, %457 : vector<1x256xf32>
    %cst_255 = arith.constant 0.000000e+00 : f32
    %460 = vector.broadcast %cst_255 : f32 to vector<1x256xf32>
    %461 = arith.maximumf %460, %459 : vector<1x256xf32>
    %462 = vector.broadcast %461 : vector<1x256xf32> to vector<8x256xf32>
    %463 = arith.mulf %454, %462 : vector<8x256xf32>
    %464 = arith.addf %452, %463 : vector<8x256xf32>
    %c0_256 = arith.constant 0 : index
    %c80_257 = arith.constant 80 : index
    %465 = vector.load %arg1[%c0_256, %c80_257] : memref<8x512xf32, #tpu.memory_space<vmem>>, vector<8x16xf32>
    %cst_258 = arith.constant dense<0.000000e+00> : vector<8x256xf32>
    %466 = tpu.matmul %465, %404, %cst_258 {dimension_numbers = #tpu.dot_dimension_numbers<[1], [0], [0], [1], [0, 0, 1, 1], [], []>} : vector<8x16xf32>, vector<16x256xf32>, vector<8x256xf32> -> vector<8x256xf32>
    %cst_259 = arith.constant 5.000000e+00 : f32
    %467 = vector.broadcast %cst_259 : f32 to vector<1x256xf32>
    %468 = arith.subf %397, %467 : vector<1x256xf32>
    %469 = math.absf %468 : vector<1x256xf32>
    %cst_260 = arith.constant 1.000000e+00 : f32
    %470 = vector.broadcast %cst_260 : f32 to vector<1x256xf32>
    %471 = arith.subf %470, %469 : vector<1x256xf32>
    %cst_261 = arith.constant 0.000000e+00 : f32
    %472 = vector.broadcast %cst_261 : f32 to vector<1x256xf32>
    %473 = arith.maximumf %472, %471 : vector<1x256xf32>
    %474 = vector.broadcast %473 : vector<1x256xf32> to vector<8x256xf32>
    %475 = arith.mulf %466, %474 : vector<8x256xf32>
    %476 = arith.addf %464, %475 : vector<8x256xf32>
    %c0_262 = arith.constant 0 : index
    %c96_263 = arith.constant 96 : index
    %477 = vector.load %arg1[%c0_262, %c96_263] : memref<8x512xf32, #tpu.memory_space<vmem>>, vector<8x16xf32>
    %cst_264 = arith.constant dense<0.000000e+00> : vector<8x256xf32>
    %478 = tpu.matmul %477, %404, %cst_264 {dimension_numbers = #tpu.dot_dimension_numbers<[1], [0], [0], [1], [0, 0, 1, 1], [], []>} : vector<8x16xf32>, vector<16x256xf32>, vector<8x256xf32> -> vector<8x256xf32>
    %cst_265 = arith.constant 6.000000e+00 : f32
    %479 = vector.broadcast %cst_265 : f32 to vector<1x256xf32>
    %480 = arith.subf %397, %479 : vector<1x256xf32>
    %481 = math.absf %480 : vector<1x256xf32>
    %cst_266 = arith.constant 1.000000e+00 : f32
    %482 = vector.broadcast %cst_266 : f32 to vector<1x256xf32>
    %483 = arith.subf %482, %481 : vector<1x256xf32>
    %cst_267 = arith.constant 0.000000e+00 : f32
    %484 = vector.broadcast %cst_267 : f32 to vector<1x256xf32>
    %485 = arith.maximumf %484, %483 : vector<1x256xf32>
    %486 = vector.broadcast %485 : vector<1x256xf32> to vector<8x256xf32>
    %487 = arith.mulf %478, %486 : vector<8x256xf32>
    %488 = arith.addf %476, %487 : vector<8x256xf32>
    %c0_268 = arith.constant 0 : index
    %c112_269 = arith.constant 112 : index
    %489 = vector.load %arg1[%c0_268, %c112_269] : memref<8x512xf32, #tpu.memory_space<vmem>>, vector<8x16xf32>
    %cst_270 = arith.constant dense<0.000000e+00> : vector<8x256xf32>
    %490 = tpu.matmul %489, %404, %cst_270 {dimension_numbers = #tpu.dot_dimension_numbers<[1], [0], [0], [1], [0, 0, 1, 1], [], []>} : vector<8x16xf32>, vector<16x256xf32>, vector<8x256xf32> -> vector<8x256xf32>
    %cst_271 = arith.constant 7.000000e+00 : f32
    %491 = vector.broadcast %cst_271 : f32 to vector<1x256xf32>
    %492 = arith.subf %397, %491 : vector<1x256xf32>
    %493 = math.absf %492 : vector<1x256xf32>
    %cst_272 = arith.constant 1.000000e+00 : f32
    %494 = vector.broadcast %cst_272 : f32 to vector<1x256xf32>
    %495 = arith.subf %494, %493 : vector<1x256xf32>
    %cst_273 = arith.constant 0.000000e+00 : f32
    %496 = vector.broadcast %cst_273 : f32 to vector<1x256xf32>
    %497 = arith.maximumf %496, %495 : vector<1x256xf32>
    %498 = vector.broadcast %497 : vector<1x256xf32> to vector<8x256xf32>
    %499 = arith.mulf %490, %498 : vector<8x256xf32>
    %500 = arith.addf %488, %499 : vector<8x256xf32>
    %c0_274 = arith.constant 0 : index
    %c128_275 = arith.constant 128 : index
    %501 = vector.load %arg1[%c0_274, %c128_275] : memref<8x512xf32, #tpu.memory_space<vmem>>, vector<8x16xf32>
    %cst_276 = arith.constant dense<0.000000e+00> : vector<8x256xf32>
    %502 = tpu.matmul %501, %404, %cst_276 {dimension_numbers = #tpu.dot_dimension_numbers<[1], [0], [0], [1], [0, 0, 1, 1], [], []>} : vector<8x16xf32>, vector<16x256xf32>, vector<8x256xf32> -> vector<8x256xf32>
    %cst_277 = arith.constant 8.000000e+00 : f32
    %503 = vector.broadcast %cst_277 : f32 to vector<1x256xf32>
    %504 = arith.subf %397, %503 : vector<1x256xf32>
    %505 = math.absf %504 : vector<1x256xf32>
    %cst_278 = arith.constant 1.000000e+00 : f32
    %506 = vector.broadcast %cst_278 : f32 to vector<1x256xf32>
    %507 = arith.subf %506, %505 : vector<1x256xf32>
    %cst_279 = arith.constant 0.000000e+00 : f32
    %508 = vector.broadcast %cst_279 : f32 to vector<1x256xf32>
    %509 = arith.maximumf %508, %507 : vector<1x256xf32>
    %510 = vector.broadcast %509 : vector<1x256xf32> to vector<8x256xf32>
    %511 = arith.mulf %502, %510 : vector<8x256xf32>
    %512 = arith.addf %500, %511 : vector<8x256xf32>
    %c0_280 = arith.constant 0 : index
    %c144_281 = arith.constant 144 : index
    %513 = vector.load %arg1[%c0_280, %c144_281] : memref<8x512xf32, #tpu.memory_space<vmem>>, vector<8x16xf32>
    %cst_282 = arith.constant dense<0.000000e+00> : vector<8x256xf32>
    %514 = tpu.matmul %513, %404, %cst_282 {dimension_numbers = #tpu.dot_dimension_numbers<[1], [0], [0], [1], [0, 0, 1, 1], [], []>} : vector<8x16xf32>, vector<16x256xf32>, vector<8x256xf32> -> vector<8x256xf32>
    %cst_283 = arith.constant 9.000000e+00 : f32
    %515 = vector.broadcast %cst_283 : f32 to vector<1x256xf32>
    %516 = arith.subf %397, %515 : vector<1x256xf32>
    %517 = math.absf %516 : vector<1x256xf32>
    %cst_284 = arith.constant 1.000000e+00 : f32
    %518 = vector.broadcast %cst_284 : f32 to vector<1x256xf32>
    %519 = arith.subf %518, %517 : vector<1x256xf32>
    %cst_285 = arith.constant 0.000000e+00 : f32
    %520 = vector.broadcast %cst_285 : f32 to vector<1x256xf32>
    %521 = arith.maximumf %520, %519 : vector<1x256xf32>
    %522 = vector.broadcast %521 : vector<1x256xf32> to vector<8x256xf32>
    %523 = arith.mulf %514, %522 : vector<8x256xf32>
    %524 = arith.addf %512, %523 : vector<8x256xf32>
    %c0_286 = arith.constant 0 : index
    %c160_287 = arith.constant 160 : index
    %525 = vector.load %arg1[%c0_286, %c160_287] : memref<8x512xf32, #tpu.memory_space<vmem>>, vector<8x16xf32>
    %cst_288 = arith.constant dense<0.000000e+00> : vector<8x256xf32>
    %526 = tpu.matmul %525, %404, %cst_288 {dimension_numbers = #tpu.dot_dimension_numbers<[1], [0], [0], [1], [0, 0, 1, 1], [], []>} : vector<8x16xf32>, vector<16x256xf32>, vector<8x256xf32> -> vector<8x256xf32>
    %cst_289 = arith.constant 1.000000e+01 : f32
    %527 = vector.broadcast %cst_289 : f32 to vector<1x256xf32>
    %528 = arith.subf %397, %527 : vector<1x256xf32>
    %529 = math.absf %528 : vector<1x256xf32>
    %cst_290 = arith.constant 1.000000e+00 : f32
    %530 = vector.broadcast %cst_290 : f32 to vector<1x256xf32>
    %531 = arith.subf %530, %529 : vector<1x256xf32>
    %cst_291 = arith.constant 0.000000e+00 : f32
    %532 = vector.broadcast %cst_291 : f32 to vector<1x256xf32>
    %533 = arith.maximumf %532, %531 : vector<1x256xf32>
    %534 = vector.broadcast %533 : vector<1x256xf32> to vector<8x256xf32>
    %535 = arith.mulf %526, %534 : vector<8x256xf32>
    %536 = arith.addf %524, %535 : vector<8x256xf32>
    %c0_292 = arith.constant 0 : index
    %c176_293 = arith.constant 176 : index
    %537 = vector.load %arg1[%c0_292, %c176_293] : memref<8x512xf32, #tpu.memory_space<vmem>>, vector<8x16xf32>
    %cst_294 = arith.constant dense<0.000000e+00> : vector<8x256xf32>
    %538 = tpu.matmul %537, %404, %cst_294 {dimension_numbers = #tpu.dot_dimension_numbers<[1], [0], [0], [1], [0, 0, 1, 1], [], []>} : vector<8x16xf32>, vector<16x256xf32>, vector<8x256xf32> -> vector<8x256xf32>
    %cst_295 = arith.constant 1.100000e+01 : f32
    %539 = vector.broadcast %cst_295 : f32 to vector<1x256xf32>
    %540 = arith.subf %397, %539 : vector<1x256xf32>
    %541 = math.absf %540 : vector<1x256xf32>
    %cst_296 = arith.constant 1.000000e+00 : f32
    %542 = vector.broadcast %cst_296 : f32 to vector<1x256xf32>
    %543 = arith.subf %542, %541 : vector<1x256xf32>
    %cst_297 = arith.constant 0.000000e+00 : f32
    %544 = vector.broadcast %cst_297 : f32 to vector<1x256xf32>
    %545 = arith.maximumf %544, %543 : vector<1x256xf32>
    %546 = vector.broadcast %545 : vector<1x256xf32> to vector<8x256xf32>
    %547 = arith.mulf %538, %546 : vector<8x256xf32>
    %548 = arith.addf %536, %547 : vector<8x256xf32>
    %c0_298 = arith.constant 0 : index
    %c192_299 = arith.constant 192 : index
    %549 = vector.load %arg1[%c0_298, %c192_299] : memref<8x512xf32, #tpu.memory_space<vmem>>, vector<8x16xf32>
    %cst_300 = arith.constant dense<0.000000e+00> : vector<8x256xf32>
    %550 = tpu.matmul %549, %404, %cst_300 {dimension_numbers = #tpu.dot_dimension_numbers<[1], [0], [0], [1], [0, 0, 1, 1], [], []>} : vector<8x16xf32>, vector<16x256xf32>, vector<8x256xf32> -> vector<8x256xf32>
    %cst_301 = arith.constant 1.200000e+01 : f32
    %551 = vector.broadcast %cst_301 : f32 to vector<1x256xf32>
    %552 = arith.subf %397, %551 : vector<1x256xf32>
    %553 = math.absf %552 : vector<1x256xf32>
    %cst_302 = arith.constant 1.000000e+00 : f32
    %554 = vector.broadcast %cst_302 : f32 to vector<1x256xf32>
    %555 = arith.subf %554, %553 : vector<1x256xf32>
    %cst_303 = arith.constant 0.000000e+00 : f32
    %556 = vector.broadcast %cst_303 : f32 to vector<1x256xf32>
    %557 = arith.maximumf %556, %555 : vector<1x256xf32>
    %558 = vector.broadcast %557 : vector<1x256xf32> to vector<8x256xf32>
    %559 = arith.mulf %550, %558 : vector<8x256xf32>
    %560 = arith.addf %548, %559 : vector<8x256xf32>
    %c0_304 = arith.constant 0 : index
    %c208_305 = arith.constant 208 : index
    %561 = vector.load %arg1[%c0_304, %c208_305] : memref<8x512xf32, #tpu.memory_space<vmem>>, vector<8x16xf32>
    %cst_306 = arith.constant dense<0.000000e+00> : vector<8x256xf32>
    %562 = tpu.matmul %561, %404, %cst_306 {dimension_numbers = #tpu.dot_dimension_numbers<[1], [0], [0], [1], [0, 0, 1, 1], [], []>} : vector<8x16xf32>, vector<16x256xf32>, vector<8x256xf32> -> vector<8x256xf32>
    %cst_307 = arith.constant 1.300000e+01 : f32
    %563 = vector.broadcast %cst_307 : f32 to vector<1x256xf32>
    %564 = arith.subf %397, %563 : vector<1x256xf32>
    %565 = math.absf %564 : vector<1x256xf32>
    %cst_308 = arith.constant 1.000000e+00 : f32
    %566 = vector.broadcast %cst_308 : f32 to vector<1x256xf32>
    %567 = arith.subf %566, %565 : vector<1x256xf32>
    %cst_309 = arith.constant 0.000000e+00 : f32
    %568 = vector.broadcast %cst_309 : f32 to vector<1x256xf32>
    %569 = arith.maximumf %568, %567 : vector<1x256xf32>
    %570 = vector.broadcast %569 : vector<1x256xf32> to vector<8x256xf32>
    %571 = arith.mulf %562, %570 : vector<8x256xf32>
    %572 = arith.addf %560, %571 : vector<8x256xf32>
    %c0_310 = arith.constant 0 : index
    %c224_311 = arith.constant 224 : index
    %573 = vector.load %arg1[%c0_310, %c224_311] : memref<8x512xf32, #tpu.memory_space<vmem>>, vector<8x16xf32>
    %cst_312 = arith.constant dense<0.000000e+00> : vector<8x256xf32>
    %574 = tpu.matmul %573, %404, %cst_312 {dimension_numbers = #tpu.dot_dimension_numbers<[1], [0], [0], [1], [0, 0, 1, 1], [], []>} : vector<8x16xf32>, vector<16x256xf32>, vector<8x256xf32> -> vector<8x256xf32>
    %cst_313 = arith.constant 1.400000e+01 : f32
    %575 = vector.broadcast %cst_313 : f32 to vector<1x256xf32>
    %576 = arith.subf %397, %575 : vector<1x256xf32>
    %577 = math.absf %576 : vector<1x256xf32>
    %cst_314 = arith.constant 1.000000e+00 : f32
    %578 = vector.broadcast %cst_314 : f32 to vector<1x256xf32>
    %579 = arith.subf %578, %577 : vector<1x256xf32>
    %cst_315 = arith.constant 0.000000e+00 : f32
    %580 = vector.broadcast %cst_315 : f32 to vector<1x256xf32>
    %581 = arith.maximumf %580, %579 : vector<1x256xf32>
    %582 = vector.broadcast %581 : vector<1x256xf32> to vector<8x256xf32>
    %583 = arith.mulf %574, %582 : vector<8x256xf32>
    %584 = arith.addf %572, %583 : vector<8x256xf32>
    %c0_316 = arith.constant 0 : index
    %c240_317 = arith.constant 240 : index
    %585 = vector.load %arg1[%c0_316, %c240_317] : memref<8x512xf32, #tpu.memory_space<vmem>>, vector<8x16xf32>
    %cst_318 = arith.constant dense<0.000000e+00> : vector<8x256xf32>
    %586 = tpu.matmul %585, %404, %cst_318 {dimension_numbers = #tpu.dot_dimension_numbers<[1], [0], [0], [1], [0, 0, 1, 1], [], []>} : vector<8x16xf32>, vector<16x256xf32>, vector<8x256xf32> -> vector<8x256xf32>
    %cst_319 = arith.constant 1.500000e+01 : f32
    %587 = vector.broadcast %cst_319 : f32 to vector<1x256xf32>
    %588 = arith.subf %397, %587 : vector<1x256xf32>
    %589 = math.absf %588 : vector<1x256xf32>
    %cst_320 = arith.constant 1.000000e+00 : f32
    %590 = vector.broadcast %cst_320 : f32 to vector<1x256xf32>
    %591 = arith.subf %590, %589 : vector<1x256xf32>
    %cst_321 = arith.constant 0.000000e+00 : f32
    %592 = vector.broadcast %cst_321 : f32 to vector<1x256xf32>
    %593 = arith.maximumf %592, %591 : vector<1x256xf32>
    %594 = vector.broadcast %593 : vector<1x256xf32> to vector<8x256xf32>
    %595 = arith.mulf %586, %594 : vector<8x256xf32>
    %596 = arith.addf %584, %595 : vector<8x256xf32>
    %c0_322 = arith.constant 0 : index
    %c0_323 = arith.constant 0 : index
    %597 = vector.load %arg11[%c0_322, %c0_323] : memref<8x512xf32, #tpu.memory_space<vmem>>, vector<8x256xf32>
    tpu.vector_store %arg11[%c0_322, %c0_323], %596 {strides = array<i32>} : memref<8x512xf32, #tpu.memory_space<vmem>>, vector<8x256xf32>,
    %cst_324 = arith.constant 0.000000e+00 : f32
    %598 = vector.broadcast %cst_324 : f32 to vector<8x256xf32>
    %599 = vector.extract_strided_slice %176 {offsets = [0, 256], sizes = [1, 256], strides = [1, 1]} : vector<4x512xf32> to vector<1x256xf32>
    %cst_325 = arith.constant 5.000000e-01 : f32
    %600 = vector.broadcast %cst_325 : f32 to vector<1x256xf32>
    %601 = arith.mulf %600, %599 : vector<1x256xf32>
    %602 = arith.addf %178, %601 : vector<1x256xf32>
    %603 = vector.extract_strided_slice %176 {offsets = [1, 256], sizes = [1, 256], strides = [1, 1]} : vector<4x512xf32> to vector<1x256xf32>
    %cst_326 = arith.constant 5.000000e-01 : f32
    %604 = vector.broadcast %cst_326 : f32 to vector<1x256xf32>
    %605 = arith.mulf %604, %603 : vector<1x256xf32>
    %606 = arith.addf %179, %605 : vector<1x256xf32>
    %607 = vector.broadcast %602 : vector<1x256xf32> to vector<16x256xf32>
    %608 = arith.subf %607, %181 : vector<16x256xf32>
    %609 = math.absf %608 : vector<16x256xf32>
    %cst_327 = arith.constant 1.000000e+00 : f32
    %610 = vector.broadcast %cst_327 : f32 to vector<16x256xf32>
    %611 = arith.subf %610, %609 : vector<16x256xf32>
    %cst_328 = arith.constant 0.000000e+00 : f32
    %612 = vector.broadcast %cst_328 : f32 to vector<16x256xf32>
    %613 = arith.maximumf %612, %611 : vector<16x256xf32>
    %c0_329 = arith.constant 0 : index
    %c256_330 = arith.constant 256 : index
    %614 = vector.load %arg12[%c0_329, %c256_330] : memref<8x512xf32, #tpu.memory_space<vmem>>, vector<8x16xf32>
    %cst_331 = arith.constant dense<0.000000e+00> : vector<8x256xf32>
    %615 = tpu.matmul %614, %613, %cst_331 {dimension_numbers = #tpu.dot_dimension_numbers<[1], [0], [0], [1], [0, 0, 1, 1], [], []>} : vector<8x16xf32>, vector<16x256xf32>, vector<8x256xf32> -> vector<8x256xf32>
    %cst_332 = arith.constant 0.000000e+00 : f32
    %616 = vector.broadcast %cst_332 : f32 to vector<1x256xf32>
    %617 = arith.subf %606, %616 : vector<1x256xf32>
    %618 = math.absf %617 : vector<1x256xf32>
    %cst_333 = arith.constant 1.000000e+00 : f32
    %619 = vector.broadcast %cst_333 : f32 to vector<1x256xf32>
    %620 = arith.subf %619, %618 : vector<1x256xf32>
    %cst_334 = arith.constant 0.000000e+00 : f32
    %621 = vector.broadcast %cst_334 : f32 to vector<1x256xf32>
    %622 = arith.maximumf %621, %620 : vector<1x256xf32>
    %623 = vector.broadcast %622 : vector<1x256xf32> to vector<8x256xf32>
    %624 = arith.mulf %615, %623 : vector<8x256xf32>
    %625 = arith.addf %598, %624 : vector<8x256xf32>
    %c0_335 = arith.constant 0 : index
    %c272 = arith.constant 272 : index
    %626 = vector.load %arg12[%c0_335, %c272] : memref<8x512xf32, #tpu.memory_space<vmem>>, vector<8x16xf32>
    %cst_336 = arith.constant dense<0.000000e+00> : vector<8x256xf32>
    %627 = tpu.matmul %626, %613, %cst_336 {dimension_numbers = #tpu.dot_dimension_numbers<[1], [0], [0], [1], [0, 0, 1, 1], [], []>} : vector<8x16xf32>, vector<16x256xf32>, vector<8x256xf32> -> vector<8x256xf32>
    %cst_337 = arith.constant 1.000000e+00 : f32
    %628 = vector.broadcast %cst_337 : f32 to vector<1x256xf32>
    %629 = arith.subf %606, %628 : vector<1x256xf32>
    %630 = math.absf %629 : vector<1x256xf32>
    %cst_338 = arith.constant 1.000000e+00 : f32
    %631 = vector.broadcast %cst_338 : f32 to vector<1x256xf32>
    %632 = arith.subf %631, %630 : vector<1x256xf32>
    %cst_339 = arith.constant 0.000000e+00 : f32
    %633 = vector.broadcast %cst_339 : f32 to vector<1x256xf32>
    %634 = arith.maximumf %633, %632 : vector<1x256xf32>
    %635 = vector.broadcast %634 : vector<1x256xf32> to vector<8x256xf32>
    %636 = arith.mulf %627, %635 : vector<8x256xf32>
    %637 = arith.addf %625, %636 : vector<8x256xf32>
    %c0_340 = arith.constant 0 : index
    %c288 = arith.constant 288 : index
    %638 = vector.load %arg12[%c0_340, %c288] : memref<8x512xf32, #tpu.memory_space<vmem>>, vector<8x16xf32>
    %cst_341 = arith.constant dense<0.000000e+00> : vector<8x256xf32>
    %639 = tpu.matmul %638, %613, %cst_341 {dimension_numbers = #tpu.dot_dimension_numbers<[1], [0], [0], [1], [0, 0, 1, 1], [], []>} : vector<8x16xf32>, vector<16x256xf32>, vector<8x256xf32> -> vector<8x256xf32>
    %cst_342 = arith.constant 2.000000e+00 : f32
    %640 = vector.broadcast %cst_342 : f32 to vector<1x256xf32>
    %641 = arith.subf %606, %640 : vector<1x256xf32>
    %642 = math.absf %641 : vector<1x256xf32>
    %cst_343 = arith.constant 1.000000e+00 : f32
    %643 = vector.broadcast %cst_343 : f32 to vector<1x256xf32>
    %644 = arith.subf %643, %642 : vector<1x256xf32>
    %cst_344 = arith.constant 0.000000e+00 : f32
    %645 = vector.broadcast %cst_344 : f32 to vector<1x256xf32>
    %646 = arith.maximumf %645, %644 : vector<1x256xf32>
    %647 = vector.broadcast %646 : vector<1x256xf32> to vector<8x256xf32>
    %648 = arith.mulf %639, %647 : vector<8x256xf32>
    %649 = arith.addf %637, %648 : vector<8x256xf32>
    %c0_345 = arith.constant 0 : index
    %c304 = arith.constant 304 : index
    %650 = vector.load %arg12[%c0_345, %c304] : memref<8x512xf32, #tpu.memory_space<vmem>>, vector<8x16xf32>
    %cst_346 = arith.constant dense<0.000000e+00> : vector<8x256xf32>
    %651 = tpu.matmul %650, %613, %cst_346 {dimension_numbers = #tpu.dot_dimension_numbers<[1], [0], [0], [1], [0, 0, 1, 1], [], []>} : vector<8x16xf32>, vector<16x256xf32>, vector<8x256xf32> -> vector<8x256xf32>
    %cst_347 = arith.constant 3.000000e+00 : f32
    %652 = vector.broadcast %cst_347 : f32 to vector<1x256xf32>
    %653 = arith.subf %606, %652 : vector<1x256xf32>
    %654 = math.absf %653 : vector<1x256xf32>
    %cst_348 = arith.constant 1.000000e+00 : f32
    %655 = vector.broadcast %cst_348 : f32 to vector<1x256xf32>
    %656 = arith.subf %655, %654 : vector<1x256xf32>
    %cst_349 = arith.constant 0.000000e+00 : f32
    %657 = vector.broadcast %cst_349 : f32 to vector<1x256xf32>
    %658 = arith.maximumf %657, %656 : vector<1x256xf32>
    %659 = vector.broadcast %658 : vector<1x256xf32> to vector<8x256xf32>
    %660 = arith.mulf %651, %659 : vector<8x256xf32>
    %661 = arith.addf %649, %660 : vector<8x256xf32>
    %c0_350 = arith.constant 0 : index
    %c320 = arith.constant 320 : index
    %662 = vector.load %arg12[%c0_350, %c320] : memref<8x512xf32, #tpu.memory_space<vmem>>, vector<8x16xf32>
    %cst_351 = arith.constant dense<0.000000e+00> : vector<8x256xf32>
    %663 = tpu.matmul %662, %613, %cst_351 {dimension_numbers = #tpu.dot_dimension_numbers<[1], [0], [0], [1], [0, 0, 1, 1], [], []>} : vector<8x16xf32>, vector<16x256xf32>, vector<8x256xf32> -> vector<8x256xf32>
    %cst_352 = arith.constant 4.000000e+00 : f32
    %664 = vector.broadcast %cst_352 : f32 to vector<1x256xf32>
    %665 = arith.subf %606, %664 : vector<1x256xf32>
    %666 = math.absf %665 : vector<1x256xf32>
    %cst_353 = arith.constant 1.000000e+00 : f32
    %667 = vector.broadcast %cst_353 : f32 to vector<1x256xf32>
    %668 = arith.subf %667, %666 : vector<1x256xf32>
    %cst_354 = arith.constant 0.000000e+00 : f32
    %669 = vector.broadcast %cst_354 : f32 to vector<1x256xf32>
    %670 = arith.maximumf %669, %668 : vector<1x256xf32>
    %671 = vector.broadcast %670 : vector<1x256xf32> to vector<8x256xf32>
    %672 = arith.mulf %663, %671 : vector<8x256xf32>
    %673 = arith.addf %661, %672 : vector<8x256xf32>
    %c0_355 = arith.constant 0 : index
    %c336 = arith.constant 336 : index
    %674 = vector.load %arg12[%c0_355, %c336] : memref<8x512xf32, #tpu.memory_space<vmem>>, vector<8x16xf32>
    %cst_356 = arith.constant dense<0.000000e+00> : vector<8x256xf32>
    %675 = tpu.matmul %674, %613, %cst_356 {dimension_numbers = #tpu.dot_dimension_numbers<[1], [0], [0], [1], [0, 0, 1, 1], [], []>} : vector<8x16xf32>, vector<16x256xf32>, vector<8x256xf32> -> vector<8x256xf32>
    %cst_357 = arith.constant 5.000000e+00 : f32
    %676 = vector.broadcast %cst_357 : f32 to vector<1x256xf32>
    %677 = arith.subf %606, %676 : vector<1x256xf32>
    %678 = math.absf %677 : vector<1x256xf32>
    %cst_358 = arith.constant 1.000000e+00 : f32
    %679 = vector.broadcast %cst_358 : f32 to vector<1x256xf32>
    %680 = arith.subf %679, %678 : vector<1x256xf32>
    %cst_359 = arith.constant 0.000000e+00 : f32
    %681 = vector.broadcast %cst_359 : f32 to vector<1x256xf32>
    %682 = arith.maximumf %681, %680 : vector<1x256xf32>
    %683 = vector.broadcast %682 : vector<1x256xf32> to vector<8x256xf32>
    %684 = arith.mulf %675, %683 : vector<8x256xf32>
    %685 = arith.addf %673, %684 : vector<8x256xf32>
    %c0_360 = arith.constant 0 : index
    %c352 = arith.constant 352 : index
    %686 = vector.load %arg12[%c0_360, %c352] : memref<8x512xf32, #tpu.memory_space<vmem>>, vector<8x16xf32>
    %cst_361 = arith.constant dense<0.000000e+00> : vector<8x256xf32>
    %687 = tpu.matmul %686, %613, %cst_361 {dimension_numbers = #tpu.dot_dimension_numbers<[1], [0], [0], [1], [0, 0, 1, 1], [], []>} : vector<8x16xf32>, vector<16x256xf32>, vector<8x256xf32> -> vector<8x256xf32>
    %cst_362 = arith.constant 6.000000e+00 : f32
    %688 = vector.broadcast %cst_362 : f32 to vector<1x256xf32>
    %689 = arith.subf %606, %688 : vector<1x256xf32>
    %690 = math.absf %689 : vector<1x256xf32>
    %cst_363 = arith.constant 1.000000e+00 : f32
    %691 = vector.broadcast %cst_363 : f32 to vector<1x256xf32>
    %692 = arith.subf %691, %690 : vector<1x256xf32>
    %cst_364 = arith.constant 0.000000e+00 : f32
    %693 = vector.broadcast %cst_364 : f32 to vector<1x256xf32>
    %694 = arith.maximumf %693, %692 : vector<1x256xf32>
    %695 = vector.broadcast %694 : vector<1x256xf32> to vector<8x256xf32>
    %696 = arith.mulf %687, %695 : vector<8x256xf32>
    %697 = arith.addf %685, %696 : vector<8x256xf32>
    %c0_365 = arith.constant 0 : index
    %c368 = arith.constant 368 : index
    %698 = vector.load %arg12[%c0_365, %c368] : memref<8x512xf32, #tpu.memory_space<vmem>>, vector<8x16xf32>
    %cst_366 = arith.constant dense<0.000000e+00> : vector<8x256xf32>
    %699 = tpu.matmul %698, %613, %cst_366 {dimension_numbers = #tpu.dot_dimension_numbers<[1], [0], [0], [1], [0, 0, 1, 1], [], []>} : vector<8x16xf32>, vector<16x256xf32>, vector<8x256xf32> -> vector<8x256xf32>
    %cst_367 = arith.constant 7.000000e+00 : f32
    %700 = vector.broadcast %cst_367 : f32 to vector<1x256xf32>
    %701 = arith.subf %606, %700 : vector<1x256xf32>
    %702 = math.absf %701 : vector<1x256xf32>
    %cst_368 = arith.constant 1.000000e+00 : f32
    %703 = vector.broadcast %cst_368 : f32 to vector<1x256xf32>
    %704 = arith.subf %703, %702 : vector<1x256xf32>
    %cst_369 = arith.constant 0.000000e+00 : f32
    %705 = vector.broadcast %cst_369 : f32 to vector<1x256xf32>
    %706 = arith.maximumf %705, %704 : vector<1x256xf32>
    %707 = vector.broadcast %706 : vector<1x256xf32> to vector<8x256xf32>
    %708 = arith.mulf %699, %707 : vector<8x256xf32>
    %709 = arith.addf %697, %708 : vector<8x256xf32>
    %c0_370 = arith.constant 0 : index
    %c384 = arith.constant 384 : index
    %710 = vector.load %arg12[%c0_370, %c384] : memref<8x512xf32, #tpu.memory_space<vmem>>, vector<8x16xf32>
    %cst_371 = arith.constant dense<0.000000e+00> : vector<8x256xf32>
    %711 = tpu.matmul %710, %613, %cst_371 {dimension_numbers = #tpu.dot_dimension_numbers<[1], [0], [0], [1], [0, 0, 1, 1], [], []>} : vector<8x16xf32>, vector<16x256xf32>, vector<8x256xf32> -> vector<8x256xf32>
    %cst_372 = arith.constant 8.000000e+00 : f32
    %712 = vector.broadcast %cst_372 : f32 to vector<1x256xf32>
    %713 = arith.subf %606, %712 : vector<1x256xf32>
    %714 = math.absf %713 : vector<1x256xf32>
    %cst_373 = arith.constant 1.000000e+00 : f32
    %715 = vector.broadcast %cst_373 : f32 to vector<1x256xf32>
    %716 = arith.subf %715, %714 : vector<1x256xf32>
    %cst_374 = arith.constant 0.000000e+00 : f32
    %717 = vector.broadcast %cst_374 : f32 to vector<1x256xf32>
    %718 = arith.maximumf %717, %716 : vector<1x256xf32>
    %719 = vector.broadcast %718 : vector<1x256xf32> to vector<8x256xf32>
    %720 = arith.mulf %711, %719 : vector<8x256xf32>
    %721 = arith.addf %709, %720 : vector<8x256xf32>
    %c0_375 = arith.constant 0 : index
    %c400 = arith.constant 400 : index
    %722 = vector.load %arg12[%c0_375, %c400] : memref<8x512xf32, #tpu.memory_space<vmem>>, vector<8x16xf32>
    %cst_376 = arith.constant dense<0.000000e+00> : vector<8x256xf32>
    %723 = tpu.matmul %722, %613, %cst_376 {dimension_numbers = #tpu.dot_dimension_numbers<[1], [0], [0], [1], [0, 0, 1, 1], [], []>} : vector<8x16xf32>, vector<16x256xf32>, vector<8x256xf32> -> vector<8x256xf32>
    %cst_377 = arith.constant 9.000000e+00 : f32
    %724 = vector.broadcast %cst_377 : f32 to vector<1x256xf32>
    %725 = arith.subf %606, %724 : vector<1x256xf32>
    %726 = math.absf %725 : vector<1x256xf32>
    %cst_378 = arith.constant 1.000000e+00 : f32
    %727 = vector.broadcast %cst_378 : f32 to vector<1x256xf32>
    %728 = arith.subf %727, %726 : vector<1x256xf32>
    %cst_379 = arith.constant 0.000000e+00 : f32
    %729 = vector.broadcast %cst_379 : f32 to vector<1x256xf32>
    %730 = arith.maximumf %729, %728 : vector<1x256xf32>
    %731 = vector.broadcast %730 : vector<1x256xf32> to vector<8x256xf32>
    %732 = arith.mulf %723, %731 : vector<8x256xf32>
    %733 = arith.addf %721, %732 : vector<8x256xf32>
    %c0_380 = arith.constant 0 : index
    %c416 = arith.constant 416 : index
    %734 = vector.load %arg12[%c0_380, %c416] : memref<8x512xf32, #tpu.memory_space<vmem>>, vector<8x16xf32>
    %cst_381 = arith.constant dense<0.000000e+00> : vector<8x256xf32>
    %735 = tpu.matmul %734, %613, %cst_381 {dimension_numbers = #tpu.dot_dimension_numbers<[1], [0], [0], [1], [0, 0, 1, 1], [], []>} : vector<8x16xf32>, vector<16x256xf32>, vector<8x256xf32> -> vector<8x256xf32>
    %cst_382 = arith.constant 1.000000e+01 : f32
    %736 = vector.broadcast %cst_382 : f32 to vector<1x256xf32>
    %737 = arith.subf %606, %736 : vector<1x256xf32>
    %738 = math.absf %737 : vector<1x256xf32>
    %cst_383 = arith.constant 1.000000e+00 : f32
    %739 = vector.broadcast %cst_383 : f32 to vector<1x256xf32>
    %740 = arith.subf %739, %738 : vector<1x256xf32>
    %cst_384 = arith.constant 0.000000e+00 : f32
    %741 = vector.broadcast %cst_384 : f32 to vector<1x256xf32>
    %742 = arith.maximumf %741, %740 : vector<1x256xf32>
    %743 = vector.broadcast %742 : vector<1x256xf32> to vector<8x256xf32>
    %744 = arith.mulf %735, %743 : vector<8x256xf32>
    %745 = arith.addf %733, %744 : vector<8x256xf32>
    %c0_385 = arith.constant 0 : index
    %c432 = arith.constant 432 : index
    %746 = vector.load %arg12[%c0_385, %c432] : memref<8x512xf32, #tpu.memory_space<vmem>>, vector<8x16xf32>
    %cst_386 = arith.constant dense<0.000000e+00> : vector<8x256xf32>
    %747 = tpu.matmul %746, %613, %cst_386 {dimension_numbers = #tpu.dot_dimension_numbers<[1], [0], [0], [1], [0, 0, 1, 1], [], []>} : vector<8x16xf32>, vector<16x256xf32>, vector<8x256xf32> -> vector<8x256xf32>
    %cst_387 = arith.constant 1.100000e+01 : f32
    %748 = vector.broadcast %cst_387 : f32 to vector<1x256xf32>
    %749 = arith.subf %606, %748 : vector<1x256xf32>
    %750 = math.absf %749 : vector<1x256xf32>
    %cst_388 = arith.constant 1.000000e+00 : f32
    %751 = vector.broadcast %cst_388 : f32 to vector<1x256xf32>
    %752 = arith.subf %751, %750 : vector<1x256xf32>
    %cst_389 = arith.constant 0.000000e+00 : f32
    %753 = vector.broadcast %cst_389 : f32 to vector<1x256xf32>
    %754 = arith.maximumf %753, %752 : vector<1x256xf32>
    %755 = vector.broadcast %754 : vector<1x256xf32> to vector<8x256xf32>
    %756 = arith.mulf %747, %755 : vector<8x256xf32>
    %757 = arith.addf %745, %756 : vector<8x256xf32>
    %c0_390 = arith.constant 0 : index
    %c448 = arith.constant 448 : index
    %758 = vector.load %arg12[%c0_390, %c448] : memref<8x512xf32, #tpu.memory_space<vmem>>, vector<8x16xf32>
    %cst_391 = arith.constant dense<0.000000e+00> : vector<8x256xf32>
    %759 = tpu.matmul %758, %613, %cst_391 {dimension_numbers = #tpu.dot_dimension_numbers<[1], [0], [0], [1], [0, 0, 1, 1], [], []>} : vector<8x16xf32>, vector<16x256xf32>, vector<8x256xf32> -> vector<8x256xf32>
    %cst_392 = arith.constant 1.200000e+01 : f32
    %760 = vector.broadcast %cst_392 : f32 to vector<1x256xf32>
    %761 = arith.subf %606, %760 : vector<1x256xf32>
    %762 = math.absf %761 : vector<1x256xf32>
    %cst_393 = arith.constant 1.000000e+00 : f32
    %763 = vector.broadcast %cst_393 : f32 to vector<1x256xf32>
    %764 = arith.subf %763, %762 : vector<1x256xf32>
    %cst_394 = arith.constant 0.000000e+00 : f32
    %765 = vector.broadcast %cst_394 : f32 to vector<1x256xf32>
    %766 = arith.maximumf %765, %764 : vector<1x256xf32>
    %767 = vector.broadcast %766 : vector<1x256xf32> to vector<8x256xf32>
    %768 = arith.mulf %759, %767 : vector<8x256xf32>
    %769 = arith.addf %757, %768 : vector<8x256xf32>
    %c0_395 = arith.constant 0 : index
    %c464 = arith.constant 464 : index
    %770 = vector.load %arg12[%c0_395, %c464] : memref<8x512xf32, #tpu.memory_space<vmem>>, vector<8x16xf32>
    %cst_396 = arith.constant dense<0.000000e+00> : vector<8x256xf32>
    %771 = tpu.matmul %770, %613, %cst_396 {dimension_numbers = #tpu.dot_dimension_numbers<[1], [0], [0], [1], [0, 0, 1, 1], [], []>} : vector<8x16xf32>, vector<16x256xf32>, vector<8x256xf32> -> vector<8x256xf32>
    %cst_397 = arith.constant 1.300000e+01 : f32
    %772 = vector.broadcast %cst_397 : f32 to vector<1x256xf32>
    %773 = arith.subf %606, %772 : vector<1x256xf32>
    %774 = math.absf %773 : vector<1x256xf32>
    %cst_398 = arith.constant 1.000000e+00 : f32
    %775 = vector.broadcast %cst_398 : f32 to vector<1x256xf32>
    %776 = arith.subf %775, %774 : vector<1x256xf32>
    %cst_399 = arith.constant 0.000000e+00 : f32
    %777 = vector.broadcast %cst_399 : f32 to vector<1x256xf32>
    %778 = arith.maximumf %777, %776 : vector<1x256xf32>
    %779 = vector.broadcast %778 : vector<1x256xf32> to vector<8x256xf32>
    %780 = arith.mulf %771, %779 : vector<8x256xf32>
    %781 = arith.addf %769, %780 : vector<8x256xf32>
    %c0_400 = arith.constant 0 : index
    %c480 = arith.constant 480 : index
    %782 = vector.load %arg12[%c0_400, %c480] : memref<8x512xf32, #tpu.memory_space<vmem>>, vector<8x16xf32>
    %cst_401 = arith.constant dense<0.000000e+00> : vector<8x256xf32>
    %783 = tpu.matmul %782, %613, %cst_401 {dimension_numbers = #tpu.dot_dimension_numbers<[1], [0], [0], [1], [0, 0, 1, 1], [], []>} : vector<8x16xf32>, vector<16x256xf32>, vector<8x256xf32> -> vector<8x256xf32>
    %cst_402 = arith.constant 1.400000e+01 : f32
    %784 = vector.broadcast %cst_402 : f32 to vector<1x256xf32>
    %785 = arith.subf %606, %784 : vector<1x256xf32>
    %786 = math.absf %785 : vector<1x256xf32>
    %cst_403 = arith.constant 1.000000e+00 : f32
    %787 = vector.broadcast %cst_403 : f32 to vector<1x256xf32>
    %788 = arith.subf %787, %786 : vector<1x256xf32>
    %cst_404 = arith.constant 0.000000e+00 : f32
    %789 = vector.broadcast %cst_404 : f32 to vector<1x256xf32>
    %790 = arith.maximumf %789, %788 : vector<1x256xf32>
    %791 = vector.broadcast %790 : vector<1x256xf32> to vector<8x256xf32>
    %792 = arith.mulf %783, %791 : vector<8x256xf32>
    %793 = arith.addf %781, %792 : vector<8x256xf32>
    %c0_405 = arith.constant 0 : index
    %c496 = arith.constant 496 : index
    %794 = vector.load %arg12[%c0_405, %c496] : memref<8x512xf32, #tpu.memory_space<vmem>>, vector<8x16xf32>
    %cst_406 = arith.constant dense<0.000000e+00> : vector<8x256xf32>
    %795 = tpu.matmul %794, %613, %cst_406 {dimension_numbers = #tpu.dot_dimension_numbers<[1], [0], [0], [1], [0, 0, 1, 1], [], []>} : vector<8x16xf32>, vector<16x256xf32>, vector<8x256xf32> -> vector<8x256xf32>
    %cst_407 = arith.constant 1.500000e+01 : f32
    %796 = vector.broadcast %cst_407 : f32 to vector<1x256xf32>
    %797 = arith.subf %606, %796 : vector<1x256xf32>
    %798 = math.absf %797 : vector<1x256xf32>
    %cst_408 = arith.constant 1.000000e+00 : f32
    %799 = vector.broadcast %cst_408 : f32 to vector<1x256xf32>
    %800 = arith.subf %799, %798 : vector<1x256xf32>
    %cst_409 = arith.constant 0.000000e+00 : f32
    %801 = vector.broadcast %cst_409 : f32 to vector<1x256xf32>
    %802 = arith.maximumf %801, %800 : vector<1x256xf32>
    %803 = vector.broadcast %802 : vector<1x256xf32> to vector<8x256xf32>
    %804 = arith.mulf %795, %803 : vector<8x256xf32>
    %805 = arith.addf %793, %804 : vector<8x256xf32>
    %806 = vector.extract_strided_slice %176 {offsets = [2, 256], sizes = [1, 256], strides = [1, 1]} : vector<4x512xf32> to vector<1x256xf32>
    %cst_410 = arith.constant 5.000000e-01 : f32
    %807 = vector.broadcast %cst_410 : f32 to vector<1x256xf32>
    %808 = arith.mulf %807, %806 : vector<1x256xf32>
    %809 = arith.addf %178, %808 : vector<1x256xf32>
    %810 = vector.extract_strided_slice %176 {offsets = [3, 256], sizes = [1, 256], strides = [1, 1]} : vector<4x512xf32> to vector<1x256xf32>
    %cst_411 = arith.constant 5.000000e-01 : f32
    %811 = vector.broadcast %cst_411 : f32 to vector<1x256xf32>
    %812 = arith.mulf %811, %810 : vector<1x256xf32>
    %813 = arith.addf %179, %812 : vector<1x256xf32>
    %814 = vector.broadcast %809 : vector<1x256xf32> to vector<16x256xf32>
    %815 = arith.subf %814, %181 : vector<16x256xf32>
    %816 = math.absf %815 : vector<16x256xf32>
    %cst_412 = arith.constant 1.000000e+00 : f32
    %817 = vector.broadcast %cst_412 : f32 to vector<16x256xf32>
    %818 = arith.subf %817, %816 : vector<16x256xf32>
    %cst_413 = arith.constant 0.000000e+00 : f32
    %819 = vector.broadcast %cst_413 : f32 to vector<16x256xf32>
    %820 = arith.maximumf %819, %818 : vector<16x256xf32>
    %c0_414 = arith.constant 0 : index
    %c256_415 = arith.constant 256 : index
    %821 = vector.load %arg1[%c0_414, %c256_415] : memref<8x512xf32, #tpu.memory_space<vmem>>, vector<8x16xf32>
    %cst_416 = arith.constant dense<0.000000e+00> : vector<8x256xf32>
    %822 = tpu.matmul %821, %820, %cst_416 {dimension_numbers = #tpu.dot_dimension_numbers<[1], [0], [0], [1], [0, 0, 1, 1], [], []>} : vector<8x16xf32>, vector<16x256xf32>, vector<8x256xf32> -> vector<8x256xf32>
    %cst_417 = arith.constant 0.000000e+00 : f32
    %823 = vector.broadcast %cst_417 : f32 to vector<1x256xf32>
    %824 = arith.subf %813, %823 : vector<1x256xf32>
    %825 = math.absf %824 : vector<1x256xf32>
    %cst_418 = arith.constant 1.000000e+00 : f32
    %826 = vector.broadcast %cst_418 : f32 to vector<1x256xf32>
    %827 = arith.subf %826, %825 : vector<1x256xf32>
    %cst_419 = arith.constant 0.000000e+00 : f32
    %828 = vector.broadcast %cst_419 : f32 to vector<1x256xf32>
    %829 = arith.maximumf %828, %827 : vector<1x256xf32>
    %830 = vector.broadcast %829 : vector<1x256xf32> to vector<8x256xf32>
    %831 = arith.mulf %822, %830 : vector<8x256xf32>
    %832 = arith.addf %805, %831 : vector<8x256xf32>
    %c0_420 = arith.constant 0 : index
    %c272_421 = arith.constant 272 : index
    %833 = vector.load %arg1[%c0_420, %c272_421] : memref<8x512xf32, #tpu.memory_space<vmem>>, vector<8x16xf32>
    %cst_422 = arith.constant dense<0.000000e+00> : vector<8x256xf32>
    %834 = tpu.matmul %833, %820, %cst_422 {dimension_numbers = #tpu.dot_dimension_numbers<[1], [0], [0], [1], [0, 0, 1, 1], [], []>} : vector<8x16xf32>, vector<16x256xf32>, vector<8x256xf32> -> vector<8x256xf32>
    %cst_423 = arith.constant 1.000000e+00 : f32
    %835 = vector.broadcast %cst_423 : f32 to vector<1x256xf32>
    %836 = arith.subf %813, %835 : vector<1x256xf32>
    %837 = math.absf %836 : vector<1x256xf32>
    %cst_424 = arith.constant 1.000000e+00 : f32
    %838 = vector.broadcast %cst_424 : f32 to vector<1x256xf32>
    %839 = arith.subf %838, %837 : vector<1x256xf32>
    %cst_425 = arith.constant 0.000000e+00 : f32
    %840 = vector.broadcast %cst_425 : f32 to vector<1x256xf32>
    %841 = arith.maximumf %840, %839 : vector<1x256xf32>
    %842 = vector.broadcast %841 : vector<1x256xf32> to vector<8x256xf32>
    %843 = arith.mulf %834, %842 : vector<8x256xf32>
    %844 = arith.addf %832, %843 : vector<8x256xf32>
    %c0_426 = arith.constant 0 : index
    %c288_427 = arith.constant 288 : index
    %845 = vector.load %arg1[%c0_426, %c288_427] : memref<8x512xf32, #tpu.memory_space<vmem>>, vector<8x16xf32>
    %cst_428 = arith.constant dense<0.000000e+00> : vector<8x256xf32>
    %846 = tpu.matmul %845, %820, %cst_428 {dimension_numbers = #tpu.dot_dimension_numbers<[1], [0], [0], [1], [0, 0, 1, 1], [], []>} : vector<8x16xf32>, vector<16x256xf32>, vector<8x256xf32> -> vector<8x256xf32>
    %cst_429 = arith.constant 2.000000e+00 : f32
    %847 = vector.broadcast %cst_429 : f32 to vector<1x256xf32>
    %848 = arith.subf %813, %847 : vector<1x256xf32>
    %849 = math.absf %848 : vector<1x256xf32>
    %cst_430 = arith.constant 1.000000e+00 : f32
    %850 = vector.broadcast %cst_430 : f32 to vector<1x256xf32>
    %851 = arith.subf %850, %849 : vector<1x256xf32>
    %cst_431 = arith.constant 0.000000e+00 : f32
    %852 = vector.broadcast %cst_431 : f32 to vector<1x256xf32>
    %853 = arith.maximumf %852, %851 : vector<1x256xf32>
    %854 = vector.broadcast %853 : vector<1x256xf32> to vector<8x256xf32>
    %855 = arith.mulf %846, %854 : vector<8x256xf32>
    %856 = arith.addf %844, %855 : vector<8x256xf32>
    %c0_432 = arith.constant 0 : index
    %c304_433 = arith.constant 304 : index
    %857 = vector.load %arg1[%c0_432, %c304_433] : memref<8x512xf32, #tpu.memory_space<vmem>>, vector<8x16xf32>
    %cst_434 = arith.constant dense<0.000000e+00> : vector<8x256xf32>
    %858 = tpu.matmul %857, %820, %cst_434 {dimension_numbers = #tpu.dot_dimension_numbers<[1], [0], [0], [1], [0, 0, 1, 1], [], []>} : vector<8x16xf32>, vector<16x256xf32>, vector<8x256xf32> -> vector<8x256xf32>
    %cst_435 = arith.constant 3.000000e+00 : f32
    %859 = vector.broadcast %cst_435 : f32 to vector<1x256xf32>
    %860 = arith.subf %813, %859 : vector<1x256xf32>
    %861 = math.absf %860 : vector<1x256xf32>
    %cst_436 = arith.constant 1.000000e+00 : f32
    %862 = vector.broadcast %cst_436 : f32 to vector<1x256xf32>
    %863 = arith.subf %862, %861 : vector<1x256xf32>
    %cst_437 = arith.constant 0.000000e+00 : f32
    %864 = vector.broadcast %cst_437 : f32 to vector<1x256xf32>
    %865 = arith.maximumf %864, %863 : vector<1x256xf32>
    %866 = vector.broadcast %865 : vector<1x256xf32> to vector<8x256xf32>
    %867 = arith.mulf %858, %866 : vector<8x256xf32>
    %868 = arith.addf %856, %867 : vector<8x256xf32>
    %c0_438 = arith.constant 0 : index
    %c320_439 = arith.constant 320 : index
    %869 = vector.load %arg1[%c0_438, %c320_439] : memref<8x512xf32, #tpu.memory_space<vmem>>, vector<8x16xf32>
    %cst_440 = arith.constant dense<0.000000e+00> : vector<8x256xf32>
    %870 = tpu.matmul %869, %820, %cst_440 {dimension_numbers = #tpu.dot_dimension_numbers<[1], [0], [0], [1], [0, 0, 1, 1], [], []>} : vector<8x16xf32>, vector<16x256xf32>, vector<8x256xf32> -> vector<8x256xf32>
    %cst_441 = arith.constant 4.000000e+00 : f32
    %871 = vector.broadcast %cst_441 : f32 to vector<1x256xf32>
    %872 = arith.subf %813, %871 : vector<1x256xf32>
    %873 = math.absf %872 : vector<1x256xf32>
    %cst_442 = arith.constant 1.000000e+00 : f32
    %874 = vector.broadcast %cst_442 : f32 to vector<1x256xf32>
    %875 = arith.subf %874, %873 : vector<1x256xf32>
    %cst_443 = arith.constant 0.000000e+00 : f32
    %876 = vector.broadcast %cst_443 : f32 to vector<1x256xf32>
    %877 = arith.maximumf %876, %875 : vector<1x256xf32>
    %878 = vector.broadcast %877 : vector<1x256xf32> to vector<8x256xf32>
    %879 = arith.mulf %870, %878 : vector<8x256xf32>
    %880 = arith.addf %868, %879 : vector<8x256xf32>
    %c0_444 = arith.constant 0 : index
    %c336_445 = arith.constant 336 : index
    %881 = vector.load %arg1[%c0_444, %c336_445] : memref<8x512xf32, #tpu.memory_space<vmem>>, vector<8x16xf32>
    %cst_446 = arith.constant dense<0.000000e+00> : vector<8x256xf32>
    %882 = tpu.matmul %881, %820, %cst_446 {dimension_numbers = #tpu.dot_dimension_numbers<[1], [0], [0], [1], [0, 0, 1, 1], [], []>} : vector<8x16xf32>, vector<16x256xf32>, vector<8x256xf32> -> vector<8x256xf32>
    %cst_447 = arith.constant 5.000000e+00 : f32
    %883 = vector.broadcast %cst_447 : f32 to vector<1x256xf32>
    %884 = arith.subf %813, %883 : vector<1x256xf32>
    %885 = math.absf %884 : vector<1x256xf32>
    %cst_448 = arith.constant 1.000000e+00 : f32
    %886 = vector.broadcast %cst_448 : f32 to vector<1x256xf32>
    %887 = arith.subf %886, %885 : vector<1x256xf32>
    %cst_449 = arith.constant 0.000000e+00 : f32
    %888 = vector.broadcast %cst_449 : f32 to vector<1x256xf32>
    %889 = arith.maximumf %888, %887 : vector<1x256xf32>
    %890 = vector.broadcast %889 : vector<1x256xf32> to vector<8x256xf32>
    %891 = arith.mulf %882, %890 : vector<8x256xf32>
    %892 = arith.addf %880, %891 : vector<8x256xf32>
    %c0_450 = arith.constant 0 : index
    %c352_451 = arith.constant 352 : index
    %893 = vector.load %arg1[%c0_450, %c352_451] : memref<8x512xf32, #tpu.memory_space<vmem>>, vector<8x16xf32>
    %cst_452 = arith.constant dense<0.000000e+00> : vector<8x256xf32>
    %894 = tpu.matmul %893, %820, %cst_452 {dimension_numbers = #tpu.dot_dimension_numbers<[1], [0], [0], [1], [0, 0, 1, 1], [], []>} : vector<8x16xf32>, vector<16x256xf32>, vector<8x256xf32> -> vector<8x256xf32>
    %cst_453 = arith.constant 6.000000e+00 : f32
    %895 = vector.broadcast %cst_453 : f32 to vector<1x256xf32>
    %896 = arith.subf %813, %895 : vector<1x256xf32>
    %897 = math.absf %896 : vector<1x256xf32>
    %cst_454 = arith.constant 1.000000e+00 : f32
    %898 = vector.broadcast %cst_454 : f32 to vector<1x256xf32>
    %899 = arith.subf %898, %897 : vector<1x256xf32>
    %cst_455 = arith.constant 0.000000e+00 : f32
    %900 = vector.broadcast %cst_455 : f32 to vector<1x256xf32>
    %901 = arith.maximumf %900, %899 : vector<1x256xf32>
    %902 = vector.broadcast %901 : vector<1x256xf32> to vector<8x256xf32>
    %903 = arith.mulf %894, %902 : vector<8x256xf32>
    %904 = arith.addf %892, %903 : vector<8x256xf32>
    %c0_456 = arith.constant 0 : index
    %c368_457 = arith.constant 368 : index
    %905 = vector.load %arg1[%c0_456, %c368_457] : memref<8x512xf32, #tpu.memory_space<vmem>>, vector<8x16xf32>
    %cst_458 = arith.constant dense<0.000000e+00> : vector<8x256xf32>
    %906 = tpu.matmul %905, %820, %cst_458 {dimension_numbers = #tpu.dot_dimension_numbers<[1], [0], [0], [1], [0, 0, 1, 1], [], []>} : vector<8x16xf32>, vector<16x256xf32>, vector<8x256xf32> -> vector<8x256xf32>
    %cst_459 = arith.constant 7.000000e+00 : f32
    %907 = vector.broadcast %cst_459 : f32 to vector<1x256xf32>
    %908 = arith.subf %813, %907 : vector<1x256xf32>
    %909 = math.absf %908 : vector<1x256xf32>
    %cst_460 = arith.constant 1.000000e+00 : f32
    %910 = vector.broadcast %cst_460 : f32 to vector<1x256xf32>
    %911 = arith.subf %910, %909 : vector<1x256xf32>
    %cst_461 = arith.constant 0.000000e+00 : f32
    %912 = vector.broadcast %cst_461 : f32 to vector<1x256xf32>
    %913 = arith.maximumf %912, %911 : vector<1x256xf32>
    %914 = vector.broadcast %913 : vector<1x256xf32> to vector<8x256xf32>
    %915 = arith.mulf %906, %914 : vector<8x256xf32>
    %916 = arith.addf %904, %915 : vector<8x256xf32>
    %c0_462 = arith.constant 0 : index
    %c384_463 = arith.constant 384 : index
    %917 = vector.load %arg1[%c0_462, %c384_463] : memref<8x512xf32, #tpu.memory_space<vmem>>, vector<8x16xf32>
    %cst_464 = arith.constant dense<0.000000e+00> : vector<8x256xf32>
    %918 = tpu.matmul %917, %820, %cst_464 {dimension_numbers = #tpu.dot_dimension_numbers<[1], [0], [0], [1], [0, 0, 1, 1], [], []>} : vector<8x16xf32>, vector<16x256xf32>, vector<8x256xf32> -> vector<8x256xf32>
    %cst_465 = arith.constant 8.000000e+00 : f32
    %919 = vector.broadcast %cst_465 : f32 to vector<1x256xf32>
    %920 = arith.subf %813, %919 : vector<1x256xf32>
    %921 = math.absf %920 : vector<1x256xf32>
    %cst_466 = arith.constant 1.000000e+00 : f32
    %922 = vector.broadcast %cst_466 : f32 to vector<1x256xf32>
    %923 = arith.subf %922, %921 : vector<1x256xf32>
    %cst_467 = arith.constant 0.000000e+00 : f32
    %924 = vector.broadcast %cst_467 : f32 to vector<1x256xf32>
    %925 = arith.maximumf %924, %923 : vector<1x256xf32>
    %926 = vector.broadcast %925 : vector<1x256xf32> to vector<8x256xf32>
    %927 = arith.mulf %918, %926 : vector<8x256xf32>
    %928 = arith.addf %916, %927 : vector<8x256xf32>
    %c0_468 = arith.constant 0 : index
    %c400_469 = arith.constant 400 : index
    %929 = vector.load %arg1[%c0_468, %c400_469] : memref<8x512xf32, #tpu.memory_space<vmem>>, vector<8x16xf32>
    %cst_470 = arith.constant dense<0.000000e+00> : vector<8x256xf32>
    %930 = tpu.matmul %929, %820, %cst_470 {dimension_numbers = #tpu.dot_dimension_numbers<[1], [0], [0], [1], [0, 0, 1, 1], [], []>} : vector<8x16xf32>, vector<16x256xf32>, vector<8x256xf32> -> vector<8x256xf32>
    %cst_471 = arith.constant 9.000000e+00 : f32
    %931 = vector.broadcast %cst_471 : f32 to vector<1x256xf32>
    %932 = arith.subf %813, %931 : vector<1x256xf32>
    %933 = math.absf %932 : vector<1x256xf32>
    %cst_472 = arith.constant 1.000000e+00 : f32
    %934 = vector.broadcast %cst_472 : f32 to vector<1x256xf32>
    %935 = arith.subf %934, %933 : vector<1x256xf32>
    %cst_473 = arith.constant 0.000000e+00 : f32
    %936 = vector.broadcast %cst_473 : f32 to vector<1x256xf32>
    %937 = arith.maximumf %936, %935 : vector<1x256xf32>
    %938 = vector.broadcast %937 : vector<1x256xf32> to vector<8x256xf32>
    %939 = arith.mulf %930, %938 : vector<8x256xf32>
    %940 = arith.addf %928, %939 : vector<8x256xf32>
    %c0_474 = arith.constant 0 : index
    %c416_475 = arith.constant 416 : index
    %941 = vector.load %arg1[%c0_474, %c416_475] : memref<8x512xf32, #tpu.memory_space<vmem>>, vector<8x16xf32>
    %cst_476 = arith.constant dense<0.000000e+00> : vector<8x256xf32>
    %942 = tpu.matmul %941, %820, %cst_476 {dimension_numbers = #tpu.dot_dimension_numbers<[1], [0], [0], [1], [0, 0, 1, 1], [], []>} : vector<8x16xf32>, vector<16x256xf32>, vector<8x256xf32> -> vector<8x256xf32>
    %cst_477 = arith.constant 1.000000e+01 : f32
    %943 = vector.broadcast %cst_477 : f32 to vector<1x256xf32>
    %944 = arith.subf %813, %943 : vector<1x256xf32>
    %945 = math.absf %944 : vector<1x256xf32>
    %cst_478 = arith.constant 1.000000e+00 : f32
    %946 = vector.broadcast %cst_478 : f32 to vector<1x256xf32>
    %947 = arith.subf %946, %945 : vector<1x256xf32>
    %cst_479 = arith.constant 0.000000e+00 : f32
    %948 = vector.broadcast %cst_479 : f32 to vector<1x256xf32>
    %949 = arith.maximumf %948, %947 : vector<1x256xf32>
    %950 = vector.broadcast %949 : vector<1x256xf32> to vector<8x256xf32>
    %951 = arith.mulf %942, %950 : vector<8x256xf32>
    %952 = arith.addf %940, %951 : vector<8x256xf32>
    %c0_480 = arith.constant 0 : index
    %c432_481 = arith.constant 432 : index
    %953 = vector.load %arg1[%c0_480, %c432_481] : memref<8x512xf32, #tpu.memory_space<vmem>>, vector<8x16xf32>
    %cst_482 = arith.constant dense<0.000000e+00> : vector<8x256xf32>
    %954 = tpu.matmul %953, %820, %cst_482 {dimension_numbers = #tpu.dot_dimension_numbers<[1], [0], [0], [1], [0, 0, 1, 1], [], []>} : vector<8x16xf32>, vector<16x256xf32>, vector<8x256xf32> -> vector<8x256xf32>
    %cst_483 = arith.constant 1.100000e+01 : f32
    %955 = vector.broadcast %cst_483 : f32 to vector<1x256xf32>
    %956 = arith.subf %813, %955 : vector<1x256xf32>
    %957 = math.absf %956 : vector<1x256xf32>
    %cst_484 = arith.constant 1.000000e+00 : f32
    %958 = vector.broadcast %cst_484 : f32 to vector<1x256xf32>
    %959 = arith.subf %958, %957 : vector<1x256xf32>
    %cst_485 = arith.constant 0.000000e+00 : f32
    %960 = vector.broadcast %cst_485 : f32 to vector<1x256xf32>
    %961 = arith.maximumf %960, %959 : vector<1x256xf32>
    %962 = vector.broadcast %961 : vector<1x256xf32> to vector<8x256xf32>
    %963 = arith.mulf %954, %962 : vector<8x256xf32>
    %964 = arith.addf %952, %963 : vector<8x256xf32>
    %c0_486 = arith.constant 0 : index
    %c448_487 = arith.constant 448 : index
    %965 = vector.load %arg1[%c0_486, %c448_487] : memref<8x512xf32, #tpu.memory_space<vmem>>, vector<8x16xf32>
    %cst_488 = arith.constant dense<0.000000e+00> : vector<8x256xf32>
    %966 = tpu.matmul %965, %820, %cst_488 {dimension_numbers = #tpu.dot_dimension_numbers<[1], [0], [0], [1], [0, 0, 1, 1], [], []>} : vector<8x16xf32>, vector<16x256xf32>, vector<8x256xf32> -> vector<8x256xf32>
    %cst_489 = arith.constant 1.200000e+01 : f32
    %967 = vector.broadcast %cst_489 : f32 to vector<1x256xf32>
    %968 = arith.subf %813, %967 : vector<1x256xf32>
    %969 = math.absf %968 : vector<1x256xf32>
    %cst_490 = arith.constant 1.000000e+00 : f32
    %970 = vector.broadcast %cst_490 : f32 to vector<1x256xf32>
    %971 = arith.subf %970, %969 : vector<1x256xf32>
    %cst_491 = arith.constant 0.000000e+00 : f32
    %972 = vector.broadcast %cst_491 : f32 to vector<1x256xf32>
    %973 = arith.maximumf %972, %971 : vector<1x256xf32>
    %974 = vector.broadcast %973 : vector<1x256xf32> to vector<8x256xf32>
    %975 = arith.mulf %966, %974 : vector<8x256xf32>
    %976 = arith.addf %964, %975 : vector<8x256xf32>
    %c0_492 = arith.constant 0 : index
    %c464_493 = arith.constant 464 : index
    %977 = vector.load %arg1[%c0_492, %c464_493] : memref<8x512xf32, #tpu.memory_space<vmem>>, vector<8x16xf32>
    %cst_494 = arith.constant dense<0.000000e+00> : vector<8x256xf32>
    %978 = tpu.matmul %977, %820, %cst_494 {dimension_numbers = #tpu.dot_dimension_numbers<[1], [0], [0], [1], [0, 0, 1, 1], [], []>} : vector<8x16xf32>, vector<16x256xf32>, vector<8x256xf32> -> vector<8x256xf32>
    %cst_495 = arith.constant 1.300000e+01 : f32
    %979 = vector.broadcast %cst_495 : f32 to vector<1x256xf32>
    %980 = arith.subf %813, %979 : vector<1x256xf32>
    %981 = math.absf %980 : vector<1x256xf32>
    %cst_496 = arith.constant 1.000000e+00 : f32
    %982 = vector.broadcast %cst_496 : f32 to vector<1x256xf32>
    %983 = arith.subf %982, %981 : vector<1x256xf32>
    %cst_497 = arith.constant 0.000000e+00 : f32
    %984 = vector.broadcast %cst_497 : f32 to vector<1x256xf32>
    %985 = arith.maximumf %984, %983 : vector<1x256xf32>
    %986 = vector.broadcast %985 : vector<1x256xf32> to vector<8x256xf32>
    %987 = arith.mulf %978, %986 : vector<8x256xf32>
    %988 = arith.addf %976, %987 : vector<8x256xf32>
    %c0_498 = arith.constant 0 : index
    %c480_499 = arith.constant 480 : index
    %989 = vector.load %arg1[%c0_498, %c480_499] : memref<8x512xf32, #tpu.memory_space<vmem>>, vector<8x16xf32>
    %cst_500 = arith.constant dense<0.000000e+00> : vector<8x256xf32>
    %990 = tpu.matmul %989, %820, %cst_500 {dimension_numbers = #tpu.dot_dimension_numbers<[1], [0], [0], [1], [0, 0, 1, 1], [], []>} : vector<8x16xf32>, vector<16x256xf32>, vector<8x256xf32> -> vector<8x256xf32>
    %cst_501 = arith.constant 1.400000e+01 : f32
    %991 = vector.broadcast %cst_501 : f32 to vector<1x256xf32>
    %992 = arith.subf %813, %991 : vector<1x256xf32>
    %993 = math.absf %992 : vector<1x256xf32>
    %cst_502 = arith.constant 1.000000e+00 : f32
    %994 = vector.broadcast %cst_502 : f32 to vector<1x256xf32>
    %995 = arith.subf %994, %993 : vector<1x256xf32>
    %cst_503 = arith.constant 0.000000e+00 : f32
    %996 = vector.broadcast %cst_503 : f32 to vector<1x256xf32>
    %997 = arith.maximumf %996, %995 : vector<1x256xf32>
    %998 = vector.broadcast %997 : vector<1x256xf32> to vector<8x256xf32>
    %999 = arith.mulf %990, %998 : vector<8x256xf32>
    %1000 = arith.addf %988, %999 : vector<8x256xf32>
    %c0_504 = arith.constant 0 : index
    %c496_505 = arith.constant 496 : index
    %1001 = vector.load %arg1[%c0_504, %c496_505] : memref<8x512xf32, #tpu.memory_space<vmem>>, vector<8x16xf32>
    %cst_506 = arith.constant dense<0.000000e+00> : vector<8x256xf32>
    %1002 = tpu.matmul %1001, %820, %cst_506 {dimension_numbers = #tpu.dot_dimension_numbers<[1], [0], [0], [1], [0, 0, 1, 1], [], []>} : vector<8x16xf32>, vector<16x256xf32>, vector<8x256xf32> -> vector<8x256xf32>
    %cst_507 = arith.constant 1.500000e+01 : f32
    %1003 = vector.broadcast %cst_507 : f32 to vector<1x256xf32>
    %1004 = arith.subf %813, %1003 : vector<1x256xf32>
    %1005 = math.absf %1004 : vector<1x256xf32>
    %cst_508 = arith.constant 1.000000e+00 : f32
    %1006 = vector.broadcast %cst_508 : f32 to vector<1x256xf32>
    %1007 = arith.subf %1006, %1005 : vector<1x256xf32>
    %cst_509 = arith.constant 0.000000e+00 : f32
    %1008 = vector.broadcast %cst_509 : f32 to vector<1x256xf32>
    %1009 = arith.maximumf %1008, %1007 : vector<1x256xf32>
    %1010 = vector.broadcast %1009 : vector<1x256xf32> to vector<8x256xf32>
    %1011 = arith.mulf %1002, %1010 : vector<8x256xf32>
    %1012 = arith.addf %1000, %1011 : vector<8x256xf32>
    %c0_510 = arith.constant 0 : index
    %c256_511 = arith.constant 256 : index
    %1013 = vector.load %arg11[%c0_510, %c256_511] : memref<8x512xf32, #tpu.memory_space<vmem>>, vector<8x256xf32>
    tpu.vector_store %arg11[%c0_510, %c256_511], %1012 {strides = array<i32>} : memref<8x512xf32, #tpu.memory_space<vmem>>, vector<8x256xf32>,
    return
  }
  func.func @transform_0(%arg0: i32) -> (i32, i32) {
    %c0_i32 = arith.constant 0 : i32
    %c0_i32_0 = arith.constant 0 : i32
    return %c0_i32, %arg0 : i32, i32
  }
  func.func @transform_1(%arg0: i32) -> (i32, i32) {
    %c0_i32 = arith.constant 0 : i32
    %c0_i32_0 = arith.constant 0 : i32
    return %c0_i32, %arg0 : i32, i32
  }
  func.func @transform_2(%arg0: i32) -> (i32, i32) {
    %c0_i32 = arith.constant 0 : i32
    %c0_i32_0 = arith.constant 0 : i32
    %c0_i32_1 = arith.constant 0 : i32
    return %c0_i32, %c0_i32_0 : i32, i32
  }
  func.func @transform_3(%arg0: i32) -> (i32, i32) {
    %c0_i32 = arith.constant 0 : i32
    %c0_i32_0 = arith.constant 0 : i32
    %c0_i32_1 = arith.constant 0 : i32
    return %c0_i32, %c0_i32_0 : i32, i32
  }
  func.func @transform_4(%arg0: i32) -> (i32, i32) {
    %c0_i32 = arith.constant 0 : i32
    %c0_i32_0 = arith.constant 0 : i32
    %c0_i32_1 = arith.constant 0 : i32
    return %c0_i32, %c0_i32_0 : i32, i32
  }
  func.func @transform_5(%arg0: i32) -> (i32, i32) {
    %c0_i32 = arith.constant 0 : i32
    %c0_i32_0 = arith.constant 0 : i32
    %c0_i32_1 = arith.constant 0 : i32
    return %c0_i32, %c0_i32_0 : i32, i32
  }
  func.func @transform_6(%arg0: i32) -> (i32, i32) {
    %c0_i32 = arith.constant 0 : i32
    %c0_i32_0 = arith.constant 0 : i32
    %c0_i32_1 = arith.constant 0 : i32
    return %c0_i32, %c0_i32_0 : i32, i32
  }
  func.func @transform_7(%arg0: i32) -> (i32, i32) {
    %c0_i32 = arith.constant 0 : i32
    %c0_i32_0 = arith.constant 0 : i32
    %c0_i32_1 = arith.constant 0 : i32
    return %c0_i32, %c0_i32_0 : i32, i32
  }
  func.func @transform_8(%arg0: i32) -> (i32, i32) {
    %c0_i32 = arith.constant 0 : i32
    %c0_i32_0 = arith.constant 0 : i32
    %c0_i32_1 = arith.constant 0 : i32
    return %c0_i32, %c0_i32_0 : i32, i32
  }
  func.func @transform_9(%arg0: i32) -> (i32, i32, i32) {
    %c0_i32 = arith.constant 0 : i32
    %c0_i32_0 = arith.constant 0 : i32
    %c0_i32_1 = arith.constant 0 : i32
    %c0_i32_2 = arith.constant 0 : i32
    return %c0_i32, %c0_i32_0, %c0_i32_1 : i32, i32, i32
  }
  func.func @transform_10(%arg0: i32) -> (i32, i32) {
    %c0_i32 = arith.constant 0 : i32
    %c0_i32_0 = arith.constant 0 : i32
    return %c0_i32, %arg0 : i32, i32
  }
}

</mosaic_0001>

<bundles_post_ra>
// kernel: tpu_custom_call.1
= control target key start
LH: loop header
LB: loop body
LE: loop exit
PB: predicated region body
PF: predicated region fallthrough
CT: control target
= control target key end

     0   :  { %s13507_s0 = inlined_call_operand.hbm [shape: f32[8,1024], index: 0, kind: input, shape index: {}]   ;;  %s13508_s1 = inlined_call_operand.vmem [shape: f32[8,256], index: 1, kind: input, shape index: {}]   ;;  %s13509_s2 = inlined_call_operand.hbm [shape: f32[8,256], index: 2, kind: input, shape index: {}]   ;;  %s13510_s3 = inlined_call_operand.hbm [shape: f32[8,256], index: 3, kind: input, shape index: {}]   ;;  %s13511_s4 = inlined_call_operand.vmem [shape: f32[2,256], index: 4, kind: input, shape index: {}]   ;;  %s13512_s5 = inlined_call_operand.hbm [shape: f32[9,512], index: 5, kind: input, shape index: {}]   ;;  %s13513_s6 = inlined_call_operand.hbm [shape: f32[4,512], index: 6, kind: input, shape index: {}]   ;;  %s13514_s7 = inlined_call_operand.vmem [shape: f32[16,8], index: 7, kind: input, shape index: {}]   ;;  %s13515_s8 = inlined_call_operand.vmem [shape: f32[16,8], index: 8, kind: input, shape index: {}]   ;;  %s13516_s9 = inlined_call_operand.vmem [shape: f32[9,4,16], index: 9, kind: input, shape index: {}]   ;;  %s13517_s10 = inlined_call_operand.hbm [shape: f32[8,1024], index: 10, kind: output, shape index: {}]  }
   0x1   :  { %13539 = sst [smem:[#allocation30_spill]] %s13509_s2 }
   0x2   :  { %13540 = sst [smem:[#allocation31_spill]] %s13510_s3 }
   0x3   :  { %13541 = sst [smem:[#allocation32_spill]] %s13512_s5 }
   0x4   :  { %13542 = sst [smem:[#allocation33_spill]] %s13513_s6 }
   0x5   :  { %15 = vsyncpa [#allocation4], 0 }
   0x6   :  { %17 = vsyncpa [#allocation4 + $0x1], 0 }
   0x7   :  { %18 = vsyncpa [#allocation7], 0 }
   0x8   :  { %19 = vsyncpa [#allocation10], 0 }
   0x9   :  { %20 = vsyncpa [#allocation5], 0 }
   0xa   :  { %22 = vsyncpa [#allocation5 + $0x1], 0  ;;  %s11559_s13 = smov 0   ;;  %s11561_s14 = smov 0  }
   0xb   :  { %s11563_s15 = smov 0   ;;  %s11565_s16 = smov 0  }
   0xc LB: > { %s11473_s17 = smov [#allocation6]   ;;  %s11580_s19 = sadd.s32 4294967295, %s11471_s16   ;;  %s11471_s16 = sphi %s11565_s16, %s13593_s16   ;;  %s11467_s15 = sphi %s11563_s15, %s13592_s15   ;;  %s11463_s14 = sphi %s11561_s14, %s13591_s14   ;;  %s11459_s13 = sphi %s11559_s13, %s13590_s13  }
   0xd   : > { %s292_s18 = sshll.u32 %s11473_s17, 4  ;;  %p10953_p0 = scmp.ge.s32.totalorder %s11471_s16, 1  ;;  %s293_s18 = int_to_ptr.vmem [resolvable:$true] %s292_s18 }
   0xe   : > { %p13518_p1 = scmp.eq.s32.totalorder %s11580_s19, 0  ;;  %p279_p2 = scmp.lt.s32.totalorder %s11471_s16, 3 }
   0xf   : > { %s11474_s21 = smov [#allocation9]   ;;  %s11475_s24 = smov [#allocation8]  }
  0x10   : > { %p11585_p3 = pnand %p10953_p0, %p279_p2  ;;  %s316_s22 = sshll.u32 %s11474_s21, 4  ;;  %s11592_s22 = int_to_ptr.vmem [resolvable:$true] %s316_s22 }
  0x11   : > { %s303_s25 = sshll.u32 %s11475_s24, 4  ;;  %s11278_s26 = scalar_lea.vmem %s293_s18, 256  ;;  %s11600_s25 = int_to_ptr.vmem [resolvable:$true] %s303_s25 }
  0x12   : > { %s13543_s20 = scalar_select %p11585_p3, 1, 0 }
  0x13   : > { %p11171_p5 = pneg %p11585_p3  ;;  %p11279_p8 = scmp.ne.s32.totalorder %s293_s18, %s11278_s26 }
  0x14   : > { %p11286_p11 = scmp.lt.s32.totalorder %s293_s18, %s293_s18  ;;  %p11287_p12 = scmp.lt.s32.totalorder %s11278_s26, %s11278_s26 }
  0x15   : > { %p11596_p6 = pnand %p11171_p5, %p13518_p1 }
  0x16   : > { %p11288_p13 = por %p11287_p12, %p11286_p11 }
  0x17   : > { %p11269_p7 = pneg %p11596_p6 }
  0x19   : > { %p11281_p9 = pnand %p11279_p8, %p11269_p7 }
  0x1b   : > { %p11282_p10 = pneg %p11281_p9 }
  0x1d   : > { %p11289_p0 = pnand %p11288_p13, %p11282_p10 }
  0x1f   : > { %11292 = shalt.err (!%p11289_p0)
}
  0x20   : > { %s13545_s2 = sld [smem:[#allocation30_spill]]  ;;  %s11304_s29 = scalar_lea.vmem %s11592_s22, 1024 }
  0x21   : > { %p11305_p2 = scmp.ne.s32.totalorder %s11592_s22, %s11304_s29  ;;  %p11312_p9 = scmp.lt.s32.totalorder %s11592_s22, %s11592_s22 }
  0x22   : > { %p11313_p10 = scmp.lt.s32.totalorder %s11304_s29, %s11304_s29 }
  0x23   : > { %p11307_p5 = pnand %p11305_p2, %p11269_p7 }
  0x24   : > { %p11314_p11 = por %p11313_p10, %p11312_p9 }
  0x25   : > { %p11308_p8 = pneg %p11307_p5 }
  0x26   : > { %11174 = dma.hbm_to_vmem [thread:$0]  (!%p11596_p6), %s13545_s2, 256, %s293_s18, [#allocation7]  }
  0x27   : > { %p11315_p12 = pnand %p11314_p11, %p11308_p8 }
  0x29   : > { %11318 = shalt.err (!%p11315_p12)
}
  0x2a   : > { %s11476_s30 = smov 512   ;;  %s11477_s11 = smov 32  }
  0x2b   : > { %s13546_s5 = sld [smem:[#allocation32_spill]]  ;;  %s11330_s18 = scalar_lea.vmem %s11600_s25, 256 }
  0x2c   : > { %p11331_p13 = scmp.ne.s32.totalorder %s11600_s25, %s11330_s18  ;;  %p11338_p5 = scmp.lt.s32.totalorder %s11600_s25, %s11600_s25 }
  0x2d   : > { %p11339_p8 = scmp.lt.s32.totalorder %s11330_s18, %s11330_s18 }
  0x2e   : > { %p11333_p0 = pnand %p11331_p13, %p11269_p7 }
  0x2f   : > { %p11340_p9 = por %p11339_p8, %p11338_p5 }
  0x30   : > { %p11334_p2 = pneg %p11333_p0 }
  0x31   : > { %11180 = dma.hbm_to_vmem [thread:$0]  (!%p11596_p6), %s13546_s5, 1024, %s11592_s22, [#allocation10], %s11476_s30, %s11476_s30, %s11477_s11  }
  0x32   : > { %p11341_p10 = pnand %p11340_p9, %p11334_p2 }
  0x34   : > { %11344 = shalt.err (!%p11341_p10)
}
  0x35   : > { %s13547_s3 = sld [smem:[#allocation31_spill]]  ;;  %s11478_s22 = smov [#allocation11]  }
  0x36   : > { %s330_s26 = sshll.u32 %s11478_s22, 4  ;;  %s331_s26 = int_to_ptr.vmem [resolvable:$true] %s330_s26 }
  0x37   : > { %s11356_s27 = scalar_lea.vmem %s331_s26, 256  ;;  %p11364_p0 = scmp.lt.s32.totalorder %s331_s26, %s331_s26 }
  0x38   : > { %p11357_p11 = scmp.ne.s32.totalorder %s331_s26, %s11356_s27  ;;  %p11365_p2 = scmp.lt.s32.totalorder %s11356_s27, %s11356_s27 }
  0x3a   : > { %p11359_p12 = pnand %p11357_p11, %p11269_p7  ;;  %p11366_p5 = por %p11365_p2, %p11364_p0 }
  0x3b   : > { %11177 = dma.hbm_to_vmem [thread:$0]  (!%p11596_p6), %s13547_s3, 256, %s11600_s25, [#allocation7]  }
  0x3c   : > { %p11360_p13 = pneg %p11359_p12 }
  0x3e   : > { %p11367_p8 = pnand %p11366_p5, %p11360_p13 }
  0x40   : > { %11370 = shalt.err (!%p11367_p8)
}
  0x41   : > { %s13548_s6 = sld [smem:[#allocation33_spill]]  ;;  %s10952_s25 = sadd.s32 4294967294, %s11471_s16  }
  0x42   : > { %s11648_s23 = sadd.s32 1, %s11471_s16   ;;  %s35_s11 = sadd.s32 1, %s11467_s15 }
  0x43   : > { %s32_s30 = ssub.s32 %s11471_s16, %s11648_s23  ;;  %p42_p9 = scmp.ne.s32.totalorder %s11467_s15, %s11463_s14 }
  0x44   : > { %p33_p7 = scmp.eq.s32.totalorder %s32_s30, 0  ;;  %p43_p10 = scmp.eq.s32.totalorder %s11471_s16, 0 }
  0x45   : > { %p48_p11 = scmp.ne.s32.totalorder %s11463_s14, %s11459_s13  ;;  %p266_p13 = scmp.eq.s32.totalorder %s11580_s19, 1 }
  0x46   : > { %s11659_s12 = scalar_select %p33_p7, %s11467_s15, %s35_s11  }
  0x47   : > { %11183 = dma.hbm_to_vmem [thread:$0]  (!%p11596_p6), %s13548_s6, 256, %s331_s26, [#allocation10]  }
  0x48   : > { %13549 = sst [smem:[#allocation17_spill]] %s11659_s12  ;;  %p11661_p12 = por %p43_p10, %p42_p9 }
  0x49   : > { %p11667_p6 = por %p13518_p1, %p48_p11  ;;  %p272_p0 = scmp.eq.s32.totalorder %s10952_s25, 1 }
  0x4a   : > { %p11196_p2 = scmp.lt.s32.totalorder %s11471_s16, 2  ;;  %s350_s21 = sand.u32 1, %s11467_s15  }
  0x4b   : > { %s13551_s18 = scalar_select %p11667_p6, 1, 0 }
  0x4c   : > { %p11674_p5 = por %p266_p13, %p42_p9  ;;  %p11678_p8 = por %p272_p0, %p48_p11 }
  0x4d   : > { %s10959_s26 = sshll.u32 %s350_s21, 5  ;;  %s11149_s27 = sshll.u32 %s11471_s16, 9 }
  0x4e   : > { %s13552_s24 = scalar_select %p11674_p5, 1, 0 }
  0x4f   : > { %s13553_s22 = scalar_select %p11678_p8, 1, 0 }
  0x50   : > { %s11686_s30 = scalar_lea.hbm %s13507_s0, %s11149_s27  ;;  %s354_s25 = scalar_lea.vmem [#allocation3], %s10959_s26 }
  0x51   : > { %s362_s11 = sshll.u32 %s354_s25, 4  ;;  %p11690_p7 = pnand %p11196_p2, %p11661_p12  ;;  %s363_s11 = int_to_ptr.vmem [resolvable:$true] %s362_s11 }
  0x52   : > { %s351_s3 = scalar_lea.sflag [#allocation4], %s350_s21  ;;  %s11371_s5 = scalar_lea.hbm %s11686_s30, 512 }
  0x53   : > { %p11372_p9 = scmp.ne.s32.totalorder %s11686_s30, %s11371_s5  ;;  %p11373_p10 = pneg %p11690_p7 }
  0x54   : > { %s11376_s29 = scalar_lea.hbm %s13507_s0, 1024  ;;  %p11377_p0 = scmp.lt.s32.totalorder %s11686_s30, %s13507_s0 }
  0x55   : > { %p11374_p11 = pnand %p11373_p10, %p11372_p9  ;;  %p11378_p12 = scmp.lt.s32.totalorder %s11376_s29, %s11371_s5 }
  0x57   : > { %p11375_p13 = pneg %p11374_p11  ;;  %p11379_p2 = por %p11378_p12, %p11377_p0 }
  0x59   : > { %p11380_p4 = pnand %p11379_p2, %p11375_p13 }
  0x5b   : > { %11383 = shalt.err (!%p11380_p4)
}
  0x5c   : > { %s11384_s17 = scalar_lea.vmem %s363_s11, 512  ;;  %s11479_s21 = smov [#allocation3]  }
  0x5d   : > { %p11385_p1 = scmp.ne.s32.totalorder %s363_s11, %s11384_s17  ;;  %s11389_s6 = sshll.u32 %s11479_s21, 4  ;;  %s11390_s6 = int_to_ptr.vmem [resolvable:$false] %s11389_s6 }
  0x5e   : > { %s11391_s12 = scalar_lea.vmem %s11390_s6, 1024  ;;  %p11392_p9 = scmp.lt.s32.totalorder %s363_s11, %s11390_s6 }
  0x5f   : > { %p11387_p8 = pnand %p11385_p1, %p11373_p10  ;;  %p11393_p11 = scmp.lt.s32.totalorder %s11391_s12, %s11384_s17 }
  0x61   : > { %p11388_p5 = pneg %p11387_p8  ;;  %p11394_p6 = por %p11393_p11, %p11392_p9 }
  0x63   : > { %p11395_p3 = pnand %p11394_p6, %p11388_p5 }
  0x65   : > { %11398 = shalt.err (!%p11395_p3)
}
  0x66   : > { %11187 = dma.hbm_to_vmem [thread:$0]  (!%p11690_p7), %s11686_s30, 512, %s363_s11, %s351_s3  }
  0x67   : > { %p13555_p13 = scmp.ne.s32.totalorder %s13543_s20, 0 }
  0x69   : > { %378 = sbr.rel (%p13555_p13) target bundleno = 1495 (0x5d7), region = 60 }
  0x6e   : > { %s11711_s5 = sand.u32 1, %s11463_s14   ;;  %p13556_p1 = scmp.ne.s32.totalorder %s13551_s18, 0 }
  0x6f   : > { %s10963_s27 = sshll.u32 %s11711_s5, 5  ;;  %s381_s6 = scalar_lea.sflag [#allocation4], %s11711_s5 }
  0x70   : > { %s11717_s12 = scalar_lea.vmem [#allocation3], %s10963_s27 }
  0x71   : > { %11442 = dma.done.wait (%p13556_p1), %s381_s6, 512  }
  0x72   : > { %11444 = vsyncadd (%p13556_p1), %s381_s6, 4294966784  ;;  %p13557_p3 = scmp.eq.s32.totalorder %s11580_s19, 0 }
  0x74   : > { %11446 = dma.done.wait (%p13557_p3), [#allocation7], 512   ;;  %p13558_p4 = pmov %p13557_p3 }
  0x75   : > { %p13559_p6 = pmov %p13557_p3 }
  0x76   : > { %11448 = vsyncadd (%p13558_p4), [#allocation7], 4294966784 }
  0x77   : > { %11450 = dma.done.wait (%p13559_p6), [#allocation10], 1280   ;;  %p13560_p5 = pmov %p13557_p3 }
  0x78   : > { %p442_p8 = scmp.lt.s32.totalorder %s11580_s19, 1  ;;  %v13522_v0 = vmov 0.0   ;;  %v11738_v2 = vld [vmem:[#allocation6 + $0x8] sm:$0xff]  ;;  %v11740_v3 = vld [vmem:[#allocation6] sm:$0xff]  ;;  %s11481_s11 = smov 120   ;;  %vm450_vm0 = vcmask 64512   ;;  %v527_v19 = vlaneseq }
  0x79   : > { %11452 = vsyncadd (%p13560_p5), [#allocation10], 4294966016  ;;  %518 = vmatprep.mubr.f32.mxu0 %v13522_v0  ;;  %609 = vmatprep.mubr.f32.mxu1 %v13522_v0  ;;  %s11482_s28 = smov 104   ;;  %s11483_s29 = smov 112   ;;  %vm2311_vm3 = vcmask 130048  }
  0x7a   : > { %s443_s2 = scalar_select %p442_p8, %s11580_s19, 1  ;;  %484 = vmatprep.subr.mxu0 %v11738_v2  ;;  %575 = vmatprep.subr.mxu1 %v11738_v2  ;;  %v11814_v20 = vshrl.u32 %v527_v19, 7  ;;  %v525_v22 = vld [vmem:[#allocation8] ss:$8 sm:$0x3] }
  0x7b   : > { %485 = vmatpush1.msra.mxu0 %v11740_v3  ;;  %576 = vmatpush1.msra.mxu1 %v11740_v3  ;;  %s11484_s26 = smov 96   ;;  %s11485_s25 = smov 88   ;;  %v617_v23 = vld [vmem:[#allocation8 + $0x1] ss:$8 sm:$0x3] }
  0x7c   : > { %s10969_s3 = sshll.u32 %s443_s2, 3  ;;  %667 = vmatprep.subr.mxu0 %v11738_v2  ;;  %759 = vmatprep.subr.mxu1 %v11738_v2  ;;  %s11486_s17 = smov 80   ;;  %13561 = vst [vmem:[#allocation18_spill] sm:$0xff] %v11814_v20  ;;  %v11817_v21 = vsub.s32 0, %v11814_v20  ;;  %v11821_v25 = vsub.s32 1, %v11814_v20 }
  0x7d   : > { %s445_s30 = scalar_lea.vmem %s13508_s1, %s10969_s3  ;;  %s11487_s21 = smov 72   ;;  %v709_v28 = vld [vmem:[#allocation8 + $0x2] ss:$8 sm:$0x3] }
  0x7e   : > { %v449_v1 = vld [vmem:[%s445_s30] sm:$0xff]  ;;  %s11488_s6 = smov 64   ;;  %s11489_s2 = smov 56   ;;  %13562 = vst [vmem:[#allocation19_spill] sm:$0xff] %v11817_v21  ;;  %v530_v24 = vrot.slane %v525_v22, %v11817_v21  ;;  %13563 = vst [vmem:[#allocation20_spill] sm:$0xff] %v11821_v25  ;;  %v622_v26 = vrot.slane %v617_v23, %v11817_v21  ;;  %v626_v29 = vrot.slane %v617_v23, %v11821_v25 }
  0x7f   : > { %541 = vrot.lane.b32.xlu0 %v449_v1, %s11481_s11  ;;  %725 = vrot.lane.b32.xlu1 %v449_v1, %s11482_s28  ;;  %s11490_s3 = smov 48   ;;  %s11491_s20 = smov 40   ;;  %v801_v31 = vld [vmem:[#allocation8 + $0x3] ss:$8 sm:$0x3]  ;;  %v534_v33 = vrot.slane %v525_v22, %v11821_v25  ;;  %v714_v35 = vrot.slane %v709_v28, %v11817_v21  ;;  %v718_v42 = vrot.slane %v709_v28, %v11821_v25 }
  0x80   : > { %10970 = vmatmul.mubr.msk.f32.vlgmr.msra.gmra.mxu0 %vm450_vm0, %v449_v1  ;;  %s11492_s18 = smov 32   ;;  %s11493_s30 = smov 24   ;;  %v893_v36 = vld [vmem:[#allocation8 + $0x4] ss:$8 sm:$0x3]  ;;  %v806_v41 = vrot.slane %v801_v31, %v11817_v21  ;;  %v810_v45 = vrot.slane %v801_v31, %v11821_v25 }
  0x81   : > { %668 = vmatpush1.msra.mxu0 %v11740_v3  ;;  %701 = vmatprep.mubr.f32.mxu0 %v13522_v0  ;;  %s11494_s11 = smov 16   ;;  %s11495_s28 = smov 8   ;;  %v985_v39 = vld [vmem:[#allocation8 + $0x5] ss:$8 sm:$0x3]  ;;  %v898_v46 = vrot.slane %v893_v36, %v11817_v21  ;;  %v902_v54 = vrot.slane %v893_v36, %v11821_v25 }
  0x82   : > { %851 = vmatprep.subr.mxu0 %v11738_v2  ;;  %v990_v50 = vrot.slane %v985_v39, %v11817_v21  ;;  %v1077_v51 = vld [vmem:[#allocation8 + $0x6] ss:$8 sm:$0x3]  ;;  %v994_v62 = vrot.slane %v985_v39, %v11821_v25  ;;  %v1446_v28 = vld [vmem:[#allocation8 + $0x2] ss:$8 sm:$0x3] }
  0x83   : > { %633 = vrot.lane.b32.xlu0 %v449_v1, %s11483_s29  ;;  %817 = vrot.lane.b32.xlu1 %v449_v1, %s11484_s26  ;;  %v1082_v63 = vrot.slane %v1077_v51, %v11817_v21  ;;  %p13586_p10 = scmp.ne.s32.totalorder %s13552_s24, 0 }
  0x87   : > { %909 = vrot.lane.b32.xlu0 %v449_v1, %s11485_s25  ;;  %1001 = vrot.lane.b32.xlu1 %v449_v1, %s11486_s17  ;;  %s11500_s25 = smov 113  }
  0x8b   : > { %1093 = vrot.lane.b32.xlu0 %v449_v1, %s11487_s21  ;;  %1189 = vrot.lane.b32.xlu1 %v449_v1, %s11488_s6  ;;  %s11501_s21 = smov 111  }
  0x8f   : > { %1280 = vrot.lane.b32.xlu0 %v449_v1, %s11489_s2  ;;  %1371 = vrot.lane.b32.xlu1 %v449_v1, %s11490_s3  ;;  %s11496_s2 = smov 17  }
  0x93   : > { %1462 = vrot.lane.b32.xlu0 %v449_v1, %s11491_s20  ;;  %1553 = vrot.lane.b32.xlu1 %v449_v1, %s11492_s18  ;;  %s11497_s20 = smov 15  }
  0x97   : > { %1644 = vrot.lane.b32.xlu0 %v449_v1, %s11493_s30  ;;  %1735 = vrot.lane.b32.xlu1 %v449_v1, %s11494_s11  ;;  %s11498_s30 = smov 1  }
  0x9b   : > { %1826 = vrot.lane.b32.xlu0 %v449_v1, %s11495_s28  ;;  %v1169_v1 = vld [vmem:[#allocation8 + $0x7] ss:$8 sm:$0x3]  ;;  %s11499_s28 = smov 127  }
  0xf1   : > { %v542_v4 = vpop.permute.xlu0 %541  ;;  %v726_v5 = vpop.permute.xlu1 %725 }
  0xf2   : > { %10971 = vmatmul.mubr.msk.f32.vlgmr.msra.gmra.mxu1 %vm450_vm0, %v542_v4 }
  0xf3   : > { %760 = vmatpush1.msra.mxu1 %v11740_v3  ;;  %793 = vmatprep.mubr.f32.mxu1 %v13522_v0 }
  0xf4   : > { %943 = vmatprep.subr.mxu1 %v11738_v2 }
  0xf5   : > { %v634_v6 = vpop.permute.xlu0 %633  ;;  %v818_v7 = vpop.permute.xlu1 %817 }
  0xf6   : > { %10972 = vmatmul.mubr.msk.f32.vlgmr.msra.gmra.mxu0 %vm450_vm0, %v634_v6  ;;  %10973 = vmatmul.mubr.msk.f32.vlgmr.msra.gmra.mxu1 %vm450_vm0, %v726_v5  ;;  %v1264_v6 = vld [vmem:[#allocation8] ss:$8 sm:$0x3] }
  0xf7   : > { %852 = vmatpush1.msra.mxu0 %v11740_v3  ;;  %885 = vmatprep.mubr.f32.mxu0 %v13522_v0 }
  0xf8   : > { %944 = vmatpush1.msra.mxu1 %v11740_v3  ;;  %977 = vmatprep.mubr.f32.mxu1 %v13522_v0 }
  0xf9   : > { %v910_v8 = vpop.permute.xlu0 %909  ;;  %1035 = vmatprep.subr.mxu0 %v11738_v2  ;;  %1127 = vmatprep.subr.mxu1 %v11738_v2  ;;  %v1002_v9 = vpop.permute.xlu1 %1001 }
  0xfa   : > { %10974 = vmatmul.mubr.msk.f32.vlgmr.msra.gmra.mxu0 %vm450_vm0, %v818_v7  ;;  %10975 = vmatmul.mubr.msk.f32.vlgmr.msra.gmra.mxu1 %vm450_vm0, %v910_v8  ;;  %v1355_v7 = vld [vmem:[#allocation8 + $0x1] ss:$8 sm:$0x3] }
  0xfb   : > { %1036 = vmatpush1.msra.mxu0 %v11740_v3  ;;  %1069 = vmatprep.mubr.f32.mxu0 %v13522_v0  ;;  %v1360_v22 = vrot.slane %v1355_v7, %v11817_v21 }
  0xfc   : > { %1128 = vmatpush1.msra.mxu1 %v11740_v3  ;;  %1161 = vmatprep.mubr.f32.mxu1 %v13522_v0 }
  0xfd   : > { %v1094_v10 = vpop.permute.xlu0 %1093  ;;  %1223 = vmatprep.subr.mxu0 %v11738_v2  ;;  %v1190_v11 = vpop.permute.xlu1 %1189  ;;  %1314 = vmatprep.subr.mxu1 %v11738_v2 }
  0xfe   : > { %10976 = vmatmul.mubr.msk.f32.vlgmr.msra.gmra.mxu0 %vm450_vm0, %v1002_v9  ;;  %10977 = vmatmul.mubr.msk.f32.vlgmr.msra.gmra.mxu1 %vm450_vm0, %v1094_v10 }
  0xff   : > { %1224 = vmatpush1.msra.mxu0 %v11740_v3  ;;  %1257 = vmatprep.mubr.f32.mxu0 %v13522_v0 }
 0x100   : > { %1315 = vmatpush1.msra.mxu1 %v11740_v3  ;;  %1348 = vmatprep.mubr.f32.mxu1 %v13522_v0 }
 0x101   : > { %v1281_v12 = vpop.permute.xlu0 %1280  ;;  %1405 = vmatprep.subr.mxu0 %v11738_v2  ;;  %v1372_v13 = vpop.permute.xlu1 %1371  ;;  %1496 = vmatprep.subr.mxu1 %v11738_v2 }
 0x102   : > { %10978 = vmatmul.mubr.msk.f32.vlgmr.msra.gmra.mxu0 %vm450_vm0, %v1190_v11  ;;  %10979 = vmatmul.mubr.msk.f32.vlgmr.msra.gmra.mxu1 %vm450_vm0, %v1281_v12 }
 0x103   : > { %1406 = vmatpush1.msra.mxu0 %v11740_v3  ;;  %1439 = vmatprep.mubr.f32.mxu0 %v13522_v0 }
 0x104   : > { %1497 = vmatpush1.msra.mxu1 %v11740_v3  ;;  %1530 = vmatprep.mubr.f32.mxu1 %v13522_v0 }
 0x105   : > { %v1463_v14 = vpop.permute.xlu0 %1462  ;;  %1587 = vmatprep.subr.mxu0 %v11738_v2  ;;  %v1554_v15 = vpop.permute.xlu1 %1553  ;;  %1678 = vmatprep.subr.mxu1 %v11738_v2 }
 0x106   : > { %10980 = vmatmul.mubr.msk.f32.vlgmr.msra.gmra.mxu0 %vm450_vm0, %v1372_v13  ;;  %10981 = vmatmul.mubr.msk.f32.vlgmr.msra.gmra.mxu1 %vm450_vm0, %v1463_v14  ;;  %v1086_v13 = vrot.slane %v1077_v51, %v11821_v25  ;;  %v1719_v51 = vld [vmem:[#allocation8 + $0x5] ss:$8 sm:$0x3] }
 0x107   : > { %1588 = vmatpush1.msra.mxu0 %v11740_v3  ;;  %1621 = vmatprep.mubr.f32.mxu0 %v13522_v0 }
 0x108   : > { %1679 = vmatpush1.msra.mxu1 %v11740_v3  ;;  %1712 = vmatprep.mubr.f32.mxu1 %v13522_v0 }
 0x109   : > { %v1645_v16 = vpop.permute.xlu0 %1644  ;;  %1769 = vmatprep.subr.mxu0 %v11738_v2  ;;  %1860 = vmatprep.subr.mxu1 %v11738_v2  ;;  %v1736_v17 = vpop.permute.xlu1 %1735 }
 0x10a   : > { %10982 = vmatmul.mubr.msk.f32.vlgmr.msra.gmra.mxu0 %vm450_vm0, %v1554_v15  ;;  %10983 = vmatmul.mubr.msk.f32.vlgmr.msra.gmra.mxu1 %vm450_vm0, %v1645_v16  ;;  %v1174_v16 = vrot.slane %v1169_v1, %v11817_v21 }
 0x10b   : > { %1770 = vmatpush1.msra.mxu0 %v11740_v3  ;;  %1803 = vmatprep.mubr.f32.mxu0 %v13522_v0 }
 0x10c   : > { %1861 = vmatpush1.msra.mxu1 %v11740_v3  ;;  %1894 = vmatprep.mubr.f32.mxu1 %v13522_v0 }
 0x10d   : > { %v1827_v18 = vpop.permute.xlu0 %1826 }
 0x10e   : > { %10984 = vmatmul.mubr.msk.f32.vlgmr.msra.gmra.mxu0 %vm450_vm0, %v1736_v17  ;;  %10985 = vmatmul.mubr.msk.f32.vlgmr.msra.gmra.mxu1 %vm450_vm0, %v1827_v18  ;;  %v1178_v17 = vrot.slane %v1169_v1, %v11821_v25  ;;  %v1269_v18 = vrot.slane %v1264_v6, %v11817_v21 }
 0x10f   : > { %2001 = vmatprep.mubr.f32.mxu0 %v13522_v0  ;;  %2078 = vmatprep.mubr.f32.mxu1 %v13522_v0 }
 0x140   : > { %v520_v27 = vpop.f32.mrf.mxu0 }
 0x141   : > { %v537_v32 = vmul.f32 %v530_v24, %v520_v27 }
 0x142   : > { %v522_v37 = vpop.f32.mrf.mxu0 }
 0x143   : > { %v538_v47 = vmul.f32 %v534_v33, %v522_v37 }
 0x1b2   : > { %v611_v30 = vpop.f32.mrf.mxu1 }
 0x1b3   : > { %v629_v34 = vmul.f32 %v622_v26, %v611_v30 }
 0x1b4   : > { %v613_v38 = vpop.f32.mrf.mxu1 }
 0x1b5   : > { %v630_v40 = vmul.f32 %v626_v29, %v613_v38  ;;  %v631_v48 = vadd.f32 %v629_v34, %v537_v32  ;;  %v1537_v29 = vld [vmem:[#allocation8 + $0x3] ss:$8 sm:$0x3]  ;;  %v1273_v34 = vrot.slane %v1264_v6, %v11821_v25 }
 0x1b6   : > { %v703_v43 = vpop.f32.mrf.mxu0  ;;  %v795_v44 = vpop.f32.mrf.mxu1 }
 0x1b7   : > { %v721_v49 = vmul.f32 %v714_v35, %v703_v43  ;;  %v632_v55 = vadd.f32 %v630_v40, %v538_v47  ;;  %v813_v57 = vmul.f32 %v806_v41, %v795_v44  ;;  %v1364_v35 = vrot.slane %v1355_v7, %v11821_v25 }
 0x1b8   : > { %v705_v52 = vpop.f32.mrf.mxu0  ;;  %v797_v53 = vpop.f32.mrf.mxu1  ;;  %v1451_v40 = vrot.slane %v1446_v28, %v11817_v21  ;;  %v1542_v41 = vrot.slane %v1537_v29, %v11817_v21 }
 0x1b9   : > { %v723_v56 = vadd.f32 %v721_v49, %v631_v48  ;;  %v722_v58 = vmul.f32 %v718_v42, %v705_v52  ;;  %v814_v59 = vmul.f32 %v810_v45, %v797_v53  ;;  %v1455_v49 = vrot.slane %v1446_v28, %v11821_v25 }
 0x1ba   : > { %v887_v60 = vpop.f32.mrf.mxu0  ;;  %v979_v61 = vpop.f32.mrf.mxu1 }
 0x1bb   : > { %v815_v2 = vadd.f32 %v813_v57, %v723_v56  ;;  %v724_v3 = vadd.f32 %v722_v58, %v632_v55  ;;  %v905_v4 = vmul.f32 %v898_v46, %v887_v60  ;;  %v997_v5 = vmul.f32 %v990_v50, %v979_v61  ;;  %v1628_v46 = vld [vmem:[#allocation8 + $0x4] ss:$8 sm:$0x3]  ;;  %v11853_v57 = vld [vmem:[%s13515_s8] sm:$0xff]  ;;  %v11856_v58 = vld [vmem:[%s11717_s12 + $0x8] sm:$0xff] }
 0x1bc   : > { %v889_v8 = vpop.f32.mrf.mxu0  ;;  %v981_v9 = vpop.f32.mrf.mxu1  ;;  %v1546_v50 = vrot.slane %v1537_v29, %v11821_v25  ;;  %v1633_v61 = vrot.slane %v1628_v46, %v11817_v21  ;;  %v1637_v7 = vrot.slane %v1628_v46, %v11821_v25 }
 0x1bd   : > { %v816_v10 = vadd.f32 %v814_v59, %v724_v3  ;;  %v907_v11 = vadd.f32 %v905_v4, %v815_v2  ;;  %v906_v12 = vmul.f32 %v902_v54, %v889_v8  ;;  %v998_v26 = vmul.f32 %v994_v62, %v981_v9  ;;  %v11861_v62 = vld [vmem:[%s11717_s12] sm:$0xff]  ;;  %v1810_v4 = vld [vmem:[#allocation8 + $0x6] ss:$8 sm:$0x3] }
 0x1be   : > { %v1071_v14 = vpop.f32.mrf.mxu0  ;;  %v1163_v15 = vpop.f32.mrf.mxu1  ;;  %v1724_v3 = vrot.slane %v1719_v51, %v11817_v21  ;;  %v1728_v8 = vrot.slane %v1719_v51, %v11821_v25  ;;  %v1924_v51 = vld [vmem:[%s11717_s12 + $0x18] sm:$0xff] }
 0x1bf   : > { %v999_v23 = vadd.f32 %v997_v5, %v907_v11  ;;  %v908_v24 = vadd.f32 %v906_v12, %v816_v10  ;;  %v1089_v27 = vmul.f32 %v1082_v63, %v1071_v14  ;;  %v1181_v37 = vmul.f32 %v1174_v16, %v1163_v15  ;;  %v1901_v12 = vld [vmem:[#allocation8 + $0x7] ss:$8 sm:$0x3] }
 0x1c0   : > { %v1073_v30 = vpop.f32.mrf.mxu0  ;;  %v1165_v31 = vpop.f32.mrf.mxu1  ;;  %v1815_v16 = vrot.slane %v1810_v4, %v11817_v21  ;;  %v1906_v28 = vrot.slane %v1901_v12, %v11817_v21  ;;  %v1910_v29 = vrot.slane %v1901_v12, %v11821_v25 }
 0x1c1   : > { %v1000_v32 = vadd.f32 %v998_v26, %v908_v24  ;;  %v1090_v33 = vmul.f32 %v1086_v13, %v1073_v30  ;;  %v1091_v36 = vadd.f32 %v1089_v27, %v999_v23  ;;  %v1182_v43 = vmul.f32 %v1178_v17, %v1165_v31  ;;  %v1926_v13 = vld [vmem:[%s13515_s8 + $0x8] sm:$0xff] }
 0x1c2   : > { %v1259_v38 = vpop.f32.mrf.mxu0  ;;  %v1350_v39 = vpop.f32.mrf.mxu1  ;;  %v1819_v27 = vrot.slane %v1810_v4, %v11821_v25 }
 0x1c3   : > { %v1092_v42 = vadd.f32 %v1090_v33, %v1000_v32  ;;  %v1276_v44 = vmul.f32 %v1269_v18, %v1259_v38  ;;  %v1367_v45 = vmul.f32 %v1360_v22, %v1350_v39  ;;  %v11848_v56 = vadd.f32 %v1181_v37, %v1091_v36 }
 0x1c4   : > { %v1261_v47 = vpop.f32.mrf.mxu0  ;;  %v1352_v48 = vpop.f32.mrf.mxu1 }
 0x1c5   : > { %v11846_v52 = vadd.f32 %v1182_v43, %v1092_v42  ;;  %v1277_v53 = vmul.f32 %v1273_v34, %v1261_v47  ;;  %v1369_v54 = vadd.f32 %v1367_v45, %v1276_v44  ;;  %v1368_v55 = vmul.f32 %v1364_v35, %v1352_v48  ;;  %13565 = vst [vmem:[#allocation22_spill] sm:$0xff] %v11848_v56  ;;  %v1919_v34 = vld [vmem:[%s13514_s7] sm:$0xff]  ;;  %v1920_v47 = vld [vmem:[%s13514_s7 + $0x8] sm:$0xff] }
 0x1c6   : > { %v1441_v59 = vpop.f32.mrf.mxu0  ;;  %v1532_v60 = vpop.f32.mrf.mxu1 }
 0x1c7   : > { %13564 = vst [vmem:[#allocation21_spill] sm:$0xff] %v11846_v52  ;;  %1967 = vmatprep.subr.mxu0 %v11846_v52  ;;  %v1370_v63 = vadd.f32 %v1368_v55, %v1277_v53  ;;  %v1458_v1 = vmul.f32 %v1451_v40, %v1441_v59  ;;  %v1549_v2 = vmul.f32 %v1542_v41, %v1532_v60  ;;  %v1923_v53 = vld [vmem:[%s11717_s12 + $0x10] sm:$0xff] }
 0x1c8   : > { %1968 = vmatpush1.msra.mxu0 %v11848_v56  ;;  %v1443_v5 = vpop.f32.mrf.mxu0  ;;  %v1534_v6 = vpop.f32.mrf.mxu1 }
 0x1c9   : > { %10986 = vmatmul.mubr.msk.f32.vlgmr.msra.gmra.mxu0 %vm450_vm0, %v11853_v57  ;;  %2127 = vmatprep.subr.mxu0 %v11856_v58  ;;  %v1460_v9 = vadd.f32 %v1458_v1, %v1369_v54  ;;  %v1459_v10 = vmul.f32 %v1455_v49, %v1443_v5  ;;  %v1550_v11 = vmul.f32 %v1546_v50, %v1534_v6 }
 0x1ca   : > { %2007 = vmatprep.mubr.f32.mxu0 %v13522_v0  ;;  %2128 = vmatpush1.msra.mxu0 %v11861_v62  ;;  %v1623_v14 = vpop.f32.mrf.mxu0  ;;  %v1714_v15 = vpop.f32.mrf.mxu1 }
 0x1cb   : > { %v1461_v17 = vadd.f32 %v1459_v10, %v1370_v63  ;;  %v1551_v18 = vadd.f32 %v1549_v2, %v1460_v9  ;;  %v1640_v22 = vmul.f32 %v1633_v61, %v1623_v14  ;;  %v1731_v23 = vmul.f32 %v1724_v3, %v1714_v15 }
 0x1cc   : > { %v1625_v24 = vpop.f32.mrf.mxu0  ;;  %v1716_v26 = vpop.f32.mrf.mxu1 }
 0x1cd   : > { %10987 = vmatmul.mubr.msk.f32.gmra.mxu0 %vm450_vm0, %v1926_v13  ;;  %v1552_v30 = vadd.f32 %v1550_v11, %v1461_v17  ;;  %v1642_v31 = vadd.f32 %v1640_v22, %v1551_v18  ;;  %v1641_v32 = vmul.f32 %v1637_v7, %v1625_v24  ;;  %v1732_v33 = vmul.f32 %v1728_v8, %v1716_v26 }
 0x1ce   : > { %2161 = vmatprep.mubr.f32.mxu0 %v13522_v0  ;;  %v1805_v35 = vpop.f32.mrf.mxu0  ;;  %v1896_v36 = vpop.f32.mrf.mxu1 }
 0x1cf   : > { %v1643_v37 = vadd.f32 %v1641_v32, %v1552_v30  ;;  %v1733_v38 = vadd.f32 %v1731_v23, %v1642_v31  ;;  %v1822_v39 = vmul.f32 %v1815_v16, %v1805_v35  ;;  %v1913_v41 = vmul.f32 %v1906_v28, %v1896_v36 }
 0x1d0   : > { %v1807_v40 = vpop.f32.mrf.mxu0  ;;  %v1898_v42 = vpop.f32.mrf.mxu1  ;;  %v12085_v36 = vand.u32 127, %v527_v19 }
 0x1d1   : > { %10990 = vmatmul.mubr.msk.f32.vlgmr.msra.gmra.mxu0 %vm450_vm0, %v1919_v34  ;;  %v1734_v43 = vadd.f32 %v1732_v33, %v1643_v37  ;;  %v1824_v44 = vadd.f32 %v1822_v39, %v1733_v38  ;;  %v1823_v45 = vmul.f32 %v1819_v27, %v1807_v40  ;;  %v1914_v46 = vmul.f32 %v1910_v29, %v1898_v42  ;;  %v12091_v38 = vld [vmem:[#allocation9] ss:$8 sm:$0xf] }
 0x1d2   : > { %2167 = vmatprep.mubr.f32.mxu0 %v13522_v0  ;;  %vm2271_vm1 = vcmp.lt.s32.totalorder %v12085_v36, 17  ;;  %v2289_v19 = vrot.slane %v12091_v38, %v11821_v25  ;;  %vm2483_vm2 = vcmp.lt.s32.totalorder %v12085_v36, 16  ;;  %vm2696_vm4 = vcmp.lt.s32.totalorder %v12085_v36, 15 }
 0x1d3   : > { %v1825_v48 = vadd.f32 %v1823_v45, %v1734_v43  ;;  %v11889_v49 = vadd.f32 %v1913_v41, %v1824_v44  ;;  %vm2909_vm5 = vcmp.lt.s32.totalorder %v12085_v36, 1  ;;  %vm3279_vm6 = vcmp.lt.s32.totalorder %v12085_v36, 127 }
 0x1d4   : > { %vm3492_vm7 = vcmp.lt.s32.totalorder %v12085_v36, 113  ;;  %vm3705_vm8 = vcmp.lt.s32.totalorder %v12085_v36, 112  ;;  %vm3918_vm9 = vcmp.lt.s32.totalorder %v12085_v36, 111  ;;  %v9184_v36 = vld [vmem:[%s11717_s12 + $0x10] sm:$0xff] }
 0x1d5   : > { %13566 = vst [vmem:[#allocation23_spill] sm:$0xff] %v11889_v49  ;;  %10991 = vmatmul.mubr.msk.f32.gmra.mxu0 %vm450_vm0, %v1920_v47  ;;  %v11892_v50 = vadd.f32 %v1914_v46, %v1825_v48 }
 0x1d6   : > { %2379 = vmatprep.mubr.f32.mxu0 %v13522_v0 }
 0x1d7   : > { %13567 = vst [vmem:[#allocation24_spill] sm:$0xff] %v11892_v50  ;;  %2044 = vmatprep.subr.mxu1 %v11892_v50 }
 0x1d8   : > { %2045 = vmatpush1.msra.mxu1 %v11889_v49 }
 0x1d9   : > { %10988 = vmatmul.mubr.msk.f32.vlgmr.msra.gmra.mxu1 %vm450_vm0, %v11853_v57  ;;  %2204 = vmatprep.subr.mxu1 %v1924_v51 }
 0x1da   : > { %2084 = vmatprep.mubr.f32.mxu1 %v13522_v0  ;;  %2205 = vmatpush1.msra.mxu1 %v1923_v53 }
 0x1dd   : > { %10989 = vmatmul.mubr.msk.f32.gmra.mxu1 %vm450_vm0, %v1926_v13 }
 0x1de   : > { %2238 = vmatprep.mubr.f32.mxu1 %v13522_v0 }
 0x1e1   : > { %10992 = vmatmul.mubr.msk.f32.vlgmr.msra.gmra.mxu1 %vm450_vm0, %v1919_v34 }
 0x1e2   : > { %2244 = vmatprep.mubr.f32.mxu1 %v13522_v0 }
 0x1e5   : > { %10993 = vmatmul.mubr.msk.f32.gmra.mxu1 %vm450_vm0, %v1920_v47 }
 0x1e6   : > { %2450 = vmatprep.mubr.f32.mxu1 %v13522_v0 }
 0x289   : > { %v2003_v54 = vpop.f32.mrf.mxu0 }
 0x28b   : > { %v2005_v55 = vpop.f32.mrf.mxu0 }
 0x28d   : > { %v2009_v59 = vpop.f32.mrf.mxu0 }
 0x28f   : > { %v2011_v57 = vpop.f32.mrf.mxu0 }
 0x291   : > { %v2163_v60 = vpop.f32.mrf.mxu0 }
 0x292   : > { %v11908_v61 = vadd.f32 %v2163_v60, %v2003_v54 }
 0x293   : > { %v2165_v63 = vpop.f32.mrf.mxu0 }
 0x294   : > { %v11910_v1 = vadd.f32 %v2165_v63, %v2005_v55  ;;  %2253 = vrot.lane.b32.xlu0 %v11908_v61, %s11496_s2  ;;  %v2285_v63 = vrot.slane %v12091_v38, %v11817_v21 }
 0x295   : > { %v2169_v2 = vpop.f32.mrf.mxu0 }
 0x296   : > { %2257 = vrot.lane.b32.xlu1 %v11910_v1, %s11496_s2  ;;  %v11928_v3 = vadd.f32 %v2169_v2, %v2009_v59  ;;  %v12161_v2 = vld [vmem:[#allocation9 + $0x1] ss:$8 sm:$0xf] }
 0x297   : > { %v2171_v5 = vpop.f32.mrf.mxu0 }
 0x298   : > { %2467 = vrot.lane.b32.xlu0 %v11908_v61, %s11494_s11  ;;  %v11944_v7 = vadd.f32 %v2171_v5, %v2011_v57 }
 0x299   : > { %v2080_v4 = vpop.f32.mrf.mxu1 }
 0x29a   : > { %2471 = vrot.lane.b32.xlu1 %v11910_v1, %s11494_s11 }
 0x29b   : > { %v2082_v6 = vpop.f32.mrf.mxu1 }
 0x29c   : > { %2680 = vrot.lane.b32.xlu0 %v11908_v61, %s11497_s20 }
 0x29d   : > { %v2086_v8 = vpop.f32.mrf.mxu1 }
 0x29e   : > { %2684 = vrot.lane.b32.xlu1 %v11910_v1, %s11497_s20 }
 0x29f   : > { %v2088_v9 = vpop.f32.mrf.mxu1 }
 0x2a0   : > { %2893 = vrot.lane.b32.xlu0 %v11908_v61, %s11498_s30 }
 0x2a1   : > { %v2240_v10 = vpop.f32.mrf.mxu1 }
 0x2a2   : > { %2897 = vrot.lane.b32.xlu1 %v11910_v1, %s11498_s30  ;;  %v11966_v13 = vadd.f32 %v2240_v10, %v2080_v4 }
 0x2a3   : > { %v2242_v11 = vpop.f32.mrf.mxu1 }
 0x2a4   : > { %3263 = vrot.lane.b32.xlu0 %v11908_v61, %s11499_s28  ;;  %v11962_v12 = vadd.f32 %v2242_v11, %v2082_v6  ;;  %13569 = vst [vmem:[#allocation26_spill] sm:$0xff] %v11966_v13  ;;  %v2502_v11 = vrot.slane %v12161_v2, %v11821_v25 }
 0x2a5   : > { %v2246_v14 = vpop.f32.mrf.mxu1 }
 0x2a6   : > { %2255 = vrot.lane.b32.xlu1 %v11928_v3, %s11496_s2  ;;  %13568 = vst [vmem:[#allocation25_spill] sm:$0xff] %v11962_v12  ;;  %v11984_v17 = vadd.f32 %v2246_v14, %v2086_v8 }
 0x2a7   : > { %v2248_v15 = vpop.f32.mrf.mxu1 }
 0x2a8   : > { %3476 = vrot.lane.b32.xlu0 %v11908_v61, %s11500_s25  ;;  %v11976_v16 = vadd.f32 %v2248_v15, %v2088_v9 }
 0x2aa   : > { %2469 = vrot.lane.b32.xlu1 %v11928_v3, %s11494_s11 }
 0x2ac   : > { %3267 = vrot.lane.b32.xlu0 %v11910_v1, %s11499_s28 }
 0x2ae   : > { %2682 = vrot.lane.b32.xlu1 %v11928_v3, %s11497_s20 }
 0x2b0   : > { %3480 = vrot.lane.b32.xlu0 %v11910_v1, %s11500_s25 }
 0x2b2   : > { %2895 = vrot.lane.b32.xlu1 %v11928_v3, %s11498_s30 }
 0x2b4   : > { %2259 = vrot.lane.b32.xlu0 %v11944_v7, %s11496_s2 }
 0x2b6   : > { %3265 = vrot.lane.b32.xlu1 %v11928_v3, %s11499_s28 }
 0x2b8   : > { %2473 = vrot.lane.b32.xlu0 %v11944_v7, %s11494_s11 }
 0x2ba   : > { %3478 = vrot.lane.b32.xlu1 %v11928_v3, %s11500_s25 }
 0x2bc   : > { %2686 = vrot.lane.b32.xlu0 %v11944_v7, %s11497_s20 }
 0x2be   : > { %3269 = vrot.lane.b32.xlu1 %v11944_v7, %s11499_s28 }
 0x2c0   : > { %2899 = vrot.lane.b32.xlu0 %v11944_v7, %s11498_s30 }
 0x2c2   : > { %3482 = vrot.lane.b32.xlu1 %v11944_v7, %s11500_s25 }
 0x2c4   : > { %2265 = vrot.lane.b32.xlu0 %v11962_v12, %s11496_s2 }
 0x2c6   : > { %3271 = vrot.lane.b32.xlu1 %v11966_v13, %s11499_s28 }
 0x2c8   : > { %2479 = vrot.lane.b32.xlu0 %v11962_v12, %s11494_s11 }
 0x2ca   : > { %3484 = vrot.lane.b32.xlu1 %v11966_v13, %s11500_s25 }
 0x2cc   : > { %2692 = vrot.lane.b32.xlu0 %v11962_v12, %s11497_s20 }
 0x2ce   : > { %2267 = vrot.lane.b32.xlu1 %v11976_v16, %s11496_s2 }
 0x2d0   : > { %2905 = vrot.lane.b32.xlu0 %v11962_v12, %s11498_s30 }
 0x2d2   : > { %2481 = vrot.lane.b32.xlu1 %v11976_v16, %s11494_s11 }
 0x2d4   : > { %3273 = vrot.lane.b32.xlu0 %v11984_v17, %s11499_s28 }
 0x2d6   : > { %2694 = vrot.lane.b32.xlu1 %v11976_v16, %s11497_s20 }
 0x2d8   : > { %3486 = vrot.lane.b32.xlu0 %v11984_v17, %s11500_s25 }
 0x2da   : > { %2907 = vrot.lane.b32.xlu1 %v11976_v16, %s11498_s30 }
 0x2dc   : > { %3699 = vrot.lane.b32.xlu0 %v11984_v17, %s11483_s29 }
 0x2de   : > { %3695 = vrot.lane.b32.xlu1 %v11944_v7, %s11483_s29 }
 0x2e0   : > { %3693 = vrot.lane.b32.xlu0 %v11910_v1, %s11483_s29 }
 0x2e2   : > { %3691 = vrot.lane.b32.xlu1 %v11928_v3, %s11483_s29 }
 0x2e4   : > { %3689 = vrot.lane.b32.xlu0 %v11908_v61, %s11483_s29 }
 0x2e6   : > { %3697 = vrot.lane.b32.xlu1 %v11966_v13, %s11483_s29 }
 0x2e8   : > { %3912 = vrot.lane.b32.xlu0 %v11984_v17, %s11501_s21 }
 0x2ea   : > { %3908 = vrot.lane.b32.xlu1 %v11944_v7, %s11501_s21 }
 0x2ec   : > { %3906 = vrot.lane.b32.xlu0 %v11910_v1, %s11501_s21 }
 0x2ee   : > { %3904 = vrot.lane.b32.xlu1 %v11928_v3, %s11501_s21 }
 0x2f0   : > { %3902 = vrot.lane.b32.xlu0 %v11908_v61, %s11501_s21 }
 0x2f2   : > { %3910 = vrot.lane.b32.xlu1 %v11966_v13, %s11501_s21 }
 0x2f4   : > { %2261 = vrot.lane.b32.xlu0 %v11966_v13, %s11496_s2 }
 0x2f6   : > { %2263 = vrot.lane.b32.xlu1 %v11984_v17, %s11496_s2 }
 0x2f8   : > { %2475 = vrot.lane.b32.xlu0 %v11966_v13, %s11494_s11 }
 0x2fa   : > { %2477 = vrot.lane.b32.xlu1 %v11984_v17, %s11494_s11 }
 0x2fc   : > { %2688 = vrot.lane.b32.xlu0 %v11966_v13, %s11497_s20 }
 0x2fe   : > { %2690 = vrot.lane.b32.xlu1 %v11984_v17, %s11497_s20  ;;  %s11503_s20 = smov [#allocation12]  }
 0x300   : > { %2901 = vrot.lane.b32.xlu0 %v11966_v13, %s11498_s30  ;;  %v12347_v13 = vld [vmem:[#allocation9 + $0x7] ss:$8 sm:$0xf] }
 0x302   : > { %2903 = vrot.lane.b32.xlu1 %v11984_v17, %s11498_s30 }
 0x304   : > { %3275 = vrot.lane.b32.xlu0 %v11962_v12, %s11499_s28 }
 0x306   : > { %3277 = vrot.lane.b32.xlu1 %v11976_v16, %s11499_s28  ;;  %v12034_v18 = vpop.permute.xlu0 %2253 }
 0x308   : > { %v12036_v22 = vpop.permute.xlu1 %2257  ;;  %3488 = vrot.lane.b32.xlu0 %v11962_v12, %s11500_s25 }
 0x309   : > { %v2276_v60 = vsel %vm2271_vm1, %v12034_v18, %v12036_v22 }
 0x30a   : > { %3490 = vrot.lane.b32.xlu1 %v11976_v16, %s11500_s25  ;;  %v12042_v23 = vpop.permute.xlu0 %2467  ;;  %v2303_v10 = vmul.f32 %v2289_v19, %v2276_v60 }
 0x30c   : > { %v12044_v24 = vpop.permute.xlu1 %2471  ;;  %3701 = vrot.lane.b32.xlu0 %v11962_v12, %s11483_s29 }
 0x30d   : > { %v2488_v14 = vsel %vm2483_vm2, %v12042_v23, %v12044_v24 }
 0x30e   : > { %3703 = vrot.lane.b32.xlu1 %v11976_v16, %s11483_s29  ;;  %v12050_v26 = vpop.permute.xlu0 %2680 }
 0x310   : > { %v12052_v27 = vpop.permute.xlu1 %2684  ;;  %3914 = vrot.lane.b32.xlu0 %v11962_v12, %s11501_s21 }
 0x312   : > { %3916 = vrot.lane.b32.xlu1 %v11976_v16, %s11501_s21  ;;  %v12056_v28 = vpop.permute.xlu0 %2893 }
 0x314   : > { %v12058_v29 = vpop.permute.xlu1 %2897  ;;  %4370 = vrot.lane.b32.xlu0 %v11848_v56, %s11484_s26 }
 0x316   : > { %4268 = vrot.lane.b32.xlu1 %v11848_v56, %s11483_s29  ;;  %v12064_v30 = vpop.permute.xlu0 %3263 }
 0x318   : > { %v2256_v31 = vpop.permute.xlu1 %2255  ;;  %4574 = vrot.lane.b32.xlu0 %v11848_v56, %s11488_s6 }
 0x31a   : > { %4472 = vrot.lane.b32.xlu1 %v11848_v56, %s11486_s17  ;;  %v12070_v32 = vpop.permute.xlu0 %3476 }
 0x31b   : > { %13570 = vst [vmem:[#allocation27_spill] sm:$0xff] %v12070_v32 }
 0x31c   : > { %v12072_v33 = vpop.permute.xlu1 %2469  ;;  %4778 = vrot.lane.b32.xlu0 %v11848_v56, %s11492_s18 }
 0x31e   : > { %4676 = vrot.lane.b32.xlu1 %v11848_v56, %s11490_s3  ;;  %v12078_v34 = vpop.permute.xlu0 %3267 }
 0x320   : > { %v12080_v35 = vpop.permute.xlu1 %2682  ;;  %5084 = vrot.lane.b32.xlu0 %v11846_v52, %s11483_s29 }
 0x322   : > { %4880 = vrot.lane.b32.xlu1 %v11848_v56, %s11494_s11  ;;  %v12089_v37 = vpop.permute.xlu0 %3480 }
 0x324   : > { %v12093_v39 = vpop.permute.xlu1 %2895  ;;  %5288 = vrot.lane.b32.xlu0 %v11846_v52, %s11486_s17 }
 0x326   : > { %5186 = vrot.lane.b32.xlu1 %v11846_v52, %s11484_s26  ;;  %v12100_v40 = vpop.permute.xlu0 %2259 }
 0x327   : > { %v2277_v41 = vsel %vm2271_vm1, %v2256_v31, %v12100_v40 }
 0x328   : > { %v12107_v42 = vpop.permute.xlu1 %3265  ;;  %5492 = vrot.lane.b32.xlu0 %v11846_v52, %s11490_s3  ;;  %v2307_v43 = vmul.f32 %v2289_v19, %v2277_v41  ;;  %v12200_v19 = vld [vmem:[%s13516_s9] sm:$0xf] }
 0x32a   : > { %5390 = vrot.lane.b32.xlu1 %v11846_v52, %s11488_s6  ;;  %2343 = vmatprep.subr.mxu0 %v2307_v43  ;;  %v12113_v44 = vpop.permute.xlu0 %2473 }
 0x32b   : > { %v2489_v6 = vsel %vm2483_vm2, %v12072_v33, %v12113_v44 }
 0x32c   : > { %v12115_v45 = vpop.permute.xlu1 %3478  ;;  %5696 = vrot.lane.b32.xlu0 %v11846_v52, %s11494_s11 }
 0x32e   : > { %5594 = vrot.lane.b32.xlu1 %v11846_v52, %s11492_s18  ;;  %v12121_v46 = vpop.permute.xlu0 %2686 }
 0x330   : > { %v12123_v47 = vpop.permute.xlu1 %3269  ;;  %6039 = vrot.lane.b32.xlu0 %v11861_v62, %s11484_s26 }
 0x332   : > { %5937 = vrot.lane.b32.xlu1 %v11861_v62, %s11483_s29  ;;  %v12129_v48 = vpop.permute.xlu0 %2899 }
 0x334   : > { %v12131_v51 = vpop.permute.xlu1 %3482  ;;  %6243 = vrot.lane.b32.xlu0 %v11861_v62, %s11488_s6 }
 0x336   : > { %6141 = vrot.lane.b32.xlu1 %v11861_v62, %s11486_s17  ;;  %v12137_v53 = vpop.permute.xlu0 %2265 }
 0x338   : > { %v12139_v54 = vpop.permute.xlu1 %3271  ;;  %6447 = vrot.lane.b32.xlu0 %v11861_v62, %s11492_s18 }
 0x33a   : > { %6345 = vrot.lane.b32.xlu1 %v11861_v62, %s11490_s3  ;;  %v12145_v55 = vpop.permute.xlu0 %2479 }
 0x33b   : > { %v2490_v43 = vsel %vm2483_vm2, %v12145_v55, %v12042_v23  ;;  %v2516_v23 = vmul.f32 %v2502_v11, %v2488_v14 }
 0x33c   : > { %v12147_v59 = vpop.permute.xlu1 %3484  ;;  %6753 = vrot.lane.b32.xlu0 %v11856_v58, %s11483_s29 }
 0x33d   : > { %13571 = vst [vmem:[#allocation28_spill] sm:$0xff] %v12147_v59  ;;  %v3495_v12 = vsel %vm3492_vm7, %v12089_v37, %v12147_v59  ;;  %v3720_v59 = vrot.slane %v12347_v13, %v11817_v21 }
 0x33e   : > { %6549 = vrot.lane.b32.xlu1 %v11861_v62, %s11494_s11  ;;  %v12153_v57 = vpop.permute.xlu0 %2692  ;;  %v2278_v62 = vsel %vm2271_vm1, %v12137_v53, %v12034_v18  ;;  %v2498_v18 = vrot.slane %v12161_v2, %v11817_v21 }
 0x33f   : > { %v2302_v15 = vmul.f32 %v2285_v63, %v2278_v62  ;;  %v2702_v62 = vsel %vm2696_vm4, %v12080_v35, %v12121_v46  ;;  %v2703_v14 = vsel %vm2696_vm4, %v12153_v57, %v12050_v26 }
 0x340   : > { %v12163_v4 = vpop.permute.xlu1 %2267  ;;  %6957 = vrot.lane.b32.xlu0 %v11856_v58, %s11486_s17 }
 0x341   : > { %v2279_v5 = vsel %vm2271_vm1, %v12163_v4, %v2256_v31  ;;  %v12191_v31 = vld [vmem:[#allocation9 + $0x2] ss:$8 sm:$0xf] }
 0x342   : > { %v2306_v8 = vmul.f32 %v2285_v63, %v2279_v5  ;;  %6855 = vrot.lane.b32.xlu1 %v11856_v58, %s11484_s26  ;;  %v12181_v9 = vpop.permute.xlu0 %2905  ;;  %v2520_v63 = vmul.f32 %v2502_v11, %v2489_v6  ;;  %v2701_v6 = vsel %vm2696_vm4, %v12050_v26, %v12052_v27  ;;  %v12238_v11 = vld [vmem:[%s13516_s9 + $0x4] sm:$0xf] }
 0x344   : > { %v12193_v41 = vpop.permute.xlu1 %2481  ;;  %7161 = vrot.lane.b32.xlu0 %v11856_v58, %s11490_s3  ;;  %2344 = vmatpush1.msra.mxu0 %v2306_v8 }
 0x345   : > { %v2491_v60 = vsel %vm2483_vm2, %v12193_v41, %v12072_v33  ;;  %2345 = vmatprep.subr.mxu0 %v2303_v10  ;;  %v2715_v33 = vrot.slane %v12191_v31, %v11821_v25  ;;  %v12227_v10 = vld [vmem:[#allocation9 + $0x3] ss:$8 sm:$0xf] }
 0x346   : > { %v2519_v5 = vmul.f32 %v2498_v18, %v2491_v60  ;;  %7059 = vrot.lane.b32.xlu1 %v11856_v58, %s11488_s6  ;;  %2346 = vmatpush1.msra.mxu0 %v2302_v15  ;;  %v12217_v8 = vpop.permute.xlu0 %3273  ;;  %v2515_v60 = vmul.f32 %v2498_v18, %v2490_v43  ;;  %v2711_v15 = vrot.slane %v12191_v31, %v11817_v21  ;;  %v13572_v43 = vmov 0.0  }
 0x347   : > { %10994 = vmatmul.mubr.msk.f32.vlgmr.msra.gmra.mxu0 %vm2311_vm3, %v12200_v19  ;;  %2556 = vmatprep.subr.mxu0 %v2520_v63  ;;  %v2733_v63 = vmul.f32 %v2715_v33, %v2702_v62  ;;  %v2928_v56 = vrot.slane %v12227_v10, %v11821_v25  ;;  %v2914_v62 = vsel %vm2909_vm5, %v12056_v28, %v12058_v29 }
 0x348   : > { %v12231_v0 = vpop.permute.xlu1 %2694  ;;  %7365 = vrot.lane.b32.xlu0 %v11856_v58, %s11494_s11  ;;  %2557 = vmatpush1.msra.mxu0 %v2519_v5  ;;  %v2915_v5 = vsel %vm2909_vm5, %v12093_v39, %v12129_v48 }
 0x349   : > { %v2704_v18 = vsel %vm2696_vm4, %v12231_v0, %v12080_v35  ;;  %2558 = vmatprep.subr.mxu0 %v2516_v23  ;;  %2592 = vmatprep.mubr.f32.mxu0 %v13572_v43  ;;  %v2729_v35 = vmul.f32 %v2715_v33, %v2701_v6  ;;  %v2728_v23 = vmul.f32 %v2711_v15, %v2703_v14 }
 0x34a   : > { %v2732_v52 = vmul.f32 %v2711_v15, %v2704_v18  ;;  %7263 = vrot.lane.b32.xlu1 %v11856_v58, %s11492_s18  ;;  %2559 = vmatpush1.msra.mxu0 %v2515_v60  ;;  %v12256_v26 = vpop.permute.xlu0 %3486  ;;  %v2924_v58 = vrot.slane %v12227_v10, %v11817_v21  ;;  %v12275_v18 = vld [vmem:[%s13516_s9 + $0x8] sm:$0xf]  ;;  %v2946_v33 = vmul.f32 %v2928_v56, %v2915_v5 }
 0x34b   : > { %13573 = vst [vmem:[#allocation29_spill] sm:$0xff] %v12256_v26  ;;  %10997 = vmatmul.mubr.msk.f32.vlgmr.msra.gmra.mxu0 %vm2311_vm3, %v12238_v11  ;;  %2769 = vmatprep.subr.mxu0 %v2733_v63  ;;  %v2916_v6 = vsel %vm2909_vm5, %v12181_v9, %v12056_v28  ;;  %v2942_v28 = vmul.f32 %v2928_v56, %v2914_v62 }
 0x34c   : > { %v12268_v60 = vpop.permute.xlu1 %2907  ;;  %7718 = vrot.lane.b32.xlu0 %v11889_v49, %s11484_s26  ;;  %2770 = vmatpush1.msra.mxu0 %v2732_v52  ;;  %v2941_v63 = vmul.f32 %v2924_v58, %v2916_v6  ;;  %v3283_v56 = vsel %vm3279_vm6, %v12123_v47, %v12217_v8  ;;  %v3282_v6 = vsel %vm3279_vm6, %v12078_v34, %v12139_v54 }
 0x34d   : > { %v2917_v15 = vsel %vm2909_vm5, %v12268_v60, %v12093_v39  ;;  %2771 = vmatprep.subr.mxu0 %v2729_v35  ;;  %2805 = vmatprep.mubr.f32.mxu0 %v13572_v43  ;;  %v12297_v39 = vld [vmem:[%s13516_s9 + $0xc] sm:$0xf] }
 0x34e   : > { %v2945_v52 = vmul.f32 %v2924_v58, %v2917_v15  ;;  %7616 = vrot.lane.b32.xlu1 %v11889_v49, %s11483_s29  ;;  %2772 = vmatpush1.msra.mxu0 %v2728_v23  ;;  %v12288_v14 = vpop.permute.xlu0 %3699  ;;  %v12300_v35 = vld [vmem:[#allocation9 + $0x5] ss:$8 sm:$0xf]  ;;  %v3285_v23 = vsel %vm3279_vm6, %v12107_v42, %v12123_v47  ;;  %v12332_v47 = vld [vmem:[%s13516_s9 + $0x10] sm:$0xf] }
 0x34f   : > { %11000 = vmatmul.mubr.msk.f32.vlgmr.msra.gmra.mxu0 %vm2311_vm3, %v12275_v18  ;;  %2982 = vmatprep.subr.mxu0 %v2946_v33  ;;  %v3298_v58 = vrot.slane %v12300_v35, %v11821_v25  ;;  %v3294_v33 = vrot.slane %v12300_v35, %v11817_v21 }
 0x350   : > { %v3696_v5 = vpop.permute.xlu1 %3695  ;;  %7922 = vrot.lane.b32.xlu0 %v11889_v49, %s11488_s6  ;;  %2983 = vmatpush1.msra.mxu0 %v2945_v52  ;;  %v12339_v52 = vld [vmem:[#allocation9 + $0x6] ss:$8 sm:$0xf] }
 0x351   : > { %2984 = vmatprep.subr.mxu0 %v2942_v28  ;;  %3018 = vmatprep.mubr.f32.mxu0 %v13572_v43  ;;  %v3316_v28 = vmul.f32 %v3298_v58, %v3283_v56  ;;  %v3312_v56 = vmul.f32 %v3298_v58, %v3282_v6  ;;  %v12376_v58 = vld [vmem:[%s13516_s9 + $0x14] sm:$0xf] }
 0x352   : > { %7820 = vrot.lane.b32.xlu1 %v11889_v49, %s11486_s17  ;;  %2985 = vmatpush1.msra.mxu0 %v2941_v63  ;;  %v3694_v62 = vpop.permute.xlu0 %3693  ;;  %v3496_v63 = vsel %vm3492_vm7, %v12131_v51, %v12256_v26 }
 0x353   : > { %11003 = vmatmul.mubr.msk.f32.vlgmr.msra.gmra.mxu0 %vm2311_vm3, %v12297_v39  ;;  %3139 = vmatprep.subr.mxu0 %v11944_v7  ;;  %v3284_v7 = vsel %vm3279_vm6, %v12064_v30, %v12078_v34 }
 0x354   : > { %v12324_v15 = vpop.permute.xlu1 %3691  ;;  %8126 = vrot.lane.b32.xlu0 %v11889_v49, %s11492_s18  ;;  %3140 = vmatpush1.msra.mxu0 %v11928_v3  ;;  %v3315_v3 = vmul.f32 %v3294_v33, %v3285_v23  ;;  %v3511_v23 = vrot.slane %v12339_v52, %v11821_v25  ;;  %v3311_v26 = vmul.f32 %v3294_v33, %v3284_v7 }
 0x355   : > { %3141 = vmatprep.subr.mxu0 %v11910_v1  ;;  %3175 = vmatprep.mubr.f32.mxu0 %v13572_v43  ;;  %v3498_v1 = vsel %vm3492_vm7, %v12115_v45, %v12131_v51  ;;  %v3497_v33 = vsel %vm3492_vm7, %v12070_v32, %v12089_v37  ;;  %v3724_v7 = vrot.slane %v12347_v13, %v11821_v25 }
 0x356   : > { %8024 = vrot.lane.b32.xlu1 %v11889_v49, %s11490_s3  ;;  %3142 = vmatpush1.msra.mxu0 %v11908_v61  ;;  %v12352_v34 = vpop.permute.xlu0 %3689  ;;  %v3507_v61 = vrot.slane %v12339_v52, %v11817_v21  ;;  %v3529_v6 = vmul.f32 %v3511_v23, %v3496_v63  ;;  %v12394_v63 = vld [vmem:[#allocation9 + $0x20] ss:$8 sm:$0xf]  ;;  %v3525_v32 = vmul.f32 %v3511_v23, %v3495_v12 }
 0x357   : > { %11006 = vmatmul.mubr.msk.f32.vlgmr.msra.gmra.mxu0 %vm2311_vm3, %v12332_v47  ;;  %3352 = vmatprep.subr.mxu0 %v3316_v28  ;;  %v12410_v12 = vld [vmem:[%s13516_s9 + $0x18] sm:$0xf]  ;;  %v3710_v23 = vsel %vm3705_vm8, %v12352_v34, %v3694_v62 }
 0x358   : > { %v12369_v51 = vpop.permute.xlu1 %3697  ;;  %8432 = vrot.lane.b32.xlu0 %v11892_v50, %s11483_s29  ;;  %3353 = vmatpush1.msra.mxu0 %v3315_v3  ;;  %v3528_v28 = vmul.f32 %v3507_v61, %v3498_v1  ;;  %v3709_v3 = vsel %vm3705_vm8, %v3696_v5, %v12288_v14  ;;  %v3711_v1 = vsel %vm3705_vm8, %v12324_v15, %v3696_v5 }
 0x359   : > { %3354 = vmatprep.subr.mxu0 %v3312_v56  ;;  %3388 = vmatprep.mubr.f32.mxu0 %v13572_v43  ;;  %v3524_v56 = vmul.f32 %v3507_v61, %v3497_v33  ;;  %v3742_v5 = vmul.f32 %v3724_v7, %v3709_v3  ;;  %v3937_v61 = vrot.slane %v12394_v63, %v11821_v25 }
 0x35a   : > { %8228 = vrot.lane.b32.xlu1 %v11889_v49, %s11494_s11  ;;  %3355 = vmatpush1.msra.mxu0 %v3311_v26  ;;  %v12392_v37 = vpop.permute.xlu0 %3912  ;;  %v3708_v26 = vsel %vm3705_vm8, %v3694_v62, %v12369_v51  ;;  %v3741_v33 = vmul.f32 %v3720_v59, %v3711_v1  ;;  %v3933_v3 = vrot.slane %v12394_v63, %v11817_v21  ;;  %v12434_v1 = vld [vmem:[%s13516_s9 + $0x1c] sm:$0xf] }
 0x35b   : > { %11009 = vmatmul.mubr.msk.f32.vlgmr.msra.gmra.mxu0 %vm2311_vm3, %v12376_v58  ;;  %3565 = vmatprep.subr.mxu0 %v3529_v6  ;;  %v3738_v62 = vmul.f32 %v3724_v7, %v3708_v26 }
 0x35c   : > { %v3909_v49 = vpop.permute.xlu1 %3908  ;;  %8636 = vrot.lane.b32.xlu0 %v11892_v50, %s11486_s17  ;;  %3566 = vmatpush1.msra.mxu0 %v3528_v28 }
 0x35d   : > { %3567 = vmatprep.subr.mxu0 %v3525_v32  ;;  %3601 = vmatprep.mubr.f32.mxu0 %v13572_v43  ;;  %v3922_v6 = vsel %vm3918_vm9, %v3909_v49, %v12392_v37  ;;  %v3737_v32 = vmul.f32 %v3720_v59, %v3710_v23 }
 0x35e   : > { %8534 = vrot.lane.b32.xlu1 %v11892_v50, %s11484_s26  ;;  %3568 = vmatpush1.msra.mxu0 %v3524_v56  ;;  %v3907_v28 = vpop.permute.xlu0 %3906  ;;  %v3955_v56 = vmul.f32 %v3937_v61, %v3922_v6 }
 0x35f   : > { %11012 = vmatmul.mubr.msk.f32.vlgmr.msra.gmra.mxu0 %vm2311_vm3, %v12410_v12  ;;  %3778 = vmatprep.subr.mxu0 %v3742_v5 }
 0x360   : > { %v12427_v25 = vpop.permute.xlu1 %3904  ;;  %8840 = vrot.lane.b32.xlu0 %v11892_v50, %s11490_s3  ;;  %3779 = vmatpush1.msra.mxu0 %v3741_v33  ;;  %v12457_v33 = vsub.s32 3, %v11814_v20 }
 0x361   : > { %v3924_v7 = vsel %vm3918_vm9, %v12427_v25, %v3909_v49  ;;  %3780 = vmatprep.subr.mxu0 %v3738_v62  ;;  %3814 = vmatprep.mubr.f32.mxu0 %v13572_v43  ;;  %v12454_v49 = vsub.s32 2, %v11814_v20 }
 0x362   : > { %v3954_v59 = vmul.f32 %v3933_v3, %v3924_v7  ;;  %8738 = vrot.lane.b32.xlu1 %v11892_v50, %s11488_s6  ;;  %3781 = vmatpush1.msra.mxu0 %v3737_v32  ;;  %v12442_v26 = vpop.permute.xlu0 %3902  ;;  %v12468_v7 = vld [vmem:[%s13516_s9 + $0x20] sm:$0xf]  ;;  %v2297_v21 = vrot.slane %v12091_v38, %v12457_v33 }
 0x363   : > { %11015 = vmatmul.mubr.msk.f32.vlgmr.msra.gmra.mxu0 %vm2311_vm3, %v12434_v1  ;;  %3991 = vmatprep.subr.mxu0 %v3955_v56  ;;  %v3923_v5 = vsel %vm3918_vm9, %v12442_v26, %v3907_v28 }
 0x364   : > { %v12449_v23 = vpop.permute.xlu1 %3910  ;;  %9044 = vrot.lane.b32.xlu0 %v11892_v50, %s11494_s11  ;;  %3992 = vmatpush1.msra.mxu0 %v3954_v59  ;;  %v3950_v56 = vmul.f32 %v3933_v3, %v3923_v5  ;;  %v2293_v59 = vrot.slane %v12091_v38, %v12454_v49 }
 0x365   : > { %v3921_v6 = vsel %vm3918_vm9, %v3907_v28, %v12449_v23  ;;  %4027 = vmatprep.mubr.f32.mxu0 %v13572_v43 }
 0x366   : > { %v3951_v62 = vmul.f32 %v3937_v61, %v3921_v6  ;;  %8942 = vrot.lane.b32.xlu1 %v11892_v50, %s11492_s18  ;;  %v2262_v32 = vpop.permute.xlu0 %2261 }
 0x367   : > { %v2272_v61 = vsel %vm2271_vm1, %v2262_v32, %v12137_v53  ;;  %v2274_v3 = vsel %vm2271_vm1, %v12036_v22, %v2262_v32  ;;  %v2506_v22 = vrot.slane %v12161_v2, %v12454_v49 }
 0x368   : > { %v2264_v28 = vpop.permute.xlu1 %2263  ;;  %3993 = vmatprep.subr.mxu0 %v3951_v62  ;;  %v2304_v53 = vmul.f32 %v2293_v59, %v2274_v3  ;;  %v2305_v20 = vmul.f32 %v2297_v21, %v2272_v61  ;;  %v2723_v61 = vrot.slane %v12191_v31, %v12457_v33  ;;  %9387 = vrot.lane.b32.xlu0 %v9184_v36, %s11484_s26 }
 0x369   : > { %v2273_v5 = vsel %vm2271_vm1, %v2264_v28, %v12163_v4  ;;  %v2275_v6 = vsel %vm2271_vm1, %v12100_v40, %v2264_v28  ;;  %3994 = vmatpush1.msra.mxu0 %v3950_v56  ;;  %v2510_v4 = vrot.slane %v12161_v2, %v12457_v33 }
 0x36a   : > { %v2308_v38 = vmul.f32 %v2293_v59, %v2275_v6  ;;  %v2309_v50 = vmul.f32 %v2297_v21, %v2273_v5  ;;  %11018 = vmatmul.mubr.msk.f32.vlgmr.msra.gmra.mxu0 %vm2311_vm3, %v12468_v7  ;;  %v2476_v62 = vpop.permute.xlu0 %2475  ;;  %9285 = vrot.lane.b32.xlu1 %v9184_v36, %s11483_s29 }
 0x36b   : > { %4235 = vmatprep.mubr.f32.mxu0 %v13572_v43  ;;  %v2484_v40 = vsel %vm2483_vm2, %v2476_v62, %v12145_v55  ;;  %v2486_v56 = vsel %vm2483_vm2, %v12044_v24, %v2476_v62  ;;  %v2719_v55 = vrot.slane %v12191_v31, %v12454_v49 }
 0x36c   : > { %2414 = vmatprep.subr.mxu1 %v2309_v50  ;;  %v2478_v32 = vpop.permute.xlu1 %2477  ;;  %v2517_v24 = vmul.f32 %v2506_v22, %v2486_v56  ;;  %v2518_v3 = vmul.f32 %v2510_v4, %v2484_v40  ;;  %9591 = vrot.lane.b32.xlu0 %v9184_v36, %s11488_s6 }
 0x36d   : > { %v2485_v21 = vsel %vm2483_vm2, %v2478_v32, %v12193_v41  ;;  %v2487_v59 = vsel %vm2483_vm2, %v12113_v44, %v2478_v32  ;;  %2415 = vmatpush1.msra.mxu1 %v2308_v38 }
 0x36e   : > { %v2521_v2 = vmul.f32 %v2506_v22, %v2487_v59  ;;  %v2522_v50 = vmul.f32 %v2510_v4, %v2485_v21  ;;  %2416 = vmatprep.subr.mxu1 %v2305_v20  ;;  %v2689_v28 = vpop.permute.xlu0 %2688  ;;  %v3306_v21 = vrot.slane %v12300_v35, %v12457_v33  ;;  %9489 = vrot.lane.b32.xlu1 %v9184_v36, %s11486_s17 }
 0x36f   : > { %2417 = vmatpush1.msra.mxu1 %v2304_v53  ;;  %v2697_v41 = vsel %vm2696_vm4, %v2689_v28, %v12153_v57  ;;  %v2699_v20 = vsel %vm2696_vm4, %v12052_v27, %v2689_v28 }
 0x370   : > { %v2691_v5 = vpop.permute.xlu1 %2690  ;;  %2627 = vmatprep.subr.mxu1 %v2522_v50  ;;  %10995 = vmatmul.mubr.msk.f32.vlgmr.msra.gmra.mxu1 %vm2311_vm3, %v12200_v19  ;;  %v2932_v19 = vrot.slane %v12227_v10, %v12454_v49  ;;  %v2730_v27 = vmul.f32 %v2719_v55, %v2699_v20  ;;  %v2731_v62 = vmul.f32 %v2723_v61, %v2697_v41  ;;  %v13577_v41 = vld [vmem:[#allocation27_spill] sm:$0xff]  ;;  %v13578_v20 = vld [vmem:[#allocation28_spill] sm:$0xff] }
 0x371   : > { %v2698_v44 = vsel %vm2696_vm4, %v2691_v5, %v12231_v0  ;;  %v2700_v31 = vsel %vm2696_vm4, %v12121_v46, %v2691_v5  ;;  %2628 = vmatpush1.msra.mxu1 %v2521_v2  ;;  %2663 = vmatprep.mubr.f32.mxu1 %v13572_v43  ;;  %v2936_v0 = vrot.slane %v12227_v10, %v12457_v33 }
 0x372   : > { %v2734_v57 = vmul.f32 %v2719_v55, %v2700_v31  ;;  %v2735_v6 = vmul.f32 %v2723_v61, %v2698_v44  ;;  %2629 = vmatprep.subr.mxu1 %v2518_v3  ;;  %v2902_v38 = vpop.permute.xlu0 %2901  ;;  %9693 = vrot.lane.b32.xlu1 %v9184_v36, %s11490_s3 }
 0x373   : > { %2630 = vmatpush1.msra.mxu1 %v2517_v24  ;;  %v2910_v46 = vsel %vm2909_vm5, %v2902_v38, %v12181_v9  ;;  %v2912_v10 = vsel %vm2909_vm5, %v12058_v29, %v2902_v38  ;;  %9795 = vrot.lane.b32.xlu0 %v9184_v36, %s11492_s18 }
 0x374   : > { %v2904_v53 = vpop.permute.xlu1 %2903  ;;  %2840 = vmatprep.subr.mxu1 %v2735_v6  ;;  %10998 = vmatmul.mubr.msk.f32.vlgmr.msra.gmra.mxu1 %vm2311_vm3, %v12238_v11  ;;  %v2944_v9 = vmul.f32 %v2936_v0, %v2910_v46  ;;  %v3732_v6 = vrot.slane %v12347_v13, %v12457_v33 }
 0x375   : > { %v2911_v22 = vsel %vm2909_vm5, %v2904_v53, %v12268_v60  ;;  %v2913_v4 = vsel %vm2909_vm5, %v12129_v48, %v2904_v53  ;;  %2841 = vmatpush1.msra.mxu1 %v2734_v57  ;;  %2876 = vmatprep.mubr.f32.mxu1 %v13572_v43  ;;  %v2943_v60 = vmul.f32 %v2932_v19, %v2912_v10 }
 0x376   : > { %v2947_v11 = vmul.f32 %v2932_v19, %v2913_v4  ;;  %v2948_v32 = vmul.f32 %v2936_v0, %v2911_v22  ;;  %2842 = vmatprep.subr.mxu1 %v2731_v62  ;;  %v3276_v40 = vpop.permute.xlu0 %3275  ;;  %v3728_v62 = vrot.slane %v12347_v13, %v12454_v49  ;;  %v3941_v4 = vrot.slane %v12394_v63, %v12454_v49 }
 0x377   : > { %2843 = vmatpush1.msra.mxu1 %v2730_v27  ;;  %9897 = vrot.lane.b32.xlu1 %v9184_v36, %s11494_s11 }
 0x378   : > { %v3278_v56 = vpop.permute.xlu1 %3277  ;;  %3053 = vmatprep.subr.mxu1 %v2948_v32  ;;  %11001 = vmatmul.mubr.msk.f32.vlgmr.msra.gmra.mxu1 %vm2311_vm3, %v12275_v18  ;;  %v3302_v18 = vrot.slane %v12300_v35, %v12454_v49  ;;  %v13575_v35 = vld [vmem:[#allocation26_spill] sm:$0xff] }
 0x379   : > { %3054 = vmatpush1.msra.mxu1 %v2947_v11  ;;  %3089 = vmatprep.mubr.f32.mxu1 %v13572_v43  ;;  %v3287_v29 = vsel %vm3279_vm6, %v3278_v56, %v12107_v42  ;;  %v3281_v59 = vsel %vm3279_vm6, %v12217_v8, %v3278_v56  ;;  %v3286_v42 = vsel %vm3279_vm6, %v3276_v40, %v12064_v30  ;;  %v13576_v30 = vld [vmem:[#allocation29_spill] sm:$0xff] }
 0x37a   : > { %3055 = vmatprep.subr.mxu1 %v2944_v9  ;;  %v3489_v48 = vpop.permute.xlu0 %3488  ;;  %v3280_v8 = vsel %vm3279_vm6, %v12139_v54, %v3276_v40  ;;  %v3318_v50 = vmul.f32 %v3306_v21, %v3287_v29  ;;  %v3317_v28 = vmul.f32 %v3302_v18, %v3281_v59  ;;  %v3314_v55 = vmul.f32 %v3306_v21, %v3286_v42  ;;  %v2251_v59 = vld [vmem:[#allocation11] sm:$0xff] }
 0x37b   : > { %3056 = vmatpush1.msra.mxu1 %v2943_v60  ;;  %v3313_v3 = vmul.f32 %v3302_v18, %v3280_v8  ;;  %v3499_v5 = vsel %vm3492_vm7, %v3489_v48, %v13577_v41  ;;  %v3493_v44 = vsel %vm3492_vm7, %v13578_v20, %v3489_v48  ;;  %v11502_v41 = vmov 1983009808  }
 0x37c   : > { %v3491_v2 = vpop.permute.xlu1 %3490  ;;  %3210 = vmatprep.subr.mxu1 %v11976_v16  ;;  %11004 = vmatmul.mubr.msk.f32.vlgmr.msra.gmra.mxu1 %vm2311_vm3, %v12297_v39  ;;  %v13574_v16 = vld [vmem:[#allocation25_spill] sm:$0xff] }
 0x37d   : > { %3211 = vmatpush1.msra.mxu1 %v11984_v17  ;;  %3246 = vmatprep.mubr.f32.mxu1 %v13572_v43  ;;  %v3500_v39 = vsel %vm3492_vm7, %v3491_v2, %v12115_v45  ;;  %v3519_v17 = vrot.slane %v12339_v52, %v12457_v33  ;;  %v3494_v61 = vsel %vm3492_vm7, %v13576_v30, %v3491_v2 }
 0x37e   : > { %3212 = vmatprep.subr.mxu1 %v13574_v16  ;;  %v3702_v24 = vpop.permute.xlu0 %3701  ;;  %v3515_v45 = vrot.slane %v12339_v52, %v12454_v49 }
 0x37f   : > { %3213 = vmatpush1.msra.mxu1 %v13575_v35  ;;  %v3531_v31 = vmul.f32 %v3519_v17, %v3500_v39  ;;  %v3527_v52 = vmul.f32 %v3519_v17, %v3499_v5  ;;  %v4124_v5 = vunpack.c.l.s4 %v11502_v41 }
 0x380   : > { %v3704_v54 = vpop.permute.xlu1 %3703  ;;  %3423 = vmatprep.subr.mxu1 %v3318_v50  ;;  %11007 = vmatmul.mubr.msk.f32.vlgmr.msra.gmra.mxu1 %vm2311_vm3, %v12332_v47  ;;  %v3530_v57 = vmul.f32 %v3515_v45, %v3494_v61  ;;  %v3526_v27 = vmul.f32 %v3515_v45, %v3493_v44 }
 0x381   : > { %3424 = vmatpush1.msra.mxu1 %v3317_v28  ;;  %3459 = vmatprep.mubr.f32.mxu1 %v13572_v43  ;;  %v3713_v47 = vsel %vm3705_vm8, %v3704_v54, %v12324_v15  ;;  %v3707_v38 = vsel %vm3705_vm8, %v12288_v14, %v3704_v54  ;;  %v3712_v15 = vsel %vm3705_vm8, %v3702_v24, %v12352_v34 }
 0x382   : > { %3425 = vmatprep.subr.mxu1 %v3314_v55  ;;  %v3706_v14 = vsel %vm3705_vm8, %v12369_v51, %v3702_v24  ;;  %v3744_v0 = vmul.f32 %v3732_v6, %v3713_v47  ;;  %v3915_v53 = vpop.permute.xlu0 %3914  ;;  %v3743_v46 = vmul.f32 %v3728_v62, %v3707_v38  ;;  %v3740_v13 = vmul.f32 %v3732_v6, %v3712_v15 }
 0x383   : > { %3426 = vmatpush1.msra.mxu1 %v3313_v3  ;;  %v3945_v34 = vrot.slane %v12394_v63, %v12457_v33  ;;  %v3739_v51 = vmul.f32 %v3728_v62, %v3706_v14  ;;  %v4125_v47 = vunpack.c.0.s8 %v4124_v5 }
 0x384   : > { %v3917_v19 = vpop.permute.xlu1 %3916  ;;  %3636 = vmatprep.subr.mxu1 %v3531_v31  ;;  %11010 = vmatmul.mubr.msk.f32.vlgmr.msra.gmra.mxu1 %vm2311_vm3, %v12376_v58 }
 0x385   : > { %3637 = vmatpush1.msra.mxu1 %v3530_v57  ;;  %3672 = vmatprep.mubr.f32.mxu1 %v13572_v43  ;;  %v3926_v58 = vsel %vm3918_vm9, %v3917_v19, %v12427_v25  ;;  %v3920_v22 = vsel %vm3918_vm9, %v12392_v37, %v3917_v19  ;;  %v3925_v25 = vsel %vm3918_vm9, %v3915_v53, %v12442_v26 }
 0x386   : > { %3638 = vmatprep.subr.mxu1 %v3527_v52  ;;  %v3919_v37 = vsel %vm3918_vm9, %v12449_v23, %v3915_v53  ;;  %v3957_v10 = vmul.f32 %v3945_v34, %v3926_v58  ;;  %v3956_v11 = vmul.f32 %v3941_v4, %v3920_v22  ;;  %v2252_v53 = vld [vmem:[#allocation11 + $0x8] sm:$0xff] }
 0x387   : > { %3639 = vmatpush1.msra.mxu1 %v3526_v27  ;;  %v3952_v63 = vmul.f32 %v3941_v4, %v3919_v37  ;;  %v13579_v27 = vld [vmem:[#allocation18_spill] sm:$0xff] }
 0x388   : > { %3849 = vmatprep.subr.mxu1 %v3744_v0  ;;  %11013 = vmatmul.mubr.msk.f32.vlgmr.msra.gmra.mxu1 %vm2311_vm3, %v12410_v12  ;;  %v3953_v12 = vmul.f32 %v3945_v34, %v3925_v25  ;;  %v12649_v62 = vsub.s32 %v4125_v47, %v13579_v27  ;;  %v12654_v0 = vld [vmem:[%s13511_s4] sm:$0xf]  ;;  %v4118_v58 = vadd.s32 8, %v13579_v27  ;;  %v12671_v36 = vcvt.s32.f32 %v13579_v27 }
 0x389   : > { %3850 = vmatpush1.msra.mxu1 %v3743_v46  ;;  %3885 = vmatprep.mubr.f32.mxu1 %v13572_v43 }
 0x38a   : > { %3851 = vmatprep.subr.mxu1 %v3740_v13  ;;  %v12664_v37 = vcvt.s32.f32 %v4118_v58 }
 0x38b   : > { %3852 = vmatpush1.msra.mxu1 %v3739_v51 }
 0x38c   : > { %4062 = vmatprep.subr.mxu1 %v3957_v10  ;;  %11016 = vmatmul.mubr.msk.f32.vlgmr.msra.gmra.mxu1 %vm2311_vm3, %v12434_v1  ;;  %v9999_v1 = vld [vmem:[%s11717_s12 + $0x18] sm:$0xff] }
 0x38d   : > { %4063 = vmatpush1.msra.mxu1 %v3956_v11  ;;  %4098 = vmatprep.mubr.f32.mxu1 %v13572_v43 }
 0x38e   : > { %4064 = vmatprep.subr.mxu1 %v3953_v12  ;;  %10101 = vrot.lane.b32.xlu0 %v9999_v1, %s11483_s29  ;;  %v13580_v12 = vld [vmem:[#allocation19_spill] sm:$0xff] }
 0x38f   : > { %4065 = vmatpush1.msra.mxu1 %v3952_v63  ;;  %10203 = vrot.lane.b32.xlu1 %v9999_v1, %s11484_s26 }
 0x390   : > { %11019 = vmatmul.mubr.msk.f32.vlgmr.msra.gmra.mxu1 %vm2311_vm3, %v12468_v7 }
 0x391   : > { %4336 = vmatprep.mubr.f32.mxu1 %v13572_v43 }
 0x392   : > { %10305 = vrot.lane.b32.xlu0 %v9999_v1, %s11486_s17 }
 0x393   : > { %10407 = vrot.lane.b32.xlu1 %v9999_v1, %s11488_s6 }
 0x396   : > { %10509 = vrot.lane.b32.xlu0 %v9999_v1, %s11490_s3 }
 0x397   : > { %10611 = vrot.lane.b32.xlu1 %v9999_v1, %s11492_s18 }
 0x39a   : > { %10713 = vrot.lane.b32.xlu0 %v9999_v1, %s11494_s11  ;;  %s10818_s11 = scalar_lea.sflag [#allocation5], %s11711_s5 }
 0x407   : > { %v2381_v26 = vpop.f32.mrf.mxu0 }
 0x409   : > { %v2383_v23 = vpop.f32.mrf.mxu0 }
 0x40a   : > { %v2461_v29 = vcombine.low %v2381_v26, %v2383_v23 }
 0x40b   : > { %v2594_v7 = vpop.f32.mrf.mxu0 }
 0x40c   : > { %v2465_v18 = vadd.f32 %v2461_v29, %v2251_v59 }
 0x40d   : > { %v2596_v32 = vpop.f32.mrf.mxu0 }
 0x40e   : > { %v2674_v42 = vcombine.low %v2594_v7, %v2596_v32 }
 0x40f   : > { %v2807_v40 = vpop.f32.mrf.mxu0 }
 0x410   : > { %v2678_v28 = vadd.f32 %v2674_v42, %v2465_v18 }
 0x411   : > { %v2809_v9 = vpop.f32.mrf.mxu0 }
 0x412   : > { %v2887_v50 = vcombine.low %v2807_v40, %v2809_v9 }
 0x413   : > { %v3020_v56 = vpop.f32.mrf.mxu0 }
 0x414   : > { %v2891_v55 = vadd.f32 %v2887_v50, %v2678_v28 }
 0x415   : > { %v3022_v60 = vpop.f32.mrf.mxu0 }
 0x416   : > { %v3100_v39 = vcombine.low %v3020_v56, %v3022_v60 }
 0x417   : > { %v3177_v48 = vpop.f32.mrf.mxu0 }
 0x418   : > { %v3104_v61 = vadd.f32 %v3100_v39, %v2891_v55 }
 0x419   : > { %v3179_v21 = vpop.f32.mrf.mxu0 }
 0x41a   : > { %v3257_v17 = vcombine.low %v3177_v48, %v3179_v21 }
 0x41b   : > { %v3390_v2 = vpop.f32.mrf.mxu0 }
 0x41c   : > { %v3261_v3 = vadd.f32 %v3257_v17, %v3104_v61 }
 0x41d   : > { %v3392_v8 = vpop.f32.mrf.mxu0 }
 0x41e   : > { %v3470_v24 = vcombine.low %v3390_v2, %v3392_v8 }
 0x41f   : > { %v3603_v16 = vpop.f32.mrf.mxu0 }
 0x420   : > { %v3474_v20 = vadd.f32 %v3470_v24, %v3261_v3 }
 0x421   : > { %v3605_v35 = vpop.f32.mrf.mxu0 }
 0x422   : > { %v3683_v45 = vcombine.low %v3603_v16, %v3605_v35 }
 0x423   : > { %v3816_v30 = vpop.f32.mrf.mxu0 }
 0x424   : > { %v3687_v57 = vadd.f32 %v3683_v45, %v3474_v20  ;;  %v4269_v20 = vpop.permute.xlu1 %4268 }
 0x425   : > { %v3818_v54 = vpop.f32.mrf.mxu0 }
 0x426   : > { %v3896_v44 = vcombine.low %v3816_v30, %v3818_v54 }
 0x428   : > { %v3900_v6 = vadd.f32 %v3896_v44, %v3687_v57  ;;  %v4473_v27 = vpop.permute.xlu1 %4472 }
 0x42a   : > { %v4029_v31 = vpop.f32.mrf.mxu0 }
 0x42c   : > { %v4031_v52 = vpop.f32.mrf.mxu0 }
 0x42d   : > { %v4109_v38 = vcombine.low %v4029_v31, %v4031_v52  ;;  %v13581_v31 = vld [vmem:[#allocation22_spill] sm:$0xff] }
 0x42f   : > { %v4113_v19 = vadd.f32 %v4109_v38, %v3900_v6  ;;  %v4371_v38 = vpop.permute.xlu0 %4370 }
 0x430   : > { %v2452_v15 = vpop.f32.mrf.mxu1 }
 0x431   : > { %v4121_v14 = vmul.f32 0.5, %v4113_v19 }
 0x432   : > { %v2454_v46 = vpop.f32.mrf.mxu1 }
 0x433   : > { %v12658_v13 = vrot.slane %v4121_v14, %v12649_v62  ;;  %v2462_v34 = vcombine.low %v2452_v15, %v2454_v46 }
 0x434   : > { %v2665_v22 = vpop.f32.mrf.mxu1 }
 0x435   : > { %v12662_v51 = vadd.f32 %v12658_v13, %v12654_v0  ;;  %v2466_v4 = vadd.f32 %v2462_v34, %v2252_v53  ;;  %v4575_v34 = vpop.permute.xlu0 %4574 }
 0x436   : > { %v2667_v25 = vpop.f32.mrf.mxu1 }
 0x437   : > { %v2675_v10 = vcombine.low %v2665_v22, %v2667_v25  ;;  %v4140_v11 = vrot.slane %v12662_v51, %v12454_v49  ;;  %v4136_v63 = vrot.slane %v12662_v51, %v13580_v12 }
 0x438   : > { %v2878_v1 = vpop.f32.mrf.mxu1 }
 0x439   : > { %v2679_v26 = vadd.f32 %v2675_v10, %v2466_v4  ;;  %v4150_v23 = vrot.slane %v4140_v11, %v13580_v12  ;;  %v4146_v7 = vrot.slane %v4136_v63, %v13580_v12  ;;  %v4677_v4 = vpop.permute.xlu1 %4676  ;;  %v5798_v11 = vcombine.high %v12658_v13, %v12658_v13 }
 0x43a   : > { %v2880_v32 = vpop.f32.mrf.mxu1 }
 0x43b   : > { %v4154_v40 = vsub.f32 %v4150_v23, %v12664_v37  ;;  %v2888_v9 = vcombine.low %v2878_v1, %v2880_v32  ;;  %v4153_v56 = vsub.f32 %v4146_v7, %v12664_v37  ;;  %v4152_v60 = vsub.f32 %v4150_v23, %v12671_v36 }
 0x43c   : > { %v3091_v48 = vpop.f32.mrf.mxu1  ;;  %v4151_v29 = vsub.f32 %v4146_v7, %v12671_v36  ;;  %v12733_v23 = vadd.f32 %v5798_v11, %v12654_v0 }
 0x43d   : > { %v4158_v21 = vand.u32 2147483647, %v4154_v40  ;;  %v2892_v59 = vadd.f32 %v2888_v9, %v2679_v26  ;;  %v4157_v2 = vand.u32 2147483647, %v4153_v56  ;;  %v4156_v18 = vand.u32 2147483647, %v4152_v60  ;;  %v4779_v26 = vpop.permute.xlu0 %4778  ;;  %v4881_v13 = vpop.permute.xlu1 %4880 }
 0x43e   : > { %v4155_v42 = vand.u32 2147483647, %v4151_v29  ;;  %v3093_v8 = vpop.f32.mrf.mxu1  ;;  %v5809_v9 = vrot.slane %v12733_v23, %v12454_v49  ;;  %v5805_v56 = vrot.slane %v12733_v23, %v13580_v12 }
 0x43f   : > { %v4162_v50 = vsub.f32 1.0, %v4158_v21  ;;  %v4161_v16 = vsub.f32 1.0, %v4157_v2  ;;  %v4160_v28 = vsub.f32 1.0, %v4156_v18  ;;  %v3101_v39 = vcombine.low %v3091_v48, %v3093_v8  ;;  %v13582_v48 = vld [vmem:[#allocation21_spill] sm:$0xff] }
 0x440   : > { %v4159_v35 = vsub.f32 1.0, %v4155_v42  ;;  %v3248_v55 = vpop.f32.mrf.mxu1  ;;  %v5815_v29 = vrot.slane %v5805_v56, %v13580_v12 }
 0x441   : > { %v12679_v17 = vmax.f32 %v4162_v50, 0.0  ;;  %v12681_v30 = vmax.f32 %v4161_v16, 0.0  ;;  %v3105_v61 = vadd.f32 %v3101_v39, %v2892_v59  ;;  %v12685_v54 = vmax.f32 %v4160_v28, 0.0  ;;  %v5085_v60 = vpop.permute.xlu0 %5084  ;;  %v5187_v59 = vpop.permute.xlu1 %5186 }
 0x442   : > { %v3250_v24 = vpop.f32.mrf.mxu1  ;;  %v12689_v45 = vmax.f32 %v4159_v35, 0.0  ;;  %v5822_v18 = vsub.f32 %v5815_v29, %v12664_v37  ;;  %v5820_v8 = vsub.f32 %v5815_v29, %v12671_v36 }
 0x443   : > { %4199 = vmatprep.subr.mxu0 %v12679_v17  ;;  %4300 = vmatprep.subr.mxu1 %v12679_v17  ;;  %v3258_v3 = vcombine.low %v3248_v55, %v3250_v24 }
 0x444   : > { %4200 = vmatpush1.msra.mxu0 %v12681_v30  ;;  %4301 = vmatpush1.msra.mxu1 %v12681_v30  ;;  %v3461_v41 = vpop.f32.mrf.mxu1  ;;  %v5826_v16 = vand.u32 2147483647, %v5822_v18  ;;  %v5824_v55 = vand.u32 2147483647, %v5820_v8  ;;  %v13583_v8 = vld [vmem:[#allocation23_spill] sm:$0xff] }
 0x445   : > { %4201 = vmatprep.subr.mxu0 %v12685_v54  ;;  %4302 = vmatprep.subr.mxu1 %v12685_v54  ;;  %v3262_v5 = vadd.f32 %v3258_v3, %v3105_v61  ;;  %v5289_v21 = vpop.permute.xlu0 %5288  ;;  %v5391_v39 = vpop.permute.xlu1 %5390 }
 0x446   : > { %4202 = vmatpush1.msra.mxu0 %v12689_v45  ;;  %4303 = vmatpush1.msra.mxu1 %v12689_v45  ;;  %v3463_v44 = vpop.f32.mrf.mxu1  ;;  %v5830_v24 = vsub.f32 1.0, %v5826_v16 }
 0x447   : > { %11020 = vmatmul.mubr.msk.f32.vlgmr.msra.gmra.mxu0 %vm2311_vm3, %v13581_v31  ;;  %11021 = vmatmul.mubr.msk.f32.vlgmr.msra.gmra.mxu1 %vm2311_vm3, %v4269_v20  ;;  %v3471_v57 = vcombine.low %v3461_v41, %v3463_v44  ;;  %v5828_v41 = vsub.f32 1.0, %v5824_v55  ;;  %v11263_v31 = vld [vmem:[%s11717_s12] sm:$0xff] }
 0x448   : > { %4402 = vmatprep.subr.mxu0 %v12679_v17  ;;  %4504 = vmatprep.subr.mxu1 %v12679_v17  ;;  %v3674_v47 = vpop.f32.mrf.mxu1 }
 0x449   : > { %4403 = vmatpush1.msra.mxu0 %v12681_v30  ;;  %4505 = vmatpush1.msra.mxu1 %v12681_v30  ;;  %v3475_v52 = vadd.f32 %v3471_v57, %v3262_v5  ;;  %v5493_v28 = vpop.permute.xlu0 %5492  ;;  %v5595_v20 = vpop.permute.xlu1 %5594 }
 0x44a   : > { %4404 = vmatprep.subr.mxu0 %v12685_v54  ;;  %4506 = vmatprep.subr.mxu1 %v12685_v54  ;;  %v3676_v6 = vpop.f32.mrf.mxu1 }
 0x44b   : > { %4405 = vmatpush1.msra.mxu0 %v12689_v45  ;;  %4438 = vmatprep.mubr.f32.mxu0 %v13572_v43  ;;  %v3684_v19 = vcombine.low %v3674_v47, %v3676_v6 }
 0x44c   : > { %4507 = vmatpush1.msra.mxu1 %v12689_v45  ;;  %4540 = vmatprep.mubr.f32.mxu1 %v13572_v43  ;;  %v3887_v15 = vpop.f32.mrf.mxu1 }
 0x44d   : > { %11023 = vmatmul.mubr.msk.f32.vlgmr.msra.gmra.mxu0 %vm2311_vm3, %v4371_v38  ;;  %11025 = vmatmul.mubr.msk.f32.vlgmr.msra.gmra.mxu1 %vm2311_vm3, %v4473_v27  ;;  %v3688_v14 = vadd.f32 %v3684_v19, %v3475_v52  ;;  %v5697_v5 = vpop.permute.xlu0 %5696  ;;  %v5938_v44 = vpop.permute.xlu1 %5937 }
 0x44e   : > { %4606 = vmatprep.subr.mxu0 %v12679_v17  ;;  %4708 = vmatprep.subr.mxu1 %v12679_v17  ;;  %v3889_v53 = vpop.f32.mrf.mxu1 }
 0x44f   : > { %4607 = vmatpush1.msra.mxu0 %v12681_v30  ;;  %4709 = vmatpush1.msra.mxu1 %v12681_v30  ;;  %v3897_v46 = vcombine.low %v3887_v15, %v3889_v53  ;;  %v11264_v53 = vld [vmem:[%s11717_s12 + $0x8] sm:$0xff] }
 0x450   : > { %4608 = vmatprep.subr.mxu0 %v12685_v54  ;;  %4710 = vmatprep.subr.mxu1 %v12685_v54  ;;  %v4100_v58 = vpop.f32.mrf.mxu1 }
 0x451   : > { %4609 = vmatpush1.msra.mxu0 %v12689_v45  ;;  %4642 = vmatprep.mubr.f32.mxu0 %v13572_v43  ;;  %v3901_v22 = vadd.f32 %v3897_v46, %v3688_v14  ;;  %v6040_v57 = vpop.permute.xlu0 %6039  ;;  %v6142_v47 = vpop.permute.xlu1 %6141 }
 0x452   : > { %4711 = vmatpush1.msra.mxu1 %v12689_v45  ;;  %4744 = vmatprep.mubr.f32.mxu1 %v13572_v43  ;;  %v4102_v25 = vpop.f32.mrf.mxu1 }
 0x453   : > { %11027 = vmatmul.mubr.msk.f32.vlgmr.msra.gmra.mxu0 %vm2311_vm3, %v4575_v34  ;;  %11029 = vmatmul.mubr.msk.f32.vlgmr.msra.gmra.mxu1 %vm2311_vm3, %v4677_v4  ;;  %v4110_v10 = vcombine.low %v4100_v58, %v4102_v25 }
 0x454   : > { %4810 = vmatprep.subr.mxu0 %v12679_v17  ;;  %4912 = vmatprep.subr.mxu1 %v12679_v17 }
 0x455   : > { %4811 = vmatpush1.msra.mxu0 %v12681_v30  ;;  %4913 = vmatpush1.msra.mxu1 %v12681_v30  ;;  %v4114_v63 = vadd.f32 %v4110_v10, %v3901_v22  ;;  %v6244_v52 = vpop.permute.xlu0 %6243  ;;  %v6346_v6 = vpop.permute.xlu1 %6345 }
 0x456   : > { %4812 = vmatprep.subr.mxu0 %v12685_v54  ;;  %4914 = vmatprep.subr.mxu1 %v12685_v54 }
 0x457   : > { %4813 = vmatpush1.msra.mxu0 %v12689_v45  ;;  %4846 = vmatprep.mubr.f32.mxu0 %v13572_v43  ;;  %v7469_v1 = vmul.f32 0.5, %v4114_v63 }
 0x458   : > { %4915 = vmatpush1.msra.mxu1 %v12689_v45  ;;  %4948 = vmatprep.mubr.f32.mxu1 %v13572_v43 }
 0x459   : > { %11031 = vmatmul.mubr.msk.f32.vlgmr.msra.gmra.mxu0 %vm2311_vm3, %v4779_v26  ;;  %11033 = vmatmul.mubr.msk.f32.vlgmr.msra.gmra.mxu1 %vm2311_vm3, %v4881_v13  ;;  %v7477_v7 = vrot.slane %v7469_v1, %v12649_v62  ;;  %v6448_v38 = vpop.permute.xlu0 %6447  ;;  %v6550_v19 = vpop.permute.xlu1 %6549 }
 0x45a   : > { %5014 = vmatprep.subr.mxu0 %v12679_v17  ;;  %5116 = vmatprep.subr.mxu1 %v12679_v17 }
 0x45b   : > { %5015 = vmatpush1.msra.mxu0 %v12681_v30  ;;  %5117 = vmatpush1.msra.mxu1 %v12681_v30  ;;  %v12745_v32 = vadd.f32 %v7477_v7, %v12654_v0  ;;  %v9146_v40 = vcombine.high %v7477_v7, %v7477_v7 }
 0x45c   : > { %5016 = vmatprep.subr.mxu0 %v12685_v54  ;;  %5118 = vmatprep.subr.mxu1 %v12685_v54 }
 0x45d   : > { %5017 = vmatpush1.msra.mxu0 %v12689_v45  ;;  %5050 = vmatprep.mubr.f32.mxu0 %v13572_v43  ;;  %v12754_v62 = vadd.f32 %v9146_v40, %v12654_v0  ;;  %v5819_v0 = vrot.slane %v5809_v9, %v13580_v12  ;;  %v7488_v27 = vrot.slane %v12745_v32, %v12454_v49  ;;  %v6754_v14 = vpop.permute.xlu0 %6753  ;;  %v6856_v22 = vpop.permute.xlu1 %6855 }
 0x45e   : > { %5119 = vmatpush1.msra.mxu1 %v12689_v45  ;;  %5152 = vmatprep.mubr.f32.mxu1 %v13572_v43  ;;  %v7484_v15 = vrot.slane %v12745_v32, %v13580_v12 }
 0x45f   : > { %11035 = vmatmul.mubr.msk.f32.vlgmr.msra.gmra.mxu0 %vm2311_vm3, %v13582_v48  ;;  %11037 = vmatmul.mubr.msk.f32.vlgmr.msra.gmra.mxu1 %vm2311_vm3, %v5085_v60  ;;  %v5823_v2 = vsub.f32 %v5819_v0, %v12664_v37  ;;  %v5821_v42 = vsub.f32 %v5819_v0, %v12671_v36  ;;  %v7498_v46 = vrot.slane %v7488_v27, %v13580_v12 }
 0x460   : > { %5218 = vmatprep.subr.mxu0 %v12679_v17  ;;  %5320 = vmatprep.subr.mxu1 %v12679_v17  ;;  %v7494_v58 = vrot.slane %v7484_v15, %v13580_v12 }
 0x461   : > { %5219 = vmatpush1.msra.mxu0 %v12681_v30  ;;  %5321 = vmatpush1.msra.mxu1 %v12681_v30  ;;  %v5827_v50 = vand.u32 2147483647, %v5823_v2  ;;  %v5825_v35 = vand.u32 2147483647, %v5821_v42  ;;  %v6958_v34 = vpop.permute.xlu0 %6957  ;;  %v7502_v4 = vsub.f32 %v7498_v46, %v12664_v37  ;;  %v7500_v10 = vsub.f32 %v7498_v46, %v12671_v36  ;;  %v7060_v13 = vpop.permute.xlu1 %7059 }
 0x462   : > { %5220 = vmatprep.subr.mxu0 %v12685_v54  ;;  %5322 = vmatprep.subr.mxu1 %v12685_v54  ;;  %v7501_v25 = vsub.f32 %v7494_v58, %v12664_v37  ;;  %v7499_v11 = vsub.f32 %v7494_v58, %v12671_v36 }
 0x463   : > { %5221 = vmatpush1.msra.mxu0 %v12689_v45  ;;  %5254 = vmatprep.mubr.f32.mxu0 %v13572_v43  ;;  %v5831_v61 = vsub.f32 1.0, %v5827_v50  ;;  %v5829_v3 = vsub.f32 1.0, %v5825_v35  ;;  %v7506_v63 = vand.u32 2147483647, %v7502_v4  ;;  %v7504_v7 = vand.u32 2147483647, %v7500_v10 }
 0x464   : > { %5323 = vmatpush1.msra.mxu1 %v12689_v45  ;;  %5356 = vmatprep.mubr.f32.mxu1 %v13572_v43  ;;  %v7505_v1 = vand.u32 2147483647, %v7501_v25  ;;  %v7503_v40 = vand.u32 2147483647, %v7499_v11 }
 0x465   : > { %11039 = vmatmul.mubr.msk.f32.vlgmr.msra.gmra.mxu0 %vm2311_vm3, %v5187_v59  ;;  %11041 = vmatmul.mubr.msk.f32.vlgmr.msra.gmra.mxu1 %vm2311_vm3, %v5289_v21  ;;  %v7162_v26 = vpop.permute.xlu0 %7161  ;;  %v7510_v9 = vsub.f32 1.0, %v7506_v63  ;;  %v7508_v60 = vsub.f32 1.0, %v7504_v7  ;;  %v7264_v29 = vpop.permute.xlu1 %7263 }
 0x466   : > { %5422 = vmatprep.subr.mxu0 %v12679_v17  ;;  %5524 = vmatprep.subr.mxu1 %v12679_v17  ;;  %v7509_v56 = vsub.f32 1.0, %v7505_v1  ;;  %v7507_v48 = vsub.f32 1.0, %v7503_v40 }
 0x467   : > { %5423 = vmatpush1.msra.mxu0 %v12681_v30  ;;  %5525 = vmatpush1.msra.mxu1 %v12681_v30  ;;  %v12919_v21 = vmax.f32 %v7510_v9, 0.0  ;;  %v12927_v2 = vmax.f32 %v7508_v60, 0.0  ;;  %v11022_v9 = vadd.f32 -1.0, %v12662_v51 }
 0x468   : > { %5424 = vmatprep.subr.mxu0 %v12685_v54  ;;  %5526 = vmatprep.subr.mxu1 %v12685_v54  ;;  %v12923_v59 = vmax.f32 %v7509_v56, 0.0  ;;  %v12931_v18 = vmax.f32 %v7507_v48, 0.0  ;;  %v11024_v56 = vadd.f32 -2.0, %v12662_v51 }
 0x469   : > { %5425 = vmatpush1.msra.mxu0 %v12689_v45  ;;  %5458 = vmatprep.mubr.f32.mxu0 %v13572_v43  ;;  %v7366_v0 = vpop.permute.xlu0 %7365  ;;  %v7617_v42 = vpop.permute.xlu1 %7616 }
 0x46a   : > { %5527 = vmatpush1.msra.mxu1 %v12689_v45  ;;  %5560 = vmatprep.mubr.f32.mxu1 %v13572_v43 }
 0x46b   : > { %11043 = vmatmul.mubr.msk.f32.vlgmr.msra.gmra.mxu0 %vm2311_vm3, %v5391_v39  ;;  %11045 = vmatmul.mubr.msk.f32.vlgmr.msra.gmra.mxu1 %vm2311_vm3, %v5493_v28 }
 0x46c   : > { %5626 = vmatprep.subr.mxu0 %v12679_v17  ;;  %5728 = vmatprep.subr.mxu1 %v12679_v17  ;;  %v12803_v17 = vmax.f32 %v5831_v61, 0.0  ;;  %v9157_v61 = vrot.slane %v12754_v62, %v12454_v49 }
 0x46d   : > { %5627 = vmatpush1.msra.mxu0 %v12681_v30  ;;  %5729 = vmatpush1.msra.mxu1 %v12681_v30  ;;  %v12807_v30 = vmax.f32 %v5830_v24, 0.0  ;;  %v7719_v50 = vpop.permute.xlu0 %7718  ;;  %v7821_v16 = vpop.permute.xlu1 %7820  ;;  %v9153_v24 = vrot.slane %v12754_v62, %v13580_v12 }
 0x46e   : > { %5628 = vmatprep.subr.mxu0 %v12685_v54  ;;  %5730 = vmatprep.subr.mxu1 %v12685_v54  ;;  %v12811_v54 = vmax.f32 %v5829_v3, 0.0  ;;  %v9167_v49 = vrot.slane %v9157_v61, %v13580_v12 }
 0x46f   : > { %5629 = vmatpush1.msra.mxu0 %v12689_v45  ;;  %5662 = vmatprep.mubr.f32.mxu0 %v13572_v43 }
 0x470   : > { %5731 = vmatpush1.msra.mxu1 %v12689_v45  ;;  %5764 = vmatprep.mubr.f32.mxu1 %v13572_v43  ;;  %v12815_v45 = vmax.f32 %v5828_v41, 0.0  ;;  %v13584_v41 = vld [vmem:[#allocation24_spill] sm:$0xff] }
 0x471   : > { %11047 = vmatmul.mubr.msk.f32.vlgmr.msra.gmra.mxu0 %vm2311_vm3, %v5595_v20  ;;  %11049 = vmatmul.mubr.msk.f32.vlgmr.msra.gmra.mxu1 %vm2311_vm3, %v5697_v5  ;;  %v7923_v28 = vpop.permute.xlu0 %7922  ;;  %v8025_v39 = vpop.permute.xlu1 %8024  ;;  %v9163_v5 = vrot.slane %v9153_v24, %v13580_v12 }
 0x472   : > { %5868 = vmatprep.subr.mxu0 %v12803_v17  ;;  %5969 = vmatprep.subr.mxu1 %v12803_v17 }
 0x473   : > { %5869 = vmatpush1.msra.mxu0 %v12807_v30  ;;  %5970 = vmatpush1.msra.mxu1 %v12807_v30  ;;  %v9170_v12 = vsub.f32 %v9163_v5, %v12664_v37 }
 0x474   : > { %5870 = vmatprep.subr.mxu0 %v12811_v54  ;;  %5971 = vmatprep.subr.mxu1 %v12811_v54 }
 0x475   : > { %5871 = vmatpush1.msra.mxu0 %v12815_v45  ;;  %5904 = vmatprep.mubr.f32.mxu0 %v13572_v43  ;;  %v8127_v35 = vpop.permute.xlu0 %8126  ;;  %v8229_v55 = vpop.permute.xlu1 %8228 }
 0x476   : > { %5972 = vmatpush1.msra.mxu1 %v12815_v45  ;;  %6005 = vmatprep.mubr.f32.mxu1 %v13572_v43 }
 0x477   : > { %11051 = vmatmul.mubr.msk.f32.vlgmr.msra.gmra.mxu0 %vm2311_vm3, %v11263_v31  ;;  %11052 = vmatmul.mubr.msk.f32.vlgmr.msra.gmra.mxu1 %vm2311_vm3, %v5938_v44 }
 0x478   : > { %6071 = vmatprep.subr.mxu0 %v12803_v17  ;;  %6173 = vmatprep.subr.mxu1 %v12803_v17 }
 0x479   : > { %6072 = vmatpush1.msra.mxu0 %v12807_v30  ;;  %6174 = vmatpush1.msra.mxu1 %v12807_v30  ;;  %v8433_v3 = vpop.permute.xlu0 %8432 }
 0x47a   : > { %6073 = vmatprep.subr.mxu0 %v12811_v54  ;;  %6175 = vmatprep.subr.mxu1 %v12811_v54 }
 0x47b   : > { %6074 = vmatpush1.msra.mxu0 %v12815_v45  ;;  %6107 = vmatprep.mubr.f32.mxu0 %v13572_v43 }
 0x47c   : > { %6176 = vmatpush1.msra.mxu1 %v12815_v45  ;;  %6209 = vmatprep.mubr.f32.mxu1 %v13572_v43 }
 0x47d   : > { %11054 = vmatmul.mubr.msk.f32.vlgmr.msra.gmra.mxu0 %vm2311_vm3, %v6040_v57  ;;  %11056 = vmatmul.mubr.msk.f32.vlgmr.msra.gmra.mxu1 %vm2311_vm3, %v6142_v47  ;;  %v8637_v20 = vpop.permute.xlu0 %8636 }
 0x47e   : > { %6275 = vmatprep.subr.mxu0 %v12803_v17  ;;  %6377 = vmatprep.subr.mxu1 %v12803_v17 }
 0x47f   : > { %6276 = vmatpush1.msra.mxu0 %v12807_v30  ;;  %6378 = vmatpush1.msra.mxu1 %v12807_v30 }
 0x480   : > { %6277 = vmatprep.subr.mxu0 %v12811_v54  ;;  %6379 = vmatprep.subr.mxu1 %v12811_v54 }
 0x481   : > { %6278 = vmatpush1.msra.mxu0 %v12815_v45  ;;  %6311 = vmatprep.mubr.f32.mxu0 %v13572_v43  ;;  %v8841_v31 = vpop.permute.xlu0 %8840 }
 0x482   : > { %6380 = vmatpush1.msra.mxu1 %v12815_v45  ;;  %6413 = vmatprep.mubr.f32.mxu1 %v13572_v43 }
 0x483   : > { %11058 = vmatmul.mubr.msk.f32.vlgmr.msra.gmra.mxu0 %vm2311_vm3, %v6244_v52  ;;  %11060 = vmatmul.mubr.msk.f32.vlgmr.msra.gmra.mxu1 %vm2311_vm3, %v6346_v6 }
 0x484   : > { %6479 = vmatprep.subr.mxu0 %v12803_v17  ;;  %6581 = vmatprep.subr.mxu1 %v12803_v17 }
 0x485   : > { %6480 = vmatpush1.msra.mxu0 %v12807_v30  ;;  %6582 = vmatpush1.msra.mxu1 %v12807_v30  ;;  %v9045_v27 = vpop.permute.xlu0 %9044 }
 0x486   : > { %6481 = vmatprep.subr.mxu0 %v12811_v54  ;;  %6583 = vmatprep.subr.mxu1 %v12811_v54 }
 0x487   : > { %6482 = vmatpush1.msra.mxu0 %v12815_v45  ;;  %6515 = vmatprep.mubr.f32.mxu0 %v13572_v43 }
 0x488   : > { %6584 = vmatpush1.msra.mxu1 %v12815_v45  ;;  %6617 = vmatprep.mubr.f32.mxu1 %v13572_v43 }
 0x489   : > { %11062 = vmatmul.mubr.msk.f32.vlgmr.msra.gmra.mxu0 %vm2311_vm3, %v6448_v38  ;;  %11064 = vmatmul.mubr.msk.f32.vlgmr.msra.gmra.mxu1 %vm2311_vm3, %v6550_v19  ;;  %v9388_v25 = vpop.permute.xlu0 %9387 }
 0x48a   : > { %6683 = vmatprep.subr.mxu0 %v12803_v17  ;;  %6785 = vmatprep.subr.mxu1 %v12803_v17 }
 0x48b   : > { %6684 = vmatpush1.msra.mxu0 %v12807_v30  ;;  %6786 = vmatpush1.msra.mxu1 %v12807_v30 }
 0x48c   : > { %6685 = vmatprep.subr.mxu0 %v12811_v54  ;;  %6787 = vmatprep.subr.mxu1 %v12811_v54 }
 0x48d   : > { %6686 = vmatpush1.msra.mxu0 %v12815_v45  ;;  %6719 = vmatprep.mubr.f32.mxu0 %v13572_v43  ;;  %v9592_v11 = vpop.permute.xlu0 %9591 }
 0x48e   : > { %6788 = vmatpush1.msra.mxu1 %v12815_v45  ;;  %6821 = vmatprep.mubr.f32.mxu1 %v13572_v43 }
 0x48f   : > { %11066 = vmatmul.mubr.msk.f32.vlgmr.msra.gmra.mxu0 %vm2311_vm3, %v11264_v53  ;;  %11068 = vmatmul.mubr.msk.f32.vlgmr.msra.gmra.mxu1 %vm2311_vm3, %v6754_v14 }
 0x490   : > { %6887 = vmatprep.subr.mxu0 %v12803_v17  ;;  %6989 = vmatprep.subr.mxu1 %v12803_v17 }
 0x491   : > { %6888 = vmatpush1.msra.mxu0 %v12807_v30  ;;  %6990 = vmatpush1.msra.mxu1 %v12807_v30  ;;  %v9796_v1 = vpop.permute.xlu0 %9795 }
 0x492   : > { %6889 = vmatprep.subr.mxu0 %v12811_v54  ;;  %6991 = vmatprep.subr.mxu1 %v12811_v54 }
 0x493   : > { %6890 = vmatpush1.msra.mxu0 %v12815_v45  ;;  %6923 = vmatprep.mubr.f32.mxu0 %v13572_v43 }
 0x494   : > { %6992 = vmatpush1.msra.mxu1 %v12815_v45  ;;  %7025 = vmatprep.mubr.f32.mxu1 %v13572_v43 }
 0x495   : > { %11070 = vmatmul.mubr.msk.f32.vlgmr.msra.gmra.mxu0 %vm2311_vm3, %v6856_v22  ;;  %11072 = vmatmul.mubr.msk.f32.vlgmr.msra.gmra.mxu1 %vm2311_vm3, %v6958_v34  ;;  %v11265_v22 = vld [vmem:[%s11717_s12 + $0x10] sm:$0xff] }
 0x496   : > { %7091 = vmatprep.subr.mxu0 %v12803_v17  ;;  %7193 = vmatprep.subr.mxu1 %v12803_v17 }
 0x497   : > { %7092 = vmatpush1.msra.mxu0 %v12807_v30  ;;  %7194 = vmatpush1.msra.mxu1 %v12807_v30 }
 0x498   : > { %7093 = vmatprep.subr.mxu0 %v12811_v54  ;;  %7195 = vmatprep.subr.mxu1 %v12811_v54 }
 0x499   : > { %7094 = vmatpush1.msra.mxu0 %v12815_v45  ;;  %7127 = vmatprep.mubr.f32.mxu0 %v13572_v43 }
 0x49a   : > { %7196 = vmatpush1.msra.mxu1 %v12815_v45  ;;  %7229 = vmatprep.mubr.f32.mxu1 %v13572_v43 }
 0x49b   : > { %11074 = vmatmul.mubr.msk.f32.vlgmr.msra.gmra.mxu0 %vm2311_vm3, %v7060_v13  ;;  %11076 = vmatmul.mubr.msk.f32.vlgmr.msra.gmra.mxu1 %vm2311_vm3, %v7162_v26  ;;  %v10102_v26 = vpop.permute.xlu0 %10101  ;;  %v11266_v13 = vld [vmem:[%s11717_s12 + $0x18] sm:$0xff]  ;;  %s13321_s12 = scalar_lea.vmem [#allocation12], %s10963_s27  ;;  %s11150_s27 = sshll.u32 %s11580_s19, 9 }
 0x49c   : > { %7295 = vmatprep.subr.mxu0 %v12803_v17  ;;  %7397 = vmatprep.subr.mxu1 %v12803_v17  ;;  %v8535_v17 = vpop.permute.xlu1 %8534  ;;  %s10832_s17 = sshll.u32 %s13321_s12, 4  ;;  %s10830_s18 = scalar_lea.hbm %s13517_s10, %s11150_s27  ;;  %s10833_s17 = int_to_ptr.vmem [resolvable:$true] %s10832_s17 }
 0x49d   : > { %7296 = vmatpush1.msra.mxu0 %v12807_v30  ;;  %7398 = vmatpush1.msra.mxu1 %v12807_v30  ;;  %v9171_v30 = vsub.f32 %v9167_v49, %v12664_v37  ;;  %v9174_v37 = vand.u32 2147483647, %v9170_v12  ;;  %s11399_s2 = scalar_lea.vmem %s10833_s17, 512  ;;  %s11403_s19 = sshll.u32 %s11503_s20, 4  ;;  %s11404_s19 = int_to_ptr.vmem [resolvable:$false] %s11403_s19 }
 0x49e   : > { %7297 = vmatprep.subr.mxu0 %v12811_v54  ;;  %7399 = vmatprep.subr.mxu1 %v12811_v54  ;;  %v9169_v54 = vsub.f32 %v9167_v49, %v12671_v36  ;;  %p11400_p7 = scmp.ne.s32.totalorder %s10833_s17, %s11399_s2  ;;  %s11405_s30 = scalar_lea.vmem %s11404_s19, 1024 }
 0x49f   : > { %7298 = vmatpush1.msra.mxu0 %v12815_v45  ;;  %7331 = vmatprep.mubr.f32.mxu0 %v13572_v43  ;;  %v9175_v44 = vand.u32 2147483647, %v9171_v30  ;;  %v9178_v6 = vsub.f32 1.0, %v9174_v37  ;;  %v10306_v40 = vpop.permute.xlu0 %10305  ;;  %p11406_p2 = scmp.lt.s32.totalorder %s10833_s17, %s11404_s19  ;;  %p11407_p9 = scmp.lt.s32.totalorder %s11405_s30, %s11399_s2 }
 0x4a0   : > { %7400 = vmatpush1.msra.mxu1 %v12815_v45  ;;  %7433 = vmatprep.mubr.f32.mxu1 %v13572_v43  ;;  %v9168_v45 = vsub.f32 %v9163_v5, %v12671_v36  ;;  %v8739_v57 = vpop.permute.xlu1 %8738  ;;  %v9173_v47 = vand.u32 2147483647, %v9169_v54  ;;  %v11034_v5 = vadd.f32 -7.0, %v12662_v51  ;;  %p11401_p0 = pnand %p11400_p7, %p13586_p10 }
 0x4a1   : > { %11078 = vmatmul.mubr.msk.f32.vlgmr.msra.gmra.mxu0 %vm2311_vm3, %v7264_v29  ;;  %11080 = vmatmul.mubr.msk.f32.vlgmr.msra.gmra.mxu1 %vm2311_vm3, %v7366_v0  ;;  %v9179_v52 = vsub.f32 1.0, %v9175_v44  ;;  %v13039_v53 = vmax.f32 %v9178_v6, 0.0  ;;  %v4242_v0 = vand.u32 2147483647, %v12662_v51  ;;  %v4344_v29 = vand.u32 2147483647, %v11022_v9  ;;  %p11408_p11 = por %p11407_p9, %p11406_p2 }
 0x4a2   : > { %7547 = vmatprep.subr.mxu0 %v12919_v21  ;;  %7648 = vmatprep.subr.mxu1 %v12919_v21  ;;  %v9172_v36 = vand.u32 2147483647, %v9168_v45  ;;  %v9177_v38 = vsub.f32 1.0, %v9173_v47  ;;  %p11402_p12 = pneg %p11401_p0 }
 0x4a3   : > { %7548 = vmatpush1.msra.mxu0 %v12923_v59  ;;  %7649 = vmatpush1.msra.mxu1 %v12923_v59  ;;  %v13035_v14 = vmax.f32 %v9179_v52, 0.0  ;;  %v10510_v48 = vpop.permute.xlu0 %10509  ;;  %v4956_v52 = vand.u32 2147483647, %v11034_v5 }
 0x4a4   : > { %7549 = vmatprep.subr.mxu0 %v12927_v2  ;;  %7650 = vmatprep.subr.mxu1 %v12927_v2  ;;  %v9176_v19 = vsub.f32 1.0, %v9172_v36  ;;  %v8943_v15 = vpop.permute.xlu1 %8942  ;;  %v13043_v46 = vmax.f32 %v9177_v38, 0.0  ;;  %p11409_p13 = pnand %p11408_p11, %p11402_p12 }
 0x4a5   : > { %7550 = vmatpush1.msra.mxu0 %v12931_v18  ;;  %7583 = vmatprep.mubr.f32.mxu0 %v13572_v43 }
 0x4a6   : > { %7651 = vmatpush1.msra.mxu1 %v12931_v18  ;;  %7684 = vmatprep.mubr.f32.mxu1 %v13572_v43  ;;  %v13047_v58 = vmax.f32 %v9176_v19, 0.0 }
 0x4a7   : > { %11082 = vmatmul.mubr.msk.f32.vlgmr.msra.gmra.mxu0 %vm2311_vm3, %v13583_v8  ;;  %11083 = vmatmul.mubr.msk.f32.vlgmr.msra.gmra.mxu1 %vm2311_vm3, %v7617_v42  ;;  %v11028_v8 = vadd.f32 -4.0, %v12662_v51 }
 0x4a8   : > { %7750 = vmatprep.subr.mxu0 %v12919_v21  ;;  %7852 = vmatprep.subr.mxu1 %v12919_v21  ;;  %v9286_v34 = vpop.permute.xlu1 %9285 }
 0x4a9   : > { %7751 = vmatpush1.msra.mxu0 %v12923_v59  ;;  %7853 = vmatpush1.msra.mxu1 %v12923_v59  ;;  %v4650_v24 = vand.u32 2147483647, %v11028_v8 }
 0x4aa   : > { %7752 = vmatprep.subr.mxu0 %v12927_v2  ;;  %7854 = vmatprep.subr.mxu1 %v12927_v2 }
 0x4ab   : > { %7753 = vmatpush1.msra.mxu0 %v12931_v18  ;;  %7786 = vmatprep.mubr.f32.mxu0 %v13572_v43  ;;  %v4651_v54 = vsub.f32 1.0, %v4650_v24 }
 0x4ac   : > { %7855 = vmatpush1.msra.mxu1 %v12931_v18  ;;  %7888 = vmatprep.mubr.f32.mxu1 %v13572_v43  ;;  %v9490_v4 = vpop.permute.xlu1 %9489 }
 0x4ad   : > { %11085 = vmatmul.mubr.msk.f32.vlgmr.msra.gmra.mxu0 %vm2311_vm3, %v7719_v50  ;;  %11087 = vmatmul.mubr.msk.f32.vlgmr.msra.gmra.mxu1 %vm2311_vm3, %v7821_v16  ;;  %v10714_v16 = vpop.permute.xlu0 %10713 }
 0x4ae   : > { %7954 = vmatprep.subr.mxu0 %v12919_v21  ;;  %8056 = vmatprep.subr.mxu1 %v12919_v21 }
 0x4af   : > { %7955 = vmatpush1.msra.mxu0 %v12923_v59  ;;  %8057 = vmatpush1.msra.mxu1 %v12923_v59 }
 0x4b0   : > { %7956 = vmatprep.subr.mxu0 %v12927_v2  ;;  %8058 = vmatprep.subr.mxu1 %v12927_v2  ;;  %v9694_v10 = vpop.permute.xlu1 %9693 }
 0x4b1   : > { %7957 = vmatpush1.msra.mxu0 %v12931_v18  ;;  %7990 = vmatprep.mubr.f32.mxu0 %v13572_v43 }
 0x4b2   : > { %8059 = vmatpush1.msra.mxu1 %v12931_v18  ;;  %8092 = vmatprep.mubr.f32.mxu1 %v13572_v43 }
 0x4b3   : > { %11089 = vmatmul.mubr.msk.f32.vlgmr.msra.gmra.mxu0 %vm2311_vm3, %v7923_v28  ;;  %11091 = vmatmul.mubr.msk.f32.vlgmr.msra.gmra.mxu1 %vm2311_vm3, %v8025_v39  ;;  %v11030_v28 = vadd.f32 -5.0, %v12662_v51 }
 0x4b4   : > { %8158 = vmatprep.subr.mxu0 %v12919_v21  ;;  %8260 = vmatprep.subr.mxu1 %v12919_v21  ;;  %v9898_v63 = vpop.permute.xlu1 %9897 }
 0x4b5   : > { %8159 = vmatpush1.msra.mxu0 %v12923_v59  ;;  %8261 = vmatpush1.msra.mxu1 %v12923_v59 }
 0x4b6   : > { %8160 = vmatprep.subr.mxu0 %v12927_v2  ;;  %8262 = vmatprep.subr.mxu1 %v12927_v2 }
 0x4b7   : > { %8161 = vmatpush1.msra.mxu0 %v12931_v18  ;;  %8194 = vmatprep.mubr.f32.mxu0 %v13572_v43 }
 0x4b8   : > { %8263 = vmatpush1.msra.mxu1 %v12931_v18  ;;  %8296 = vmatprep.mubr.f32.mxu1 %v13572_v43  ;;  %v10204_v7 = vpop.permute.xlu1 %10203 }
 0x4b9   : > { %11093 = vmatmul.mubr.msk.f32.vlgmr.msra.gmra.mxu0 %vm2311_vm3, %v8127_v35  ;;  %11095 = vmatmul.mubr.msk.f32.vlgmr.msra.gmra.mxu1 %vm2311_vm3, %v8229_v55 }
 0x4ba   : > { %8362 = vmatprep.subr.mxu0 %v12919_v21  ;;  %8464 = vmatprep.subr.mxu1 %v12919_v21 }
 0x4bb   : > { %8363 = vmatpush1.msra.mxu0 %v12923_v59  ;;  %8465 = vmatpush1.msra.mxu1 %v12923_v59 }
 0x4bc   : > { %8364 = vmatprep.subr.mxu0 %v12927_v2  ;;  %8466 = vmatprep.subr.mxu1 %v12927_v2  ;;  %v10408_v60 = vpop.permute.xlu1 %10407 }
 0x4bd   : > { %8365 = vmatpush1.msra.mxu0 %v12931_v18  ;;  %8398 = vmatprep.mubr.f32.mxu0 %v13572_v43 }
 0x4be   : > { %8467 = vmatpush1.msra.mxu1 %v12931_v18  ;;  %8500 = vmatprep.mubr.f32.mxu1 %v13572_v43 }
 0x4bf   : > { %11097 = vmatmul.mubr.msk.f32.vlgmr.msra.gmra.mxu0 %vm2311_vm3, %v13584_v41  ;;  %11099 = vmatmul.mubr.msk.f32.vlgmr.msra.gmra.mxu1 %vm2311_vm3, %v8433_v3  ;;  %v11032_v3 = vadd.f32 -6.0, %v12662_v51  ;;  %v4752_v41 = vand.u32 2147483647, %v11030_v28 }
 0x4c0   : > { %8566 = vmatprep.subr.mxu0 %v12919_v21  ;;  %8668 = vmatprep.subr.mxu1 %v12919_v21  ;;  %v10612_v50 = vpop.permute.xlu1 %10611 }
 0x4c1   : > { %8567 = vmatpush1.msra.mxu0 %v12923_v59  ;;  %8669 = vmatpush1.msra.mxu1 %v12923_v59  ;;  %v4854_v45 = vand.u32 2147483647, %v11032_v3  ;;  %v4753_v37 = vsub.f32 1.0, %v4752_v41 }
 0x4c2   : > { %8568 = vmatprep.subr.mxu0 %v12927_v2  ;;  %8670 = vmatprep.subr.mxu1 %v12927_v2 }
 0x4c3   : > { %8569 = vmatpush1.msra.mxu0 %v12931_v18  ;;  %8602 = vmatprep.mubr.f32.mxu0 %v13572_v43 }
 0x4c4   : > { %8671 = vmatpush1.msra.mxu1 %v12931_v18  ;;  %8704 = vmatprep.mubr.f32.mxu1 %v13572_v43 }
 0x4c5   : > { %11101 = vmatmul.mubr.msk.f32.vlgmr.msra.gmra.mxu0 %vm2311_vm3, %v8535_v17  ;;  %11103 = vmatmul.mubr.msk.f32.vlgmr.msra.gmra.mxu1 %vm2311_vm3, %v8637_v20  ;;  %v13585_v20 = vld [vmem:[#allocation20_spill] sm:$0xff] }
 0x4c6   : > { %8770 = vmatprep.subr.mxu0 %v12919_v21  ;;  %8872 = vmatprep.subr.mxu1 %v12919_v21 }
 0x4c7   : > { %8771 = vmatpush1.msra.mxu0 %v12923_v59  ;;  %8873 = vmatpush1.msra.mxu1 %v12923_v59 }
 0x4c8   : > { %8772 = vmatprep.subr.mxu0 %v12927_v2  ;;  %8874 = vmatprep.subr.mxu1 %v12927_v2 }
 0x4c9   : > { %8773 = vmatpush1.msra.mxu0 %v12931_v18  ;;  %8806 = vmatprep.mubr.f32.mxu0 %v13572_v43 }
 0x4ca   : > { %8875 = vmatpush1.msra.mxu1 %v12931_v18  ;;  %8908 = vmatprep.mubr.f32.mxu1 %v13572_v43 }
 0x4cb   : > { %11105 = vmatmul.mubr.msk.f32.vlgmr.msra.gmra.mxu0 %vm2311_vm3, %v8739_v57  ;;  %11107 = vmatmul.mubr.msk.f32.vlgmr.msra.gmra.mxu1 %vm2311_vm3, %v8841_v31 }
 0x4cc   : > { %8974 = vmatprep.subr.mxu0 %v12919_v21  ;;  %9076 = vmatprep.subr.mxu1 %v12919_v21  ;;  %v11026_v21 = vadd.f32 -3.0, %v12662_v51 }
 0x4cd   : > { %8975 = vmatpush1.msra.mxu0 %v12923_v59  ;;  %9077 = vmatpush1.msra.mxu1 %v12923_v59  ;;  %v4446_v59 = vand.u32 2147483647, %v11024_v56 }
 0x4ce   : > { %8976 = vmatprep.subr.mxu0 %v12927_v2  ;;  %9078 = vmatprep.subr.mxu1 %v12927_v2  ;;  %v4243_v2 = vsub.f32 1.0, %v4242_v0  ;;  %v4548_v42 = vand.u32 2147483647, %v11026_v21 }
 0x4cf   : > { %8977 = vmatpush1.msra.mxu0 %v12931_v18  ;;  %9010 = vmatprep.mubr.f32.mxu0 %v13572_v43  ;;  %v4447_v39 = vsub.f32 1.0, %v4446_v59 }
 0x4d0   : > { %9079 = vmatpush1.msra.mxu1 %v12931_v18  ;;  %9112 = vmatprep.mubr.f32.mxu1 %v13572_v43  ;;  %v4345_v18 = vsub.f32 1.0, %v4344_v29  ;;  %v4244_v35 = vmax.f32 %v4243_v2, 0.0  ;;  %v4549_v61 = vsub.f32 1.0, %v4548_v42 }
 0x4d1   : > { %11109 = vmatmul.mubr.msk.f32.vlgmr.msra.gmra.mxu0 %vm2311_vm3, %v8943_v15  ;;  %11111 = vmatmul.mubr.msk.f32.vlgmr.msra.gmra.mxu1 %vm2311_vm3, %v9045_v27  ;;  %v4448_v49 = vmax.f32 %v4447_v39, 0.0  ;;  %v11040_v39 = vadd.f32 -10.0, %v12662_v51 }
 0x4d2   : > { %9216 = vmatprep.subr.mxu0 %v13035_v14  ;;  %9317 = vmatprep.subr.mxu1 %v13035_v14  ;;  %v4346_v55 = vmax.f32 %v4345_v18, 0.0  ;;  %v4249_v17 = vrot.slane %v4244_v35, %v13585_v20  ;;  %v4550_v12 = vmax.f32 %v4549_v61, 0.0 }
 0x4d3   : > { %9217 = vmatpush1.msra.mxu0 %v13039_v53  ;;  %9318 = vmatpush1.msra.mxu1 %v13039_v53  ;;  %v4453_v47 = vrot.slane %v4448_v49, %v13585_v20  ;;  %v4457_v36 = vrot.slane %v4448_v49, %v12457_v33 }
 0x4d4   : > { %9218 = vmatprep.subr.mxu0 %v13043_v46  ;;  %9319 = vmatprep.subr.mxu1 %v13043_v46  ;;  %v4351_v30 = vrot.slane %v4346_v55, %v13585_v20  ;;  %v4355_v44 = vrot.slane %v4346_v55, %v12457_v33  ;;  %v4259_v6 = vrot.slane %v4249_v17, %v13585_v20 }
 0x4d5   : > { %9219 = vmatpush1.msra.mxu0 %v13047_v58  ;;  %9252 = vmatprep.mubr.f32.mxu0 %v13572_v43  ;;  %v4555_v19 = vrot.slane %v4550_v12, %v13585_v20  ;;  %v4559_v27 = vrot.slane %v4550_v12, %v12457_v33 }
 0x4d6   : > { %9320 = vmatpush1.msra.mxu1 %v13047_v58  ;;  %9353 = vmatprep.mubr.f32.mxu1 %v13572_v43  ;;  %v4361_v38 = vrot.slane %v4351_v30, %v13585_v20 }
 0x4d7   : > { %11113 = vmatmul.mubr.msk.f32.vlgmr.msra.gmra.mxu0 %vm2311_vm3, %v11265_v22  ;;  %11114 = vmatmul.mubr.msk.f32.vlgmr.msra.gmra.mxu1 %vm2311_vm3, %v9286_v34  ;;  %v11036_v34 = vadd.f32 -8.0, %v12662_v51  ;;  %v4569_v9 = vrot.slane %v4559_v27, %v13585_v20 }
 0x4d8   : > { %9419 = vmatprep.subr.mxu0 %v13035_v14  ;;  %9521 = vmatprep.subr.mxu1 %v13035_v14 }
 0x4d9   : > { %9420 = vmatpush1.msra.mxu0 %v13039_v53  ;;  %9522 = vmatpush1.msra.mxu1 %v13039_v53  ;;  %v5058_v21 = vand.u32 2147483647, %v11036_v34 }
 0x4da   : > { %9421 = vmatprep.subr.mxu0 %v13043_v46  ;;  %9523 = vmatprep.subr.mxu1 %v13043_v46 }
 0x4db   : > { %9422 = vmatpush1.msra.mxu0 %v13047_v58  ;;  %9455 = vmatprep.mubr.f32.mxu0 %v13572_v43 }
 0x4dc   : > { %9524 = vmatpush1.msra.mxu1 %v13047_v58  ;;  %9557 = vmatprep.mubr.f32.mxu1 %v13572_v43 }
 0x4dd   : > { %11116 = vmatmul.mubr.msk.f32.vlgmr.msra.gmra.mxu0 %vm2311_vm3, %v9388_v25  ;;  %11118 = vmatmul.mubr.msk.f32.vlgmr.msra.gmra.mxu1 %vm2311_vm3, %v9490_v4  ;;  %v4365_v25 = vrot.slane %v4355_v44, %v13585_v20 }
 0x4de   : > { %9623 = vmatprep.subr.mxu0 %v13035_v14  ;;  %9725 = vmatprep.subr.mxu1 %v13035_v14 }
 0x4df   : > { %9624 = vmatpush1.msra.mxu0 %v13039_v53  ;;  %9726 = vmatpush1.msra.mxu1 %v13039_v53 }
 0x4e0   : > { %9625 = vmatprep.subr.mxu0 %v13043_v46  ;;  %9727 = vmatprep.subr.mxu1 %v13043_v46 }
 0x4e1   : > { %9626 = vmatpush1.msra.mxu0 %v13047_v58  ;;  %9659 = vmatprep.mubr.f32.mxu0 %v13572_v43 }
 0x4e2   : > { %9728 = vmatpush1.msra.mxu1 %v13047_v58  ;;  %9761 = vmatprep.mubr.f32.mxu1 %v13572_v43 }
 0x4e3   : > { %11120 = vmatmul.mubr.msk.f32.vlgmr.msra.gmra.mxu0 %vm2311_vm3, %v9592_v11  ;;  %11122 = vmatmul.mubr.msk.f32.vlgmr.msra.gmra.mxu1 %vm2311_vm3, %v9694_v10  ;;  %v4754_v10 = vmax.f32 %v4753_v37, 0.0  ;;  %v4463_v11 = vrot.slane %v4453_v47, %v13585_v20 }
 0x4e4   : > { %9827 = vmatprep.subr.mxu0 %v13035_v14  ;;  %9929 = vmatprep.subr.mxu1 %v13035_v14 }
 0x4e5   : > { %9828 = vmatpush1.msra.mxu0 %v13039_v53  ;;  %9930 = vmatpush1.msra.mxu1 %v13039_v53  ;;  %v4759_v18 = vrot.slane %v4754_v10, %v13585_v20  ;;  %v4763_v42 = vrot.slane %v4754_v10, %v12457_v33 }
 0x4e6   : > { %9829 = vmatprep.subr.mxu0 %v13043_v46  ;;  %9931 = vmatprep.subr.mxu1 %v13043_v46 }
 0x4e7   : > { %9830 = vmatpush1.msra.mxu0 %v13047_v58  ;;  %9863 = vmatprep.mubr.f32.mxu0 %v13572_v43  ;;  %v4769_v44 = vrot.slane %v4759_v18, %v13585_v20 }
 0x4e8   : > { %9932 = vmatpush1.msra.mxu1 %v13047_v58  ;;  %9965 = vmatprep.mubr.f32.mxu1 %v13572_v43 }
 0x4e9   : > { %11124 = vmatmul.mubr.msk.f32.vlgmr.msra.gmra.mxu0 %vm2311_vm3, %v9796_v1  ;;  %11126 = vmatmul.mubr.msk.f32.vlgmr.msra.gmra.mxu1 %vm2311_vm3, %v9898_v63  ;;  %v4467_v63 = vrot.slane %v4457_v36, %v13585_v20  ;;  %v4957_v1 = vsub.f32 1.0, %v4956_v52  ;;  %v4773_v52 = vrot.slane %v4763_v42, %v13585_v20 }
 0x4ea   : > { %10031 = vmatprep.subr.mxu0 %v13035_v14  ;;  %10133 = vmatprep.subr.mxu1 %v13035_v14 }
 0x4eb   : > { %10032 = vmatpush1.msra.mxu0 %v13039_v53  ;;  %10134 = vmatpush1.msra.mxu1 %v13039_v53 }
 0x4ec   : > { %10033 = vmatprep.subr.mxu0 %v13043_v46  ;;  %10135 = vmatprep.subr.mxu1 %v13043_v46 }
 0x4ed   : > { %10034 = vmatpush1.msra.mxu0 %v13047_v58  ;;  %10067 = vmatprep.mubr.f32.mxu0 %v13572_v43 }
 0x4ee   : > { %10136 = vmatpush1.msra.mxu1 %v13047_v58  ;;  %10169 = vmatprep.mubr.f32.mxu1 %v13572_v43 }
 0x4ef   : > { %11128 = vmatmul.mubr.msk.f32.vlgmr.msra.gmra.mxu0 %vm2311_vm3, %v11266_v13  ;;  %11130 = vmatmul.mubr.msk.f32.vlgmr.msra.gmra.mxu1 %vm2311_vm3, %v10102_v26  ;;  %v11038_v26 = vadd.f32 -9.0, %v12662_v51 }
 0x4f0   : > { %10235 = vmatprep.subr.mxu0 %v13035_v14  ;;  %10337 = vmatprep.subr.mxu1 %v13035_v14 }
 0x4f1   : > { %10236 = vmatpush1.msra.mxu0 %v13039_v53  ;;  %10338 = vmatpush1.msra.mxu1 %v13039_v53  ;;  %v5160_v28 = vand.u32 2147483647, %v11038_v26 }
 0x4f2   : > { %10237 = vmatprep.subr.mxu0 %v13043_v46  ;;  %10339 = vmatprep.subr.mxu1 %v13043_v46 }
 0x4f3   : > { %10238 = vmatpush1.msra.mxu0 %v13047_v58  ;;  %10271 = vmatprep.mubr.f32.mxu0 %v13572_v43  ;;  %v5161_v37 = vsub.f32 1.0, %v5160_v28 }
 0x4f4   : > { %10340 = vmatpush1.msra.mxu1 %v13047_v58  ;;  %10373 = vmatprep.mubr.f32.mxu1 %v13572_v43 }
 0x4f5   : > { %11132 = vmatmul.mubr.msk.f32.vlgmr.msra.gmra.mxu0 %vm2311_vm3, %v10204_v7  ;;  %11134 = vmatmul.mubr.msk.f32.vlgmr.msra.gmra.mxu1 %vm2311_vm3, %v10306_v40  ;;  %v4565_v40 = vrot.slane %v4555_v19, %v13585_v20 }
 0x4f6   : > { %10439 = vmatprep.subr.mxu0 %v13035_v14  ;;  %10541 = vmatprep.subr.mxu1 %v13035_v14 }
 0x4f7   : > { %10440 = vmatpush1.msra.mxu0 %v13039_v53  ;;  %10542 = vmatpush1.msra.mxu1 %v13039_v53 }
 0x4f8   : > { %10441 = vmatprep.subr.mxu0 %v13043_v46  ;;  %10543 = vmatprep.subr.mxu1 %v13043_v46 }
 0x4f9   : > { %10442 = vmatpush1.msra.mxu0 %v13047_v58  ;;  %10475 = vmatprep.mubr.f32.mxu0 %v13572_v43 }
 0x4fa   : > { %10544 = vmatpush1.msra.mxu1 %v13047_v58  ;;  %10577 = vmatprep.mubr.f32.mxu1 %v13572_v43 }
 0x4fb   : > { %11136 = vmatmul.mubr.msk.f32.vlgmr.msra.gmra.mxu0 %vm2311_vm3, %v10408_v60  ;;  %11138 = vmatmul.mubr.msk.f32.vlgmr.msra.gmra.mxu1 %vm2311_vm3, %v10510_v48 }
 0x4fc   : > { %10643 = vmatprep.subr.mxu0 %v13035_v14  ;;  %10745 = vmatprep.subr.mxu1 %v13035_v14 }
 0x4fd   : > { %10644 = vmatpush1.msra.mxu0 %v13039_v53  ;;  %10746 = vmatpush1.msra.mxu1 %v13039_v53 }
 0x4fe   : > { %10645 = vmatprep.subr.mxu0 %v13043_v46  ;;  %10747 = vmatprep.subr.mxu1 %v13043_v46  ;;  %v4652_v46 = vmax.f32 %v4651_v54, 0.0 }
 0x4ff   : > { %10646 = vmatpush1.msra.mxu0 %v13047_v58  ;;  %10679 = vmatprep.mubr.f32.mxu0 %v13572_v43 }
 0x500   : > { %10748 = vmatpush1.msra.mxu1 %v13047_v58  ;;  %10781 = vmatprep.mubr.f32.mxu1 %v13572_v43  ;;  %v4253_v43 = vrot.slane %v4244_v35, %v12457_v33  ;;  %v4855_v58 = vsub.f32 1.0, %v4854_v45  ;;  %v4657_v48 = vrot.slane %v4652_v46, %v13585_v20  ;;  %v4661_v0 = vrot.slane %v4652_v46, %v12457_v33 }
 0x501   : > { %11140 = vmatmul.mubr.msk.f32.vlgmr.msra.gmra.mxu0 %vm2311_vm3, %v10612_v50  ;;  %11142 = vmatmul.mubr.msk.f32.vlgmr.msra.gmra.mxu1 %vm2311_vm3, %v10714_v16  ;;  %v4958_v16 = vmax.f32 %v4957_v1, 0.0  ;;  %v11042_v35 = vadd.f32 -11.0, %v12662_v51 }
 0x502   : > { %v4263_v14 = vrot.slane %v4253_v43, %v13585_v20  ;;  %v4856_v29 = vmax.f32 %v4855_v58, 0.0  ;;  %v4667_v41 = vrot.slane %v4657_v48, %v13585_v20  ;;  %v4671_v49 = vrot.slane %v4661_v0, %v13585_v20 }
 0x503   : > { %v5059_v43 = vsub.f32 1.0, %v5058_v21 }
 0x504   : > { %v4861_v5 = vrot.slane %v4856_v29, %v13585_v20  ;;  %v4865_v27 = vrot.slane %v4856_v29, %v12457_v33 }
 0x506   : > { %v4871_v26 = vrot.slane %v4861_v5, %v13585_v20 }
 0x507   : > { %v4237_v31 = vpop.f32.mrf.mxu0  ;;  %v4338_v57 = vpop.f32.mrf.mxu1 }
 0x508   : > { %v4264_v22 = vmul.f32 %v4259_v6, %v4237_v31  ;;  %v4366_v4 = vmul.f32 %v4361_v38, %v4338_v57  ;;  %v5262_v31 = vand.u32 2147483647, %v11040_v39  ;;  %v5364_v57 = vand.u32 2147483647, %v11042_v35 }
 0x509   : > { %v4239_v15 = vpop.f32.mrf.mxu0  ;;  %v4340_v53 = vpop.f32.mrf.mxu1  ;;  %v4963_v6 = vrot.slane %v4958_v16, %v13585_v20  ;;  %v11048_v35 = vadd.f32 -14.0, %v12662_v51 }
 0x50a   : > { %v4265_v13 = vmul.f32 %v4263_v14, %v4239_v15  ;;  %v4367_v7 = vmul.f32 %v4365_v25, %v4340_v53  ;;  %v4368_v59 = vadd.f32 %v4366_v4, %v4264_v22  ;;  %v4967_v15 = vrot.slane %v4958_v16, %v12457_v33 }
 0x50b   : > { %v11044_v14 = vadd.f32 -12.0, %v12662_v51  ;;  %v11046_v53 = vadd.f32 -13.0, %v12662_v51  ;;  %v5060_v22 = vmax.f32 %v5059_v43, 0.0  ;;  %v5162_v4 = vmax.f32 %v5161_v37, 0.0 }
 0x50c   : > { %v4369_v55 = vadd.f32 %v4367_v7, %v4265_v13  ;;  %v5263_v25 = vsub.f32 1.0, %v5262_v31  ;;  %v5365_v10 = vsub.f32 1.0, %v5364_v57  ;;  %v4977_v29 = vrot.slane %v4967_v15, %v13585_v20 }
 0x50d   : > { %v4440_v56 = vpop.f32.mrf.mxu0  ;;  %v4542_v60 = vpop.f32.mrf.mxu1  ;;  %v5065_v21 = vrot.slane %v5060_v22, %v13585_v20  ;;  %v5167_v18 = vrot.slane %v5162_v4, %v13585_v20  ;;  %v5069_v42 = vrot.slane %v5060_v22, %v12457_v33  ;;  %v11053_v22 = vadd.f32 -1.0, %v12733_v23 }
 0x50e   : > { %v4468_v2 = vmul.f32 %v4463_v11, %v4440_v56  ;;  %v4570_v24 = vmul.f32 %v4565_v40, %v4542_v60  ;;  %v4973_v40 = vrot.slane %v4963_v6, %v13585_v20  ;;  %v5466_v56 = vand.u32 2147483647, %v11044_v14 }
 0x50f   : > { %v4442_v8 = vpop.f32.mrf.mxu0  ;;  %v4544_v50 = vpop.f32.mrf.mxu1  ;;  %v5568_v60 = vand.u32 2147483647, %v11046_v53  ;;  %v5079_v43 = vrot.slane %v5069_v42, %v13585_v20  ;;  %v5177_v57 = vrot.slane %v5167_v18, %v13585_v20  ;;  %v11057_v18 = vadd.f32 -3.0, %v12733_v23 }
 0x510   : > { %v4470_v61 = vadd.f32 %v4468_v2, %v4368_v59  ;;  %v4469_v3 = vmul.f32 %v4467_v63, %v4442_v8  ;;  %v4571_v12 = vmul.f32 %v4569_v9, %v4544_v50  ;;  %v4875_v9 = vrot.slane %v4865_v27, %v13585_v20 }
 0x511   : > { %v5264_v8 = vmax.f32 %v5263_v25, 0.0  ;;  %v5366_v50 = vmax.f32 %v5365_v10, 0.0 }
 0x512   : > { %v4572_v17 = vadd.f32 %v4570_v24, %v4470_v61  ;;  %v4471_v30 = vadd.f32 %v4469_v3, %v4369_v55  ;;  %v5171_v55 = vrot.slane %v5162_v4, %v12457_v33  ;;  %v5467_v61 = vsub.f32 1.0, %v5466_v56 }
 0x513   : > { %v4644_v54 = vpop.f32.mrf.mxu0  ;;  %v4746_v45 = vpop.f32.mrf.mxu1  ;;  %v5569_v24 = vsub.f32 1.0, %v5568_v60  ;;  %v11050_v3 = vadd.f32 -15.0, %v12662_v51  ;;  %v5670_v51 = vand.u32 2147483647, %v11048_v35  ;;  %v5375_v53 = vrot.slane %v5366_v50, %v12457_v33 }
 0x514   : > { %v4573_v47 = vadd.f32 %v4571_v12, %v4471_v30  ;;  %v4672_v36 = vmul.f32 %v4667_v41, %v4644_v54  ;;  %v4774_v58 = vmul.f32 %v4769_v44, %v4746_v45  ;;  %v5269_v54 = vrot.slane %v5264_v8, %v13585_v20 }
 0x515   : > { %v4646_v38 = vpop.f32.mrf.mxu0  ;;  %v4748_v19 = vpop.f32.mrf.mxu1  ;;  %v5371_v45 = vrot.slane %v5366_v50, %v13585_v20  ;;  %v5273_v44 = vrot.slane %v5264_v8, %v12457_v33  ;;  %v5468_v6 = vmax.f32 %v5467_v61, 0.0  ;;  %v5385_v60 = vrot.slane %v5375_v53, %v13585_v20 }
 0x516   : > { %v4674_v46 = vadd.f32 %v4672_v36, %v4572_v17  ;;  %v4673_v34 = vmul.f32 %v4671_v49, %v4646_v38  ;;  %v4775_v1 = vmul.f32 %v4773_v52, %v4748_v19  ;;  %v5075_v17 = vrot.slane %v5065_v21, %v13585_v20 }
 0x517   : > { %v5181_v52 = vrot.slane %v5171_v55, %v13585_v20  ;;  %v5570_v38 = vmax.f32 %v5569_v24, 0.0  ;;  %v5772_v19 = vand.u32 2147483647, %v11050_v3  ;;  %v5477_v21 = vrot.slane %v5468_v6, %v12457_v33 }
 0x518   : > { %v4776_v11 = vadd.f32 %v4774_v58, %v4674_v46  ;;  %v4675_v63 = vadd.f32 %v4673_v34, %v4573_v47  ;;  %v5279_v46 = vrot.slane %v5269_v54, %v13585_v20  ;;  %v5381_v58 = vrot.slane %v5371_v45, %v13585_v20 }
 0x519   : > { %v4848_v13 = vpop.f32.mrf.mxu0  ;;  %v4950_v7 = vpop.f32.mrf.mxu1  ;;  %v5283_v34 = vrot.slane %v5273_v44, %v13585_v20 }
 0x51a   : > { %v4777_v48 = vadd.f32 %v4775_v1, %v4675_v63  ;;  %v4876_v0 = vmul.f32 %v4871_v26, %v4848_v13  ;;  %v4978_v28 = vmul.f32 %v4973_v40, %v4950_v7  ;;  %v5473_v26 = vrot.slane %v5468_v6, %v13585_v20 }
 0x51b   : > { %v4850_v59 = vpop.f32.mrf.mxu0  ;;  %v4952_v2 = vpop.f32.mrf.mxu1  ;;  %v5773_v13 = vsub.f32 1.0, %v5772_v19  ;;  %v5911_v7 = vand.u32 2147483647, %v12733_v23  ;;  %v11055_v40 = vadd.f32 -2.0, %v12733_v23 }
 0x51c   : > { %v4878_v16 = vadd.f32 %v4876_v0, %v4776_v11  ;;  %v4877_v39 = vmul.f32 %v4875_v9, %v4850_v59  ;;  %v4979_v5 = vmul.f32 %v4977_v29, %v4952_v2  ;;  %v5671_v11 = vsub.f32 1.0, %v5670_v51 }
 0x51d   : > { %v5579_v59 = vrot.slane %v5570_v38, %v12457_v33  ;;  %v6013_v2 = vand.u32 2147483647, %v11053_v22  ;;  %v5912_v35 = vsub.f32 1.0, %v5911_v7  ;;  %v6115_v55 = vand.u32 2147483647, %v11055_v40 }
 0x51e   : > { %v4980_v41 = vadd.f32 %v4978_v28, %v4878_v16  ;;  %v4879_v49 = vadd.f32 %v4877_v39, %v4777_v48  ;;  %v5575_v48 = vrot.slane %v5570_v38, %v13585_v20  ;;  %v5672_v16 = vmax.f32 %v5671_v11, 0.0 }
 0x51f   : > { %v5052_v30 = vpop.f32.mrf.mxu0  ;;  %v5154_v12 = vpop.f32.mrf.mxu1  ;;  %v5483_v28 = vrot.slane %v5473_v26, %v13585_v20  ;;  %v5774_v39 = vmax.f32 %v5773_v13, 0.0  ;;  %v5589_v44 = vrot.slane %v5579_v59, %v13585_v20 }
 0x520   : > { %v4981_v37 = vadd.f32 %v4979_v5, %v4879_v49  ;;  %v5080_v31 = vmul.f32 %v5075_v17, %v5052_v30  ;;  %v5182_v15 = vmul.f32 %v5177_v57, %v5154_v12  ;;  %v5487_v17 = vrot.slane %v5477_v21, %v13585_v20 }
 0x521   : > { %v5054_v47 = vpop.f32.mrf.mxu0  ;;  %v5156_v36 = vpop.f32.mrf.mxu1  ;;  %v6014_v30 = vsub.f32 1.0, %v6013_v2  ;;  %v6217_v12 = vand.u32 2147483647, %v11057_v18  ;;  %v5779_v51 = vrot.slane %v5774_v39, %v13585_v20 }
 0x522   : > { %v5082_v27 = vadd.f32 %v5080_v31, %v4980_v41  ;;  %v5081_v14 = vmul.f32 %v5079_v43, %v5054_v47  ;;  %v5183_v10 = vmul.f32 %v5181_v52, %v5156_v36  ;;  %v5585_v41 = vrot.slane %v5575_v48, %v13585_v20 }
 0x523   : > { %v11059_v43 = vadd.f32 -4.0, %v12733_v23  ;;  %v5913_v47 = vmax.f32 %v5912_v35, 0.0  ;;  %v6116_v36 = vsub.f32 1.0, %v6115_v55  ;;  %v11061_v52 = vadd.f32 -5.0, %v12733_v23 }
 0x524   : > { %v5184_v4 = vadd.f32 %v5182_v15, %v5082_v27  ;;  %v5083_v25 = vadd.f32 %v5081_v14, %v4981_v37  ;;  %v5677_v37 = vrot.slane %v5672_v16, %v13585_v20  ;;  %v5681_v27 = vrot.slane %v5672_v16, %v12457_v33 }
 0x525   : > { %v5256_v63 = vpop.f32.mrf.mxu0  ;;  %v5358_v1 = vpop.f32.mrf.mxu1  ;;  %v5783_v15 = vrot.slane %v5774_v39, %v12457_v33  ;;  %v6015_v14 = vmax.f32 %v6014_v30, 0.0  ;;  %v6218_v53 = vsub.f32 1.0, %v6217_v12  ;;  %v5918_v11 = vrot.slane %v5913_v47, %v13585_v20 }
 0x526   : > { %v5185_v9 = vadd.f32 %v5183_v10, %v5083_v25  ;;  %v5284_v56 = vmul.f32 %v5279_v46, %v5256_v63  ;;  %v5386_v8 = vmul.f32 %v5381_v58, %v5358_v1  ;;  %v6319_v46 = vand.u32 2147483647, %v11059_v43 }
 0x527   : > { %v5258_v0 = vpop.f32.mrf.mxu0  ;;  %v5360_v29 = vpop.f32.mrf.mxu1  ;;  %v5922_v63 = vrot.slane %v5913_v47, %v12457_v33  ;;  %v6117_v1 = vmax.f32 %v6116_v36, 0.0  ;;  %v6421_v26 = vand.u32 2147483647, %v11061_v52  ;;  %v5789_v40 = vrot.slane %v5779_v51, %v13585_v20 }
 0x528   : > { %v5286_v42 = vadd.f32 %v5284_v56, %v5184_v4  ;;  %v5285_v50 = vmul.f32 %v5283_v34, %v5258_v0  ;;  %v5387_v3 = vmul.f32 %v5385_v60, %v5360_v29  ;;  %v5687_v4 = vrot.slane %v5677_v37, %v13585_v20 }
 0x529   : > { %v5793_v48 = vrot.slane %v5783_v15, %v13585_v20  ;;  %v6020_v0 = vrot.slane %v6015_v14, %v13585_v20  ;;  %v6024_v29 = vrot.slane %v6015_v14, %v12457_v33  ;;  %v6219_v21 = vmax.f32 %v6218_v53, 0.0 }
 0x52a   : > { %v5388_v61 = vadd.f32 %v5386_v8, %v5286_v42  ;;  %v5287_v24 = vadd.f32 %v5285_v50, %v5185_v9  ;;  %v5691_v9 = vrot.slane %v5681_v27, %v13585_v20  ;;  %v11063_v42 = vadd.f32 -6.0, %v12733_v23 }
 0x52b   : > { %v5460_v49 = vpop.f32.mrf.mxu0  ;;  %v5562_v5 = vpop.f32.mrf.mxu1  ;;  %v5928_v8 = vrot.slane %v5918_v11, %v13585_v20  ;;  %v6122_v50 = vrot.slane %v6117_v1, %v13585_v20  ;;  %v6320_v16 = vsub.f32 1.0, %v6319_v46  ;;  %v6034_v43 = vrot.slane %v6024_v29, %v13585_v20 }
 0x52c   : > { %v5389_v54 = vadd.f32 %v5387_v3, %v5287_v24  ;;  %v5488_v45 = vmul.f32 %v5483_v28, %v5460_v49  ;;  %v5590_v38 = vmul.f32 %v5585_v41, %v5562_v5  ;;  %v11065_v28 = vadd.f32 -7.0, %v12733_v23 }
 0x52d   : > { %v5462_v31 = vpop.f32.mrf.mxu0  ;;  %v5564_v57 = vpop.f32.mrf.mxu1  ;;  %v6030_v41 = vrot.slane %v6020_v0, %v13585_v20  ;;  %v6224_v49 = vrot.slane %v6219_v21, %v13585_v20  ;;  %v6126_v5 = vrot.slane %v6117_v1, %v12457_v33  ;;  %v6132_v37 = vrot.slane %v6122_v50, %v13585_v20 }
 0x52e   : > { %v5490_v6 = vadd.f32 %v5488_v45, %v5388_v61  ;;  %v5489_v19 = vmul.f32 %v5487_v17, %v5462_v31  ;;  %v5591_v22 = vmul.f32 %v5589_v44, %v5564_v57  ;;  %v5932_v61 = vrot.slane %v5922_v63, %v13585_v20 }
 0x52f   : > { %v6422_v17 = vsub.f32 1.0, %v6421_v26  ;;  %v6321_v31 = vmax.f32 %v6320_v16, 0.0  ;;  %v6625_v57 = vand.u32 2147483647, %v11065_v28  ;;  %v11067_v51 = vadd.f32 -8.0, %v12733_v23 }
 0x530   : > { %v5592_v58 = vadd.f32 %v5590_v38, %v5490_v6  ;;  %v5491_v34 = vadd.f32 %v5489_v19, %v5389_v54  ;;  %v6523_v54 = vand.u32 2147483647, %v11063_v42  ;;  %v6228_v6 = vrot.slane %v6219_v21, %v12457_v33 }
 0x531   : > { %v5664_v25 = vpop.f32.mrf.mxu0  ;;  %v5766_v10 = vpop.f32.mrf.mxu1  ;;  %v6234_v38 = vrot.slane %v6224_v49, %v13585_v20  ;;  %v6136_v19 = vrot.slane %v6126_v5, %v13585_v20  ;;  %v6423_v27 = vmax.f32 %v6422_v17, 0.0  ;;  %v11069_v15 = vadd.f32 -9.0, %v12733_v23 }
 0x532   : > { %v5593_v13 = vadd.f32 %v5591_v22, %v5491_v34  ;;  %v5692_v7 = vmul.f32 %v5687_v4, %v5664_v25  ;;  %v5794_v2 = vmul.f32 %v5789_v40, %v5766_v10  ;;  %v6326_v4 = vrot.slane %v6321_v31, %v13585_v20 }
 0x533   : > { %v5666_v56 = vpop.f32.mrf.mxu0  ;;  %v5768_v60 = vpop.f32.mrf.mxu1  ;;  %v6626_v25 = vsub.f32 1.0, %v6625_v57  ;;  %v6727_v10 = vand.u32 2147483647, %v11067_v51  ;;  %v11071_v11 = vadd.f32 -10.0, %v12733_v23  ;;  %v6238_v26 = vrot.slane %v6228_v6, %v13585_v20 }
 0x534   : > { %v5694_v59 = vadd.f32 %v5692_v7, %v5592_v58  ;;  %v5693_v18 = vmul.f32 %v5691_v9, %v5666_v56  ;;  %v5795_v55 = vmul.f32 %v5793_v48, %v5768_v60  ;;  %v6524_v58 = vsub.f32 1.0, %v6523_v54 }
 0x535   : > { %v6428_v9 = vrot.slane %v6423_v27, %v13585_v20  ;;  %v6432_v56 = vrot.slane %v6423_v27, %v12457_v33  ;;  %v6829_v60 = vand.u32 2147483647, %v11069_v15  ;;  %v11073_v48 = vadd.f32 -11.0, %v12733_v23 }
 0x536   : > { %v5796_v39 = vadd.f32 %v5794_v2, %v5694_v59  ;;  %v5695_v35 = vadd.f32 %v5693_v18, %v5593_v13  ;;  %v6330_v13 = vrot.slane %v6321_v31, %v12457_v33  ;;  %v6525_v59 = vmax.f32 %v6524_v58, 0.0 }
 0x537   : > { %v5906_v24 = vpop.f32.mrf.mxu0  ;;  %v6007_v3 = vpop.f32.mrf.mxu1  ;;  %v6336_v2 = vrot.slane %v6326_v4, %v13585_v20  ;;  %v6627_v18 = vmax.f32 %v6626_v25, 0.0  ;;  %v6728_v42 = vsub.f32 1.0, %v6727_v10  ;;  %v11077_v6 = vadd.f32 -13.0, %v12733_v23 }
 0x538   : > { %v5797_v30 = vadd.f32 %v5795_v55, %v5695_v35  ;;  %v5933_v12 = vmul.f32 %v5928_v8, %v5906_v24  ;;  %v6035_v36 = vmul.f32 %v6030_v41, %v6007_v3  ;;  %v6931_v8 = vand.u32 2147483647, %v11071_v11 }
 0x539   : > { %v5908_v45 = vpop.f32.mrf.mxu0  ;;  %v6009_v44 = vpop.f32.mrf.mxu1  ;;  %v6442_v24 = vrot.slane %v6432_v56, %v13585_v20  ;;  %v6830_v3 = vsub.f32 1.0, %v6829_v60  ;;  %v11075_v41 = vadd.f32 -12.0, %v12733_v23  ;;  %v6530_v17 = vrot.slane %v6525_v59, %v13585_v20 }
 0x53a   : > { %v5935_v47 = vadd.f32 %v5933_v12, %v5796_v39  ;;  %v5934_v52 = vmul.f32 %v5932_v61, %v5908_v45  ;;  %v6036_v46 = vmul.f32 %v6034_v43, %v6009_v44  ;;  %v6340_v39 = vrot.slane %v6330_v13, %v13585_v20 }
 0x53b   : > { %v6438_v61 = vrot.slane %v6428_v9, %v13585_v20  ;;  %v6632_v54 = vrot.slane %v6627_v18, %v13585_v20  ;;  %v6534_v45 = vrot.slane %v6525_v59, %v12457_v33  ;;  %v6729_v44 = vmax.f32 %v6728_v42, 0.0 }
 0x53c   : > { %v6037_v14 = vadd.f32 %v6035_v36, %v5935_v47  ;;  %v5936_v53 = vadd.f32 %v5934_v52, %v5797_v30  ;;  %v7033_v30 = vand.u32 2147483647, %v11073_v48  ;;  %v6636_v47 = vrot.slane %v6627_v18, %v12457_v33 }
 0x53d   : > { %v6109_v34 = vpop.f32.mrf.mxu0  ;;  %v6211_v22 = vpop.f32.mrf.mxu1  ;;  %v6831_v36 = vmax.f32 %v6830_v3, 0.0  ;;  %v7135_v52 = vand.u32 2147483647, %v11075_v41  ;;  %v6540_v15 = vrot.slane %v6530_v17, %v13585_v20  ;;  %v6734_v58 = vrot.slane %v6729_v44, %v13585_v20 }
 0x53e   : > { %v6038_v63 = vadd.f32 %v6036_v46, %v5936_v53  ;;  %v6137_v1 = vmul.f32 %v6132_v37, %v6109_v34  ;;  %v6239_v29 = vmul.f32 %v6234_v38, %v6211_v22  ;;  %v6932_v37 = vsub.f32 1.0, %v6931_v8 }
 0x53f   : > { %v6111_v7 = vpop.f32.mrf.mxu0  ;;  %v6213_v40 = vpop.f32.mrf.mxu1  ;;  %v6544_v46 = vrot.slane %v6534_v45, %v13585_v20  ;;  %v7034_v22 = vsub.f32 1.0, %v7033_v30  ;;  %v6642_v10 = vrot.slane %v6632_v54, %v13585_v20  ;;  %v6646_v11 = vrot.slane %v6636_v47, %v13585_v20 }
 0x540   : > { %v6139_v0 = vadd.f32 %v6137_v1, %v6037_v14  ;;  %v6138_v21 = vmul.f32 %v6136_v19, %v6111_v7  ;;  %v6240_v28 = vmul.f32 %v6238_v26, %v6213_v40  ;;  %v6933_v34 = vmax.f32 %v6932_v37, 0.0 }
 0x541   : > { %v6836_v26 = vrot.slane %v6831_v36, %v13585_v20  ;;  %v6738_v13 = vrot.slane %v6729_v44, %v12457_v33  ;;  %v7237_v7 = vand.u32 2147483647, %v11077_v6  ;;  %v11079_v40 = vadd.f32 -14.0, %v12733_v23 }
 0x542   : > { %v6241_v50 = vadd.f32 %v6239_v29, %v6139_v0  ;;  %v6140_v16 = vadd.f32 %v6138_v21, %v6038_v63  ;;  %v6840_v48 = vrot.slane %v6831_v36, %v12457_v33  ;;  %v6744_v0 = vrot.slane %v6734_v58, %v13585_v20 }
 0x543   : > { %v6313_v35 = vpop.f32.mrf.mxu0  ;;  %v6415_v55 = vpop.f32.mrf.mxu1  ;;  %v6938_v29 = vrot.slane %v6933_v34, %v13585_v20  ;;  %v7035_v21 = vmax.f32 %v7034_v22, 0.0  ;;  %v11081_v59 = vadd.f32 -15.0, %v12733_v23  ;;  %v7136_v8 = vsub.f32 1.0, %v7135_v52 }
 0x544   : > { %v6242_v49 = vadd.f32 %v6240_v28, %v6140_v16  ;;  %v6341_v5 = vmul.f32 %v6336_v2, %v6313_v35  ;;  %v6443_v57 = vmul.f32 %v6438_v61, %v6415_v55  ;;  %v6846_v28 = vrot.slane %v6836_v26, %v13585_v20 }
 0x545   : > { %v6315_v12 = vpop.f32.mrf.mxu0  ;;  %v6417_v43 = vpop.f32.mrf.mxu1  ;;  %v7238_v35 = vsub.f32 1.0, %v7237_v7  ;;  %v7339_v55 = vand.u32 2147483647, %v11079_v40  ;;  %v6748_v3 = vrot.slane %v6738_v13, %v13585_v20  ;;  %v6850_v41 = vrot.slane %v6840_v48, %v13585_v20 }
 0x546   : > { %v6343_v31 = vadd.f32 %v6341_v5, %v6241_v50  ;;  %v6342_v51 = vmul.f32 %v6340_v39, %v6315_v12  ;;  %v6444_v27 = vmul.f32 %v6442_v24, %v6417_v43  ;;  %v6942_v39 = vrot.slane %v6933_v34, %v12457_v33 }
 0x547   : > { %v6948_v5 = vrot.slane %v6938_v29, %v13585_v20  ;;  %v7040_v17 = vrot.slane %v7035_v21, %v13585_v20  ;;  %v7044_v30 = vrot.slane %v7035_v21, %v12457_v33  ;;  %v7441_v12 = vand.u32 2147483647, %v11081_v59 }
 0x548   : > { %v6445_v38 = vadd.f32 %v6443_v57, %v6343_v31  ;;  %v6344_v19 = vadd.f32 %v6342_v51, %v6242_v49  ;;  %v7137_v44 = vmax.f32 %v7136_v8, 0.0  ;;  %v7239_v37 = vmax.f32 %v7238_v35, 0.0 }
 0x549   : > { %v6517_v14 = vpop.f32.mrf.mxu0  ;;  %v6619_v53 = vpop.f32.mrf.mxu1  ;;  %v7340_v31 = vsub.f32 1.0, %v7339_v55  ;;  %v7590_v57 = vand.u32 2147483647, %v12745_v32  ;;  %v11084_v51 = vadd.f32 -1.0, %v12745_v32  ;;  %v6952_v6 = vrot.slane %v6942_v39, %v13585_v20 }
 0x54a   : > { %v6446_v4 = vadd.f32 %v6444_v27, %v6344_v19  ;;  %v6545_v25 = vmul.f32 %v6540_v15, %v6517_v14  ;;  %v6647_v56 = vmul.f32 %v6642_v10, %v6619_v53  ;;  %v7050_v27 = vrot.slane %v7040_v17, %v13585_v20 }
 0x54b   : > { %v6519_v63 = vpop.f32.mrf.mxu0  ;;  %v6621_v1 = vpop.f32.mrf.mxu1  ;;  %v7054_v15 = vrot.slane %v7044_v30, %v13585_v20  ;;  %v7442_v14 = vsub.f32 1.0, %v7441_v12  ;;  %v11086_v53 = vadd.f32 -2.0, %v12745_v32  ;;  %v7142_v34 = vrot.slane %v7137_v44, %v13585_v20 }
 0x54c   : > { %v6547_v9 = vadd.f32 %v6545_v25, %v6445_v38  ;;  %v6546_v60 = vmul.f32 %v6544_v46, %v6519_v63  ;;  %v6648_v42 = vmul.f32 %v6646_v11, %v6621_v1  ;;  %v7146_v22 = vrot.slane %v7137_v44, %v12457_v33 }
 0x54d   : > { %v7244_v10 = vrot.slane %v7239_v37, %v13585_v20  ;;  %v7341_v11 = vmax.f32 %v7340_v31, 0.0  ;;  %v7591_v63 = vsub.f32 1.0, %v7590_v57  ;;  %v7692_v1 = vand.u32 2147483647, %v11084_v51 }
 0x54e   : > { %v6649_v2 = vadd.f32 %v6647_v56, %v6547_v9  ;;  %v6548_v18 = vadd.f32 %v6546_v60, %v6446_v4  ;;  %v11088_v40 = vadd.f32 -3.0, %v12745_v32  ;;  %v7248_v9 = vrot.slane %v7239_v37, %v12457_v33 }
 0x54f   : > { %v6721_v50 = vpop.f32.mrf.mxu0  ;;  %v6823_v16 = vpop.f32.mrf.mxu1  ;;  %v7443_v56 = vmax.f32 %v7442_v14, 0.0  ;;  %v7794_v60 = vand.u32 2147483647, %v11086_v53  ;;  %v7152_v21 = vrot.slane %v7142_v34, %v13585_v20  ;;  %v7592_v8 = vmax.f32 %v7591_v63, 0.0 }
 0x550   : > { %v6650_v61 = vadd.f32 %v6648_v42, %v6548_v18  ;;  %v6749_v24 = vmul.f32 %v6744_v0, %v6721_v50  ;;  %v6851_v54 = vmul.f32 %v6846_v28, %v6823_v16  ;;  %v7156_v18 = vrot.slane %v7146_v22, %v13585_v20 }
 0x551   : > { %v6723_v49 = vpop.f32.mrf.mxu0  ;;  %v6825_v23 = vpop.f32.mrf.mxu1  ;;  %v7346_v42 = vrot.slane %v7341_v11, %v13585_v20  ;;  %v7693_v50 = vsub.f32 1.0, %v7692_v1  ;;  %v7254_v39 = vrot.slane %v7244_v10, %v13585_v20  ;;  %v7896_v35 = vand.u32 2147483647, %v11088_v40 }
 0x552   : > { %v6751_v43 = vadd.f32 %v6749_v24, %v6649_v2  ;;  %v6750_v45 = vmul.f32 %v6748_v3, %v6723_v49  ;;  %v6852_v52 = vmul.f32 %v6850_v41, %v6825_v23  ;;  %v7258_v24 = vrot.slane %v7248_v9, %v13585_v20 }
 0x553   : > { %v7448_v3 = vrot.slane %v7443_v56, %v13585_v20  ;;  %v7350_v41 = vrot.slane %v7341_v11, %v12457_v33  ;;  %v7795_v49 = vsub.f32 1.0, %v7794_v60  ;;  %v11090_v30 = vadd.f32 -4.0, %v12745_v32 }
 0x554   : > { %v6853_v47 = vadd.f32 %v6851_v54, %v6751_v43  ;;  %v6752_v36 = vadd.f32 %v6750_v45, %v6650_v61  ;;  %v7356_v12 = vrot.slane %v7346_v42, %v13585_v20  ;;  %v7452_v43 = vrot.slane %v7443_v56, %v12457_v33 }
 0x555   : > { %v6925_v38 = vpop.f32.mrf.mxu0  ;;  %v7027_v19 = vpop.f32.mrf.mxu1  ;;  %v7694_v54 = vmax.f32 %v7693_v50, 0.0  ;;  %v11092_v45 = vadd.f32 -5.0, %v12745_v32  ;;  %v7897_v57 = vsub.f32 1.0, %v7896_v35  ;;  %v7998_v14 = vand.u32 2147483647, %v11090_v30 }
 0x556   : > { %v6854_v46 = vadd.f32 %v6852_v52, %v6752_v36  ;;  %v6953_v58 = vmul.f32 %v6948_v5, %v6925_v38  ;;  %v7055_v13 = vmul.f32 %v7050_v27, %v7027_v19  ;;  %v7458_v36 = vrot.slane %v7448_v3, %v13585_v20 }
 0x557   : > { %v6927_v4 = vpop.f32.mrf.mxu0  ;;  %v7029_v25 = vpop.f32.mrf.mxu1  ;;  %v7597_v52 = vrot.slane %v7592_v8, %v13585_v20  ;;  %v11094_v38 = vadd.f32 -6.0, %v12745_v32  ;;  %v7699_v34 = vrot.slane %v7694_v54, %v13585_v20  ;;  %v7796_v22 = vmax.f32 %v7795_v49, 0.0 }
 0x558   : > { %v6955_v26 = vadd.f32 %v6953_v58, %v6853_v47  ;;  %v6954_v7 = vmul.f32 %v6952_v6, %v6927_v4  ;;  %v7056_v29 = vmul.f32 %v7054_v15, %v7029_v25  ;;  %v7601_v6 = vrot.slane %v7592_v8, %v12457_v33 }
 0x559   : > { %v7360_v15 = vrot.slane %v7350_v41, %v13585_v20  ;;  %v7462_v58 = vrot.slane %v7452_v43, %v13585_v20  ;;  %v8100_v4 = vand.u32 2147483647, %v11092_v45  ;;  %v7898_v63 = vmax.f32 %v7897_v57, 0.0 }
 0x55a   : > { %v7057_v48 = vadd.f32 %v7055_v13, %v6955_v26  ;;  %v6956_v0 = vadd.f32 %v6954_v7, %v6854_v46  ;;  %v7607_v1 = vrot.slane %v7597_v52, %v13585_v20  ;;  %v7703_v26 = vrot.slane %v7694_v54, %v12457_v33 }
 0x55b   : > { %v7129_v59 = vpop.f32.mrf.mxu0  ;;  %v7231_v2 = vpop.f32.mrf.mxu1  ;;  %v8202_v13 = vand.u32 2147483647, %v11094_v38  ;;  %v11096_v7 = vadd.f32 -7.0, %v12745_v32  ;;  %v7999_v60 = vsub.f32 1.0, %v7998_v14  ;;  %v7709_v42 = vrot.slane %v7699_v34, %v13585_v20 }
 0x55c   : > { %v7058_v16 = vadd.f32 %v7056_v29, %v6956_v0  ;;  %v7157_v28 = vmul.f32 %v7152_v21, %v7129_v59  ;;  %v7259_v5 = vmul.f32 %v7254_v39, %v7231_v2  ;;  %v7611_v29 = vrot.slane %v7601_v6, %v13585_v20 }
 0x55d   : > { %v7131_v55 = vpop.f32.mrf.mxu0  ;;  %v7233_v61 = vpop.f32.mrf.mxu1  ;;  %v7801_v21 = vrot.slane %v7796_v22, %v13585_v20  ;;  %v8101_v59 = vsub.f32 1.0, %v8100_v4  ;;  %v11098_v2 = vadd.f32 -8.0, %v12745_v32  ;;  %v7903_v8 = vrot.slane %v7898_v63, %v13585_v20 }
 0x55e   : > { %v7159_v23 = vadd.f32 %v7157_v28, %v7057_v48  ;;  %v7158_v17 = vmul.f32 %v7156_v18, %v7131_v55  ;;  %v7260_v31 = vmul.f32 %v7258_v24, %v7233_v61  ;;  %v7805_v50 = vrot.slane %v7796_v22, %v12457_v33 }
 0x55f   : > { %v7907_v39 = vrot.slane %v7898_v63, %v12457_v33  ;;  %v8203_v35 = vsub.f32 1.0, %v8202_v13  ;;  %v8304_v55 = vand.u32 2147483647, %v11096_v7  ;;  %v11100_v61 = vadd.f32 -9.0, %v12745_v32 }
 0x560   : > { %v7261_v44 = vadd.f32 %v7259_v5, %v7159_v23  ;;  %v7160_v37 = vadd.f32 %v7158_v17, %v7058_v16  ;;  %v7713_v41 = vrot.slane %v7703_v26, %v13585_v20  ;;  %v8000_v49 = vmax.f32 %v7999_v60, 0.0 }
 0x561   : > { %v7333_v51 = vpop.f32.mrf.mxu0  ;;  %v7435_v47 = vpop.f32.mrf.mxu1  ;;  %v7811_v23 = vrot.slane %v7801_v21, %v13585_v20  ;;  %v8102_v5 = vmax.f32 %v8101_v59, 0.0  ;;  %v8406_v17 = vand.u32 2147483647, %v11098_v2  ;;  %v7913_v43 = vrot.slane %v7903_v8, %v13585_v20 }
 0x562   : > { %v7262_v19 = vadd.f32 %v7260_v31, %v7160_v37  ;;  %v7361_v27 = vmul.f32 %v7356_v12, %v7333_v51  ;;  %v7463_v10 = vmul.f32 %v7458_v36, %v7435_v47  ;;  %v7815_v54 = vrot.slane %v7805_v50, %v13585_v20 }
 0x563   : > { %v7335_v53 = vpop.f32.mrf.mxu0  ;;  %v7437_v46 = vpop.f32.mrf.mxu1  ;;  %v7917_v37 = vrot.slane %v7907_v39, %v13585_v20  ;;  %v8204_v31 = vmax.f32 %v8203_v35, 0.0  ;;  %v8305_v57 = vsub.f32 1.0, %v8304_v55  ;;  %v8508_v51 = vand.u32 2147483647, %v11100_v61 }
 0x564   : > { %v7363_v25 = vadd.f32 %v7361_v27, %v7261_v44  ;;  %v7362_v11 = vmul.f32 %v7360_v15, %v7335_v53  ;;  %v7464_v56 = vmul.f32 %v7462_v58, %v7437_v46  ;;  %v8005_v52 = vrot.slane %v8000_v49, %v13585_v20 }
 0x565   : > { %v11102_v6 = vadd.f32 -10.0, %v12745_v32  ;;  %v8107_v27 = vrot.slane %v8102_v5, %v13585_v20  ;;  %v8009_v15 = vrot.slane %v8000_v49, %v12457_v33  ;;  %v8407_v14 = vsub.f32 1.0, %v8406_v17 }
 0x566   : > { %v7465_v40 = vadd.f32 %v7463_v10, %v7363_v25  ;;  %v7364_v9 = vadd.f32 %v7362_v11, %v7262_v19  ;;  %v11104_v53 = vadd.f32 -11.0, %v12745_v32  ;;  %v8111_v4 = vrot.slane %v8102_v5, %v12457_v33 }
 0x567   : > { %v7585_v48 = vpop.f32.mrf.mxu0  ;;  %v7686_v0 = vpop.f32.mrf.mxu1  ;;  %v8209_v25 = vrot.slane %v8204_v31, %v13585_v20  ;;  %v8306_v10 = vmax.f32 %v8305_v57, 0.0  ;;  %v8213_v11 = vrot.slane %v8204_v31, %v12457_v33  ;;  %v8015_v13 = vrot.slane %v8005_v52, %v13585_v20 }
 0x568   : > { %7467 = vst [vmem:[%s13321_s12] sm:$0xff] %v7465_v40  ;;  %v7466_v18 = vadd.f32 %v7464_v56, %v7364_v9  ;;  %v7612_v24 = vmul.f32 %v7607_v1, %v7585_v48  ;;  %v7714_v3 = vmul.f32 %v7709_v42, %v7686_v0  ;;  %v8117_v9 = vrot.slane %v8107_v27, %v13585_v20 }
 0x569   : > { %v7587_v16 = vpop.f32.mrf.mxu0  ;;  %v7688_v28 = vpop.f32.mrf.mxu1  ;;  %v8019_v56 = vrot.slane %v8009_v15, %v13585_v20  ;;  %v8509_v60 = vsub.f32 1.0, %v8508_v51  ;;  %v8610_v48 = vand.u32 2147483647, %v11102_v6  ;;  %v8408_v21 = vmax.f32 %v8407_v14, 0.0 }
 0x56a   : > { %7468 = vst [vmem:[%s13321_s12 + $0x8] sm:$0xff] %v7466_v18  ;;  %v7613_v30 = vmul.f32 %v7611_v29, %v7587_v16  ;;  %v7715_v12 = vmul.f32 %v7713_v41, %v7688_v28  ;;  %v7716_v47 = vadd.f32 %v7714_v3, %v7612_v24  ;;  %v11106_v59 = vadd.f32 -12.0, %v12745_v32 }
 0x56b   : > { %v8121_v42 = vrot.slane %v8111_v4, %v13585_v20  ;;  %v8219_v8 = vrot.slane %v8209_v25, %v13585_v20  ;;  %v8311_v50 = vrot.slane %v8306_v10, %v13585_v20  ;;  %v8712_v16 = vand.u32 2147483647, %v11104_v53 }
 0x56c   : > { %v7717_v46 = vadd.f32 %v7715_v12, %v7613_v30  ;;  %v8315_v55 = vrot.slane %v8306_v10, %v12457_v33  ;;  %v8223_v61 = vrot.slane %v8213_v11, %v13585_v20  ;;  %v8510_v24 = vmax.f32 %v8509_v60, 0.0 }
 0x56d   : > { %v7788_v45 = vpop.f32.mrf.mxu0  ;;  %v7890_v44 = vpop.f32.mrf.mxu1  ;;  %v8611_v3 = vsub.f32 1.0, %v8610_v48  ;;  %v11108_v41 = vadd.f32 -13.0, %v12745_v32  ;;  %v8814_v17 = vand.u32 2147483647, %v11106_v59  ;;  %v8417_v51 = vrot.slane %v8408_v21, %v12457_v33 }
 0x56e   : > { %v7816_v36 = vmul.f32 %v7811_v23, %v7788_v45  ;;  %v7918_v34 = vmul.f32 %v7913_v43, %v7890_v44  ;;  %v8321_v43 = vrot.slane %v8311_v50, %v13585_v20  ;;  %v8713_v45 = vsub.f32 1.0, %v8712_v16 }
 0x56f   : > { %v7790_v38 = vpop.f32.mrf.mxu0  ;;  %v7892_v19 = vpop.f32.mrf.mxu1  ;;  %v11110_v44 = vadd.f32 -14.0, %v12745_v32  ;;  %v8325_v57 = vrot.slane %v8315_v55, %v13585_v20  ;;  %v8515_v52 = vrot.slane %v8510_v24, %v13585_v20  ;;  %v8612_v6 = vmax.f32 %v8611_v3, 0.0 }
 0x570   : > { %v7818_v58 = vadd.f32 %v7816_v36, %v7716_v47  ;;  %v7817_v22 = vmul.f32 %v7815_v54, %v7790_v38  ;;  %v7919_v26 = vmul.f32 %v7917_v37, %v7892_v19  ;;  %v8413_v54 = vrot.slane %v8408_v21, %v13585_v20 }
 0x571   : > { %v8916_v38 = vand.u32 2147483647, %v11108_v41  ;;  %v11112_v19 = vadd.f32 -15.0, %v12745_v32  ;;  %v8815_v53 = vsub.f32 1.0, %v8814_v17  ;;  %v8621_v21 = vrot.slane %v8612_v6, %v12457_v33 }
 0x572   : > { %v7920_v63 = vadd.f32 %v7918_v34, %v7818_v58  ;;  %v7819_v1 = vadd.f32 %v7817_v22, %v7717_v46  ;;  %v8519_v46 = vrot.slane %v8510_v24, %v12457_v33  ;;  %v8714_v58 = vmax.f32 %v8713_v45, 0.0 }
 0x573   : > { %v7992_v7 = vpop.f32.mrf.mxu0  ;;  %v8094_v40 = vpop.f32.mrf.mxu1  ;;  %v9018_v34 = vand.u32 2147483647, %v11110_v44  ;;  %v8423_v10 = vrot.slane %v8413_v54, %v13585_v20  ;;  %v8917_v32 = vsub.f32 1.0, %v8916_v38  ;;  %v9259_v17 = vand.u32 2147483647, %v12754_v62 }
 0x574   : > { %v7921_v0 = vadd.f32 %v7919_v26, %v7819_v1  ;;  %v8020_v29 = vmul.f32 %v8015_v13, %v7992_v7  ;;  %v8122_v39 = vmul.f32 %v8117_v9, %v8094_v40  ;;  %v8427_v1 = vrot.slane %v8417_v51, %v13585_v20 }
 0x575   : > { %v7994_v2 = vpop.f32.mrf.mxu0  ;;  %v8096_v18 = vpop.f32.mrf.mxu1  ;;  %v8617_v26 = vrot.slane %v8612_v6, %v13585_v20  ;;  %v9120_v13 = vand.u32 2147483647, %v11112_v19  ;;  %v8525_v9 = vrot.slane %v8515_v52, %v13585_v20  ;;  %v9019_v59 = vsub.f32 1.0, %v9018_v34 }
 0x576   : > { %v8022_v28 = vadd.f32 %v8020_v29, %v7920_v63  ;;  %v8021_v35 = vmul.f32 %v8019_v56, %v7994_v2  ;;  %v8123_v5 = vmul.f32 %v8121_v42, %v8096_v18  ;;  %v8816_v56 = vmax.f32 %v8815_v53, 0.0 }
 0x577   : > { %v8719_v29 = vrot.slane %v8714_v58, %v13585_v20  ;;  %v8627_v50 = vrot.slane %v8617_v26, %v13585_v20  ;;  %v8918_v16 = vmax.f32 %v8917_v32, 0.0  ;;  %v11117_v51 = vadd.f32 -2.0, %v12754_v62 }
 0x578   : > { %v8124_v49 = vadd.f32 %v8122_v39, %v8022_v28  ;;  %v8023_v23 = vadd.f32 %v8021_v35, %v7921_v0  ;;  %v8529_v0 = vrot.slane %v8519_v46, %v13585_v20  ;;  %v9121_v28 = vsub.f32 1.0, %v9120_v13 }
 0x579   : > { %v8196_v30 = vpop.f32.mrf.mxu0  ;;  %v8298_v12 = vpop.f32.mrf.mxu1  ;;  %v11115_v39 = vadd.f32 -1.0, %v12754_v62  ;;  %v8821_v24 = vrot.slane %v8816_v56, %v13585_v20  ;;  %v8927_v19 = vrot.slane %v8918_v16, %v12457_v33 }
 0x57a   : > { %v8125_v37 = vadd.f32 %v8123_v5, %v8023_v23  ;;  %v8224_v31 = vmul.f32 %v8219_v8, %v8196_v30  ;;  %v8326_v15 = vmul.f32 %v8321_v43, %v8298_v12  ;;  %v8723_v8 = vrot.slane %v8714_v58, %v12457_v33 }
 0x57b   : > { %v8198_v47 = vpop.f32.mrf.mxu0  ;;  %v8300_v36 = vpop.f32.mrf.mxu1  ;;  %v8825_v23 = vrot.slane %v8816_v56, %v12457_v33  ;;  %v9020_v5 = vmax.f32 %v9019_v59, 0.0  ;;  %v8729_v43 = vrot.slane %v8719_v29, %v13585_v20  ;;  %v8831_v6 = vrot.slane %v8821_v24, %v13585_v20 }
 0x57c   : > { %v8226_v27 = vadd.f32 %v8224_v31, %v8124_v49  ;;  %v8225_v14 = vmul.f32 %v8223_v61, %v8198_v47  ;;  %v8327_v25 = vmul.f32 %v8325_v57, %v8300_v36  ;;  %v8631_v49 = vrot.slane %v8621_v21, %v13585_v20 }
 0x57d   : > { %v8733_v54 = vrot.slane %v8723_v8, %v13585_v20  ;;  %v9122_v31 = vmax.f32 %v9121_v28, 0.0  ;;  %v9361_v57 = vand.u32 2147483647, %v11115_v39  ;;  %v8835_v38 = vrot.slane %v8825_v23, %v13585_v20 }
 0x57e   : > { %v8328_v22 = vadd.f32 %v8326_v15, %v8226_v27  ;;  %v8227_v4 = vadd.f32 %v8225_v14, %v8125_v37  ;;  %v8923_v37 = vrot.slane %v8918_v16, %v13585_v20  ;;  %v9025_v27 = vrot.slane %v9020_v5, %v13585_v20 }
 0x57f   : > { %v8400_v11 = vpop.f32.mrf.mxu0  ;;  %v8502_v63 = vpop.f32.mrf.mxu1  ;;  %v9260_v15 = vsub.f32 1.0, %v9259_v17  ;;  %v11119_v58 = vadd.f32 -3.0, %v12754_v62  ;;  %v9029_v26 = vrot.slane %v9020_v5, %v12457_v33  ;;  %v9131_v32 = vrot.slane %v9122_v31, %v12457_v33 }
 0x580   : > { %v8329_v7 = vadd.f32 %v8327_v25, %v8227_v4  ;;  %v8428_v40 = vmul.f32 %v8423_v10, %v8400_v11  ;;  %v8530_v18 = vmul.f32 %v8525_v9, %v8502_v63  ;;  %v8933_v4 = vrot.slane %v8923_v37, %v13585_v20 }
 0x581   : > { %v8402_v60 = vpop.f32.mrf.mxu0  ;;  %v8504_v48 = vpop.f32.mrf.mxu1  ;;  %v9127_v25 = vrot.slane %v9122_v31, %v13585_v20  ;;  %v9362_v10 = vsub.f32 1.0, %v9361_v57  ;;  %v9463_v11 = vand.u32 2147483647, %v11117_v51  ;;  %v9261_v9 = vmax.f32 %v9260_v15, 0.0 }
 0x582   : > { %v8430_v2 = vadd.f32 %v8428_v40, %v8328_v22  ;;  %v8429_v42 = vmul.f32 %v8427_v1, %v8402_v60  ;;  %v8531_v61 = vmul.f32 %v8529_v0, %v8504_v48  ;;  %v8937_v40 = vrot.slane %v8927_v19, %v13585_v20 }
 0x583   : > { %v11121_v56 = vadd.f32 -4.0, %v12754_v62  ;;  %v11123_v60 = vadd.f32 -5.0, %v12754_v62  ;;  %v9565_v21 = vand.u32 2147483647, %v11119_v58  ;;  %v9035_v59 = vrot.slane %v9025_v27, %v13585_v20 }
 0x584   : > { %v8532_v35 = vadd.f32 %v8530_v18, %v8430_v2  ;;  %v8431_v55 = vadd.f32 %v8429_v42, %v8329_v7  ;;  %v9137_v2 = vrot.slane %v9127_v25, %v13585_v20  ;;  %v9363_v18 = vmax.f32 %v9362_v10, 0.0 }
 0x585   : > { %v8604_v3 = vpop.f32.mrf.mxu0  ;;  %v8706_v41 = vpop.f32.mrf.mxu1  ;;  %v9464_v42 = vsub.f32 1.0, %v9463_v11  ;;  %v9039_v28 = vrot.slane %v9029_v26, %v13585_v20  ;;  %v9769_v24 = vand.u32 2147483647, %v11123_v60  ;;  %v9141_v23 = vrot.slane %v9131_v32, %v13585_v20 }
 0x586   : > { %v8533_v30 = vadd.f32 %v8531_v61, %v8431_v55  ;;  %v8632_v12 = vmul.f32 %v8627_v50, %v8604_v3  ;;  %v8734_v36 = vmul.f32 %v8729_v43, %v8706_v41  ;;  %v9266_v55 = vrot.slane %v9261_v9, %v13585_v20 }
 0x587   : > { %v8606_v45 = vpop.f32.mrf.mxu0  ;;  %v8708_v44 = vpop.f32.mrf.mxu1  ;;  %v9667_v61 = vand.u32 2147483647, %v11121_v56  ;;  %v11125_v3 = vadd.f32 -6.0, %v12754_v62  ;;  %v9566_v5 = vsub.f32 1.0, %v9565_v21  ;;  %v9270_v43 = vrot.slane %v9261_v9, %v12457_v33 }
 0x588   : > { %v8634_v47 = vadd.f32 %v8632_v12, %v8532_v35  ;;  %v8633_v52 = vmul.f32 %v8631_v49, %v8606_v45  ;;  %v8735_v46 = vmul.f32 %v8733_v54, %v8708_v44  ;;  %v9368_v12 = vrot.slane %v9363_v18, %v13585_v20 }
 0x589   : > { %v9465_v54 = vmax.f32 %v9464_v42, 0.0  ;;  %v11127_v45 = vadd.f32 -7.0, %v12754_v62  ;;  %v9372_v57 = vrot.slane %v9363_v18, %v12457_v33  ;;  %v9276_v51 = vrot.slane %v9266_v55, %v13585_v20 }
 0x58a   : > { %v8736_v14 = vadd.f32 %v8734_v36, %v8634_v47  ;;  %v8635_v53 = vadd.f32 %v8633_v52, %v8533_v30  ;;  %v9668_v47 = vsub.f32 1.0, %v9667_v61  ;;  %v9770_v36 = vsub.f32 1.0, %v9769_v24 }
 0x58b   : > { %v8808_v34 = vpop.f32.mrf.mxu0  ;;  %v8910_v22 = vpop.f32.mrf.mxu1  ;;  %v9871_v52 = vand.u32 2147483647, %v11125_v3  ;;  %v9567_v27 = vmax.f32 %v9566_v5, 0.0  ;;  %v9474_v58 = vrot.slane %v9465_v54, %v12457_v33  ;;  %v9378_v25 = vrot.slane %v9368_v12, %v13585_v20 }
 0x58c   : > { %v8737_v63 = vadd.f32 %v8735_v46, %v8635_v53  ;;  %v8836_v1 = vmul.f32 %v8831_v6, %v8808_v34  ;;  %v8938_v0 = vmul.f32 %v8933_v4, %v8910_v22  ;;  %v9280_v53 = vrot.slane %v9270_v43, %v13585_v20 }
 0x58d   : > { %v8810_v13 = vpop.f32.mrf.mxu0  ;;  %v8912_v7 = vpop.f32.mrf.mxu1  ;;  %v9470_v46 = vrot.slane %v9465_v54, %v13585_v20  ;;  %v9973_v34 = vand.u32 2147483647, %v11127_v45  ;;  %v9382_v10 = vrot.slane %v9372_v57, %v13585_v20  ;;  %v9771_v26 = vmax.f32 %v9770_v36, 0.0 }
 0x58e   : > { %v8838_v48 = vadd.f32 %v8836_v1, %v8736_v14  ;;  %v8837_v29 = vmul.f32 %v8835_v38, %v8810_v13  ;;  %v8939_v16 = vmul.f32 %v8937_v40, %v8912_v7  ;;  %v9669_v1 = vmax.f32 %v9668_v47, 0.0 }
 0x58f   : > { %v9872_v32 = vsub.f32 1.0, %v9871_v52  ;;  %v11129_v13 = vadd.f32 -8.0, %v12754_v62  ;;  %v9572_v56 = vrot.slane %v9567_v27, %v13585_v20  ;;  %v9480_v60 = vrot.slane %v9470_v46, %v13585_v20 }
 0x590   : > { %v8940_v8 = vadd.f32 %v8938_v0, %v8838_v48  ;;  %v8839_v50 = vadd.f32 %v8837_v29, %v8737_v63  ;;  %v9484_v48 = vrot.slane %v9474_v58, %v13585_v20  ;;  %v9576_v0 = vrot.slane %v9567_v27, %v12457_v33 }
 0x591   : > { %v9012_v39 = vpop.f32.mrf.mxu0  ;;  %v9114_v35 = vpop.f32.mrf.mxu1  ;;  %v9974_v29 = vsub.f32 1.0, %v9973_v34  ;;  %v11131_v18 = vadd.f32 -9.0, %v12754_v62  ;;  %v9582_v61 = vrot.slane %v9572_v56, %v13585_v20  ;;  %v9678_v24 = vrot.slane %v9669_v1, %v12457_v33 }
 0x592   : > { %v8941_v41 = vadd.f32 %v8939_v16, %v8839_v50  ;;  %v9040_v49 = vmul.f32 %v9035_v59, %v9012_v39  ;;  %v9142_v37 = vmul.f32 %v9137_v2, %v9114_v35  ;;  %v9674_v50 = vrot.slane %v9669_v1, %v13585_v20 }
 0x593   : > { %v9014_v17 = vpop.f32.mrf.mxu0  ;;  %v9116_v30 = vpop.f32.mrf.mxu1  ;;  %v9776_v16 = vrot.slane %v9771_v26, %v13585_v20  ;;  %v10075_v39 = vand.u32 2147483647, %v11129_v13  ;;  %v9975_v5 = vmax.f32 %v9974_v29, 0.0  ;;  %v10177_v54 = vand.u32 2147483647, %v11131_v18 }
 0x594   : > { %v9042_v44 = vadd.f32 %v9040_v49, %v8940_v8  ;;  %v9041_v31 = vmul.f32 %v9039_v28, %v9014_v17  ;;  %v9143_v19 = vmul.f32 %v9141_v23, %v9116_v30  ;;  %v9873_v28 = vmax.f32 %v9872_v32, 0.0 }
 0x595   : > { %v9586_v49 = vrot.slane %v9576_v0, %v13585_v20  ;;  %v9780_v23 = vrot.slane %v9771_v26, %v12457_v33  ;;  %v11133_v17 = vadd.f32 -10.0, %v12754_v62  ;;  %v9684_v45 = vrot.slane %v9674_v50, %v13585_v20 }
 0x596   : > { %v9144_v6 = vadd.f32 %v9142_v37, %v9042_v44  ;;  %v9043_v38 = vadd.f32 %v9041_v31, %v8941_v41  ;;  %v10076_v44 = vsub.f32 1.0, %v10075_v39  ;;  %v11135_v37 = vadd.f32 -11.0, %v12754_v62 }
 0x597   : > { %v9254_v15 = vpop.f32.mrf.mxu0  ;;  %v9355_v14 = vpop.f32.mrf.mxu1  ;;  %v9786_v47 = vrot.slane %v9776_v16, %v13585_v20  ;;  %v10279_v27 = vand.u32 2147483647, %v11133_v17  ;;  %v10178_v46 = vsub.f32 1.0, %v10177_v54  ;;  %v9984_v26 = vrot.slane %v9975_v5, %v12457_v33 }
 0x598   : > { %v9145_v22 = vadd.f32 %v9143_v19, %v9043_v38  ;;  %v9281_v4 = vmul.f32 %v9276_v51, %v9254_v15  ;;  %v9383_v40 = vmul.f32 %v9378_v25, %v9355_v14  ;;  %v9790_v38 = vrot.slane %v9780_v23, %v13585_v20 }
 0x599   : > { %v9256_v11 = vpop.f32.mrf.mxu0  ;;  %v9357_v63 = vpop.f32.mrf.mxu1  ;;  %v9878_v19 = vrot.slane %v9873_v28, %v13585_v20  ;;  %v10381_v25 = vand.u32 2147483647, %v11135_v37  ;;  %v10280_v13 = vsub.f32 1.0, %v10279_v27  ;;  %v9994_v50 = vrot.slane %v9984_v26, %v13585_v20 }
 0x59a   : > { %v9283_v7 = vadd.f32 %v9281_v4, %v9144_v6  ;;  %v9282_v9 = vmul.f32 %v9280_v53, %v9256_v11  ;;  %v9384_v2 = vmul.f32 %v9382_v10, %v9357_v63  ;;  %v9688_v6 = vrot.slane %v9678_v24, %v13585_v20 }
 0x59b   : > { %v9980_v53 = vrot.slane %v9975_v5, %v13585_v20  ;;  %v10077_v4 = vmax.f32 %v10076_v44, 0.0  ;;  %v11137_v10 = vadd.f32 -12.0, %v12754_v62  ;;  %v9888_v32 = vrot.slane %v9878_v19, %v13585_v20 }
 0x59c   : > { %v9385_v21 = vadd.f32 %v9383_v40, %v9283_v7  ;;  %v9284_v59 = vadd.f32 %v9282_v9, %v9145_v22  ;;  %v9882_v22 = vrot.slane %v9873_v28, %v12457_v33  ;;  %v11139_v7 = vadd.f32 -13.0, %v12754_v62 }
 0x59d   : > { %v9457_v42 = vpop.f32.mrf.mxu0  ;;  %v9559_v8 = vpop.f32.mrf.mxu1  ;;  %v9990_v29 = vrot.slane %v9980_v53, %v13585_v20  ;;  %v10086_v39 = vrot.slane %v10077_v4, %v12457_v33 }
 0x59e   : > { %v9386_v35 = vadd.f32 %v9384_v2, %v9284_v59  ;;  %v9485_v55 = vmul.f32 %v9480_v60, %v9457_v42  ;;  %v9587_v12 = vmul.f32 %v9582_v61, %v9559_v8  ;;  %v10179_v60 = vmax.f32 %v10178_v46, 0.0 }
 0x59f   : > { %v9459_v3 = vpop.f32.mrf.mxu0  ;;  %v9561_v41 = vpop.f32.mrf.mxu1  ;;  %v10382_v59 = vsub.f32 1.0, %v10381_v25  ;;  %v10483_v2 = vand.u32 2147483647, %v11137_v10  ;;  %v9892_v8 = vrot.slane %v9882_v22, %v13585_v20  ;;  %v11141_v61 = vadd.f32 -14.0, %v12754_v62 }
 0x5a0   : > { %v9487_v30 = vadd.f32 %v9485_v55, %v9385_v21  ;;  %v9486_v43 = vmul.f32 %v9484_v48, %v9459_v3  ;;  %v9588_v51 = vmul.f32 %v9586_v49, %v9561_v41  ;;  %v10082_v21 = vrot.slane %v10077_v4, %v13585_v20 }
 0x5a1   : > { %v10585_v55 = vand.u32 2147483647, %v11139_v7  ;;  %v10184_v49 = vrot.slane %v10179_v60, %v13585_v20  ;;  %v10188_v5 = vrot.slane %v10179_v60, %v12457_v33  ;;  %v10383_v17 = vmax.f32 %v10382_v59, 0.0 }
 0x5a2   : > { %v9589_v31 = vadd.f32 %v9587_v12, %v9487_v30  ;;  %v9488_v57 = vadd.f32 %v9486_v43, %v9386_v35  ;;  %v10281_v35 = vmax.f32 %v10280_v13, 0.0  ;;  %v10092_v23 = vrot.slane %v10082_v21, %v13585_v20 }
 0x5a3   : > { %v9661_v36 = vpop.f32.mrf.mxu0  ;;  %v9763_v52 = vpop.f32.mrf.mxu1  ;;  %v10484_v30 = vsub.f32 1.0, %v10483_v2  ;;  %v10198_v27 = vrot.slane %v10188_v5, %v13585_v20  ;;  %v10392_v4 = vrot.slane %v10383_v17, %v12457_v33 }
 0x5a4   : > { %v9590_v15 = vadd.f32 %v9588_v51, %v9488_v57  ;;  %v9689_v14 = vmul.f32 %v9684_v45, %v9661_v36  ;;  %v9791_v63 = vmul.f32 %v9786_v47, %v9763_v52  ;;  %v11143_v45 = vadd.f32 -15.0, %v12754_v62 }
 0x5a5   : > { %v9663_v58 = vpop.f32.mrf.mxu0  ;;  %v9765_v34 = vpop.f32.mrf.mxu1  ;;  %v10286_v57 = vrot.slane %v10281_v35, %v13585_v20  ;;  %v10687_v51 = vand.u32 2147483647, %v11141_v61  ;;  %v10194_v52 = vrot.slane %v10184_v49, %v13585_v20  ;;  %v10290_v62 = vrot.slane %v10281_v35, %v12457_v33 }
 0x5a6   : > { %v9691_v11 = vadd.f32 %v9689_v14, %v9589_v31  ;;  %v9690_v1 = vmul.f32 %v9688_v6, %v9663_v58  ;;  %v9792_v56 = vmul.f32 %v9790_v38, %v9765_v34  ;;  %v10096_v31 = vrot.slane %v10086_v39, %v13585_v20 }
 0x5a7   : > { %v10586_v6 = vsub.f32 1.0, %v10585_v55  ;;  %v10485_v14 = vmax.f32 %v10484_v30, 0.0  ;;  %v10789_v34 = vand.u32 2147483647, %v11143_v45  ;;  %v10296_v22 = vrot.slane %v10286_v57, %v13585_v20 }
 0x5a8   : > { %v9793_v40 = vadd.f32 %v9791_v63, %v9691_v11  ;;  %v9692_v9 = vadd.f32 %v9690_v1, %v9590_v15  ;;  %v10388_v15 = vrot.slane %v10383_v17, %v13585_v20  ;;  %v10688_v25 = vsub.f32 1.0, %v10687_v51 }
 0x5a9   : > { %v9865_v48 = vpop.f32.mrf.mxu0  ;;  %v9967_v0 = vpop.f32.mrf.mxu1  ;;  %v10587_v1 = vmax.f32 %v10586_v6, 0.0  ;;  %v10300_v13 = vrot.slane %v10290_v62, %v13585_v20  ;;  %v10490_v7 = vrot.slane %v10485_v14, %v13585_v20  ;;  %v10790_v60 = vsub.f32 1.0, %v10789_v34 }
 0x5aa   : > { %v9794_v18 = vadd.f32 %v9792_v56, %v9692_v9  ;;  %v9893_v42 = vmul.f32 %v9888_v32, %v9865_v48  ;;  %v9995_v3 = vmul.f32 %v9990_v29, %v9967_v0  ;;  %v10398_v56 = vrot.slane %v10388_v15, %v13585_v20 }
 0x5ab   : > { %v9867_v16 = vpop.f32.mrf.mxu0  ;;  %v9969_v28 = vpop.f32.mrf.mxu1  ;;  %v10402_v29 = vrot.slane %v10392_v4, %v13585_v20  ;;  %v10494_v21 = vrot.slane %v10485_v14, %v12457_v33  ;;  %v10689_v59 = vmax.f32 %v10688_v25, 0.0  ;;  %v10791_v55 = vmax.f32 %v10790_v60, 0.0 }
 0x5ac   : > { %v9895_v24 = vadd.f32 %v9893_v42, %v9793_v40  ;;  %v9894_v41 = vmul.f32 %v9892_v8, %v9867_v16  ;;  %v9996_v54 = vmul.f32 %v9994_v50, %v9969_v28  ;;  %v10592_v8 = vrot.slane %v10587_v1, %v13585_v20 }
 0x5ad   : > { %v10500_v50 = vrot.slane %v10490_v7, %v13585_v20  ;;  %v10596_v16 = vrot.slane %v10587_v1, %v12457_v33  ;;  %v10504_v5 = vrot.slane %v10494_v21, %v13585_v20 }
 0x5ae   : > { %v9997_v12 = vadd.f32 %v9995_v3, %v9895_v24  ;;  %v9896_v43 = vadd.f32 %v9894_v41, %v9794_v18  ;;  %v10694_v3 = vrot.slane %v10689_v59, %v13585_v20 }
 0x5af   : > { %v10069_v44 = vpop.f32.mrf.mxu0  ;;  %v10171_v37 = vpop.f32.mrf.mxu1 }
 0x5b0   : > { %v9998_v47 = vadd.f32 %v9996_v54, %v9896_v43  ;;  %v10097_v36 = vmul.f32 %v10092_v23, %v10069_v44  ;;  %v10199_v46 = vmul.f32 %v10194_v52, %v10171_v37  ;;  %v10602_v23 = vrot.slane %v10592_v8, %v13585_v20 }
 0x5b1   : > { %v10071_v38 = vpop.f32.mrf.mxu0  ;;  %v10173_v19 = vpop.f32.mrf.mxu1  ;;  %v10698_v43 = vrot.slane %v10689_v59, %v12457_v33  ;;  %v10796_v37 = vrot.slane %v10791_v55, %v13585_v20 }
 0x5b2   : > { %v10099_v53 = vadd.f32 %v10097_v36, %v9997_v12  ;;  %v10098_v58 = vmul.f32 %v10096_v31, %v10071_v38  ;;  %v10200_v63 = vmul.f32 %v10198_v27, %v10173_v19  ;;  %v10606_v12 = vrot.slane %v10596_v16, %v13585_v20 }
 0x5b3   : > { %v10704_v31 = vrot.slane %v10694_v3, %v13585_v20  ;;  %v10800_v36 = vrot.slane %v10791_v55, %v12457_v33  ;;  %v10806_v27 = vrot.slane %v10796_v37, %v13585_v20  ;;  %v10708_v15 = vrot.slane %v10698_v43, %v13585_v20 }
 0x5b4   : > { %v10201_v10 = vadd.f32 %v10199_v46, %v10099_v53  ;;  %v10100_v11 = vadd.f32 %v10098_v58, %v9998_v47 }
 0x5b5   : > { %v10273_v26 = vpop.f32.mrf.mxu0  ;;  %v10375_v32 = vpop.f32.mrf.mxu1  ;;  %v10810_v34 = vrot.slane %v10800_v36, %v13585_v20 }
 0x5b6   : > { %v10202_v40 = vadd.f32 %v10200_v63, %v10100_v11  ;;  %v10301_v9 = vmul.f32 %v10296_v22, %v10273_v26  ;;  %v10403_v18 = vmul.f32 %v10398_v56, %v10375_v32 }
 0x5b7   : > { %v10275_v48 = vpop.f32.mrf.mxu0  ;;  %v10377_v0 = vpop.f32.mrf.mxu1 }
 0x5b8   : > { %v10303_v2 = vadd.f32 %v10301_v9, %v10201_v10  ;;  %v10302_v42 = vmul.f32 %v10300_v13, %v10275_v48  ;;  %v10404_v35 = vmul.f32 %v10402_v29, %v10377_v0 }
 0x5ba   : > { %v10405_v28 = vadd.f32 %v10403_v18, %v10303_v2  ;;  %v10304_v39 = vadd.f32 %v10302_v42, %v10202_v40 }
 0x5bb   : > { %v10477_v61 = vpop.f32.mrf.mxu0  ;;  %v10579_v24 = vpop.f32.mrf.mxu1 }
 0x5bc   : > { %v10406_v41 = vadd.f32 %v10404_v35, %v10304_v39  ;;  %v10505_v49 = vmul.f32 %v10500_v50, %v10477_v61  ;;  %v10607_v45 = vmul.f32 %v10602_v23, %v10579_v24 }
 0x5bd   : > { %v10479_v17 = vpop.f32.mrf.mxu0  ;;  %v10581_v30 = vpop.f32.mrf.mxu1 }
 0x5be   : > { %v10507_v54 = vadd.f32 %v10505_v49, %v10405_v28  ;;  %v10506_v44 = vmul.f32 %v10504_v5, %v10479_v17  ;;  %v10608_v47 = vmul.f32 %v10606_v12, %v10581_v30 }
 0x5c0   : > { %v10609_v57 = vadd.f32 %v10607_v45, %v10507_v54  ;;  %v10508_v51 = vadd.f32 %v10506_v44, %v10406_v41 }
 0x5c1   : > { %v10681_v52 = vpop.f32.mrf.mxu0  ;;  %v10783_v6 = vpop.f32.mrf.mxu1 }
 0x5c2   : > { %v10610_v38 = vadd.f32 %v10608_v47, %v10508_v51  ;;  %v10709_v19 = vmul.f32 %v10704_v31, %v10681_v52  ;;  %v10811_v46 = vmul.f32 %v10806_v27, %v10783_v6 }
 0x5c3   : > { %v10683_v62 = vpop.f32.mrf.mxu0  ;;  %v10785_v14 = vpop.f32.mrf.mxu1 }
 0x5c4   : > { %v10711_v53 = vadd.f32 %v10709_v19, %v10609_v57  ;;  %v10710_v58 = vmul.f32 %v10708_v15, %v10683_v62  ;;  %v10812_v4 = vmul.f32 %v10810_v34, %v10785_v14 }
 0x5c6   : > { %v10813_v33 = vadd.f32 %v10811_v46, %v10711_v53  ;;  %v10712_v22 = vadd.f32 %v10710_v58, %v10610_v38 }
 0x5c8   : > { %10815 = vst [vmem:[%s13321_s12 + $0x10] sm:$0xff] %v10813_v33  ;;  %v10814_v25 = vadd.f32 %v10812_v4, %v10712_v22 }
 0x5ca   : > { %10816 = vst [vmem:[%s13321_s12 + $0x18] sm:$0xff] %v10814_v25 }
 0x5cb   : > { %11412 = shalt.err (!%p11409_p13)
}
 0x5cc   : > { %s11413_s28 = scalar_lea.hbm %s10830_s18, 512  ;;  %s11417_s21 = scalar_lea.hbm %s13517_s10, 1024 }
 0x5cd   : > { %p11414_p1 = scmp.ne.s32.totalorder %s10830_s18, %s11413_s28  ;;  %p11418_p6 = scmp.lt.s32.totalorder %s10830_s18, %s13517_s10 }
 0x5ce   : > { %p11419_p5 = scmp.lt.s32.totalorder %s11417_s21, %s11413_s28 }
 0x5cf   : > { %p11415_p3 = pnand %p11414_p1, %p13586_p10 }
 0x5d0   : > { %p11420_p8 = por %p11419_p5, %p11418_p6 }
 0x5d1   : > { %p11416_p4 = pneg %p11415_p3 }
 0x5d3   : > { %p11421_p7 = pnand %p11420_p8, %p11416_p4 }
 0x5d5   : > { %11424 = shalt.err (!%p11421_p7)
}
 0x5d6   : > { %11169 = dma.vmem_to_hbm [thread:$0]  (%p13586_p10), %s10833_s17, 512, %s10830_s18, %s10818_s11  }
 0x5d7 PF: > { %s10844_s12 = sand.u32 1, %s11459_s13   ;;  %p13587_p0 = scmp.ne.s32.totalorder %s13553_s22, 0 }
 0x5d8   : > { %p13588_p12 = scmp.ge.s32.totalorder %s11471_s16, 2  ;;  %s10845_s27 = scalar_lea.sflag [#allocation5], %s10844_s12 }
 0x5da   : > { %p11189_p2 = pnand %p13588_p12, %p13587_p0 }
 0x5dc   : > { %p11190_p9 = pneg %p11189_p2 }
 0x5de   : > { %11454 = dma.done.wait (%p11190_p9), %s10845_s27, 512  }
 0x5df   : > { %11456 = vsyncadd (%p11190_p9), %s10845_s27, 4294966784  ;;  %s13589_s6 = sld [smem:[#allocation17_spill]]  ;;  %p25_p11 = scmp.ge.s32.totalorder %s11648_s23, 4  }
 0x5e0   : > { %s13590_s13 = smov %s11463_s14  ;;  %s13591_s14 = smov %s11467_s15 }
 0x5e1   : > { %s13593_s16 = smov %s11648_s23  ;;  %27 = sbr.rel (!%p25_p11) target bundleno = 12 (0xc), region = 146 }
 0x5e5   : > { %s13592_s15 = smov %s13589_s6 }
 0x5e6   :  { %10850 = vsyncpa [#allocation4], 1 }
 0x5e7   :  { %10852 = vsyncpa [#allocation4 + $0x1], 1 }
 0x5e8   :  { %10853 = vsyncpa [#allocation7], 1 }
 0x5e9   :  { %10854 = vsyncpa [#allocation10], 1 }
 0x5ea   :  { %10855 = vsyncpa [#allocation5], 1 }
 0x5eb   :  { %10857 = vsyncpa [#allocation5 + $0x1], 1 }

</bundles_post_ra>
